<compile_context>
chip_gen: v5e
topology: v5e:2x2
jax: 0.10.0
libtpu: 0.0.40
codegen_flags: <defaults>
</compile_context>

<pallas_src>
import jax
import jax.numpy as jnp
from jax.experimental import pallas as pl
from jax.experimental.pallas import tpu as pltpu

# Mirror RNNEncoder.__init__ defaults
INPUT_SIZE = 1
HIDDEN = 4
LAYERS = 5


def _lstm_stack_kernel(x_ref, wih_ref, whh_ref, b_ref, out_ref, seq_buf):
    """Stacked-LSTM recurrence, fully resident in VMEM.

    x_ref   : (T*B, H)  time-major rows (row = t*B + b), features zero-padded to H
    wih_ref : (L, H, 4H) input->gate weights (pre-transposed; layer 0 zero-padded)
    whh_ref : (L, H, 4H) hidden->gate weights (pre-transposed)
    b_ref   : (L, 1, 4H) combined bias (b_ih + b_hh)
    out_ref : (B, H)     final hidden state of the last layer
    seq_buf : (T*B, H)   current layer's input sequence (overwritten with its output)
    """
    TB, H = x_ref.shape
    L = wih_ref.shape[0]
    B = out_ref.shape[0]
    T = TB // B

    # Seed the sequence buffer with the (padded) model input.
    seq_buf[...] = x_ref[...]

    h = jnp.zeros((B, H), jnp.float32)
    for l in range(L):                      # static unroll: static weight slices
        w_hh = whh_ref[l]                   # (H, 4H), loaded once per layer
        # Hoisted input projection + bias: one matmul for all T timesteps.
        x_proj = (jnp.dot(seq_buf[...], wih_ref[l],
                          preferred_element_type=jnp.float32)
                  + b_ref[l])               # (T*B, 4H), gate order i|f|g|o
        h = jnp.zeros((B, H), jnp.float32)
        c = jnp.zeros((B, H), jnp.float32)
        last_layer = (l == L - 1)

        for t in range(T):                  # static unroll: h/c live in vregs
            gates = (x_proj[t * B:(t + 1) * B, :]
                     + jnp.dot(h, w_hh, preferred_element_type=jnp.float32))  # (B, 4H)
            # One sigmoid + one tanh over the full gate vector, then slice.
            s = jax.nn.sigmoid(gates)
            u = jnp.tanh(gates)
            i_g = s[:, 0 * H:1 * H]
            f_g = s[:, 1 * H:2 * H]
            g_g = u[:, 2 * H:3 * H]
            o_g = s[:, 3 * H:4 * H]
            c = f_g * c + i_g * g_g
            h = o_g * jnp.tanh(c)
            if not last_layer:
                # Becomes the next layer's input row block; skipped on last layer.
                seq_buf[t * B:(t + 1) * B, :] = h

    out_ref[...] = h


def rnn_encoder_forward(x, params):
    """x: (B, T, INPUT_SIZE) float32 -> (B, HIDDEN) float32."""
    wih, whh, bias = params
    B, T, _ = x.shape
    H = HIDDEN
    # Glue: zero-pad feature dim to H and go time-major, flattened to (T*B, H).
    x_pad = jnp.zeros((B, T, H), jnp.float32).at[:, :, :INPUT_SIZE].set(x)
    x_rows = jnp.transpose(x_pad, (1, 0, 2)).reshape(T * B, H)

    out = pl.pallas_call(
        _lstm_stack_kernel,
        out_shape=jax.ShapeDtypeStruct((B, H), jnp.float32),
        in_specs=[pl.BlockSpec(memory_space=pltpu.MemorySpace.VMEM)] * 4,
        out_specs=pl.BlockSpec(memory_space=pltpu.MemorySpace.VMEM),
        scratch_shapes=[
            pltpu.VMEM((T * B, H), jnp.float32),   # seq_buf
        ],
    )(x_rows, wih, whh, bias)
    return out


def init_params(key):
    """Deterministic synthetic LSTM params, PyTorch-style uniform(-1/sqrt(H), 1/sqrt(H))."""
    H = HIDDEN
    bound = 1.0 / float(jnp.sqrt(jnp.float32(H)))
    keys = jax.random.split(key, 4 * LAYERS)
    wih_list, whh_list, b_list = [], [], []
    for l in range(LAYERS):
        in_dim = INPUT_SIZE if l == 0 else H
        k0, k1, k2, k3 = keys[4 * l:4 * l + 4]
        w_ih = jax.random.uniform(k0, (4 * H, in_dim), jnp.float32, -bound, bound)
        w_hh = jax.random.uniform(k1, (4 * H, H), jnp.float32, -bound, bound)
        b_ih = jax.random.uniform(k2, (4 * H,), jnp.float32, -bound, bound)
        b_hh = jax.random.uniform(k3, (4 * H,), jnp.float32, -bound, bound)
        # Zero-pad layer-0 input weights so every layer has shape (4H, H);
        # the padded input features are zero, so the result is identical.
        w_ih_pad = jnp.zeros((4 * H, H), jnp.float32).at[:, :in_dim].set(w_ih)
        wih_list.append(w_ih_pad.T)            # (H, 4H)
        whh_list.append(w_hh.T)                # (H, 4H)
        b_list.append((b_ih + b_hh)[None, :])  # (1, 4H)
    return (jnp.stack(wih_list), jnp.stack(whh_list), jnp.stack(b_list))


def rnn_encoder_reference(x, params):
    """Pure-JAX reference of the same stacked LSTM (for correctness check)."""
    wih, whh, bias = params
    B, T, _ = x.shape
    H = HIDDEN
    seq = jnp.zeros((B, T, H), jnp.float32).at[:, :, :INPUT_SIZE].set(x)
    h = jnp.zeros((B, H), jnp.float32)
    for l in range(LAYERS):
        h = jnp.zeros((B, H), jnp.float32)
        c = jnp.zeros((B, H), jnp.float32)
        outs = []
        for t in range(T):
            gates = seq[:, t] @ wih[l] + h @ whh[l] + bias[l]
            i_g = jax.nn.sigmoid(gates[:, :H])
            f_g = jax.nn.sigmoid(gates[:, H:2 * H])
            g_g = jnp.tanh(gates[:, 2 * H:3 * H])
            o_g = jax.nn.sigmoid(gates[:, 3 * H:])
            c = f_g * c + i_g * g_g
            h = o_g * jnp.tanh(c)
            outs.append(h)
        seq = jnp.stack(outs, axis=1)
    return h


if __name__ == "__main__":
    key = jax.random.PRNGKey(0)
    k_param, k_x = jax.random.split(key)

    B, T = 2, 8
    x = jax.random.normal(k_x, (B, T, INPUT_SIZE), jnp.float32)
    params = init_params(k_param)

    out = rnn_encoder_forward(x, params)
    out = jax.block_until_ready(out)

    ref = rnn_encoder_reference(x, params)
    assert out.shape == (B, HIDDEN)
    assert jnp.allclose(out, ref, atol=1e-5, rtol=1e-5), (out, ref)

    print("KERNEL_OK")
</pallas_src>

<mosaic_0001>
module attributes {stable_mosaic.version = 11 : i64} {
  func.func @_lstm_stack_kernel(%arg0: memref<16x4xf32, #tpu.memory_space<vmem>>, %arg1: memref<5x4x16xf32, #tpu.memory_space<vmem>>, %arg2: memref<5x4x16xf32, #tpu.memory_space<vmem>>, %arg3: memref<5x1x16xf32, #tpu.memory_space<vmem>>, %arg4: memref<2x4xf32, #tpu.memory_space<vmem>>, %arg5: memref<16x4xf32, #tpu.memory_space<vmem>>) attributes {dimension_semantics = [], scalar_prefetch = 0 : i64, scratch_operands = 1 : i64, tpu.core_type = #tpu.core_type<tc>} {
    %c0 = arith.constant 0 : index
    %c0_0 = arith.constant 0 : index
    %0 = vector.load %arg0[%c0, %c0_0] : memref<16x4xf32, #tpu.memory_space<vmem>>, vector<16x4xf32>
    %c0_1 = arith.constant 0 : index
    %c0_2 = arith.constant 0 : index
    %1 = vector.load %arg5[%c0_1, %c0_2] : memref<16x4xf32, #tpu.memory_space<vmem>>, vector<16x4xf32>
    tpu.vector_store %arg5[%c0_1, %c0_2], %0 {strides = array<i32>} : memref<16x4xf32, #tpu.memory_space<vmem>>, vector<16x4xf32>,
    %c0_3 = arith.constant 0 : index
    %c0_4 = arith.constant 0 : index
    %c0_5 = arith.constant 0 : index
    %2 = vector.load %arg2[%c0_3, %c0_4, %c0_5] : memref<5x4x16xf32, #tpu.memory_space<vmem>>, vector<1x4x16xf32>
    %3 = vector.shape_cast %2 : vector<1x4x16xf32> to vector<4x16xf32>
    %c0_6 = arith.constant 0 : index
    %c0_7 = arith.constant 0 : index
    %4 = vector.load %arg5[%c0_6, %c0_7] : memref<16x4xf32, #tpu.memory_space<vmem>>, vector<16x4xf32>
    %c0_8 = arith.constant 0 : index
    %c0_9 = arith.constant 0 : index
    %c0_10 = arith.constant 0 : index
    %5 = vector.load %arg1[%c0_8, %c0_9, %c0_10] : memref<5x4x16xf32, #tpu.memory_space<vmem>>, vector<1x4x16xf32>
    %6 = vector.shape_cast %5 : vector<1x4x16xf32> to vector<4x16xf32>
    %cst = arith.constant dense<0.000000e+00> : vector<16x16xf32>
    %7 = tpu.matmul %4, %6, %cst {dimension_numbers = #tpu.dot_dimension_numbers<[1], [0], [0], [1], [0, 0, 1, 1], [], []>} : vector<16x4xf32>, vector<4x16xf32>, vector<16x16xf32> -> vector<16x16xf32>
    %c0_11 = arith.constant 0 : index
    %c0_12 = arith.constant 0 : index
    %c0_13 = arith.constant 0 : index
    %8 = vector.load %arg3[%c0_11, %c0_12, %c0_13] : memref<5x1x16xf32, #tpu.memory_space<vmem>>, vector<1x1x16xf32>
    %9 = vector.shape_cast %8 : vector<1x1x16xf32> to vector<1x16xf32>
    %10 = vector.broadcast %9 : vector<1x16xf32> to vector<16x16xf32>
    %11 = arith.addf %7, %10 : vector<16x16xf32>
    %cst_14 = arith.constant 0.000000e+00 : f32
    %12 = vector.broadcast %cst_14 : f32 to vector<2x4xf32>
    %cst_15 = arith.constant 0.000000e+00 : f32
    %13 = vector.broadcast %cst_15 : f32 to vector<2x4xf32>
    %14 = vector.extract_strided_slice %11 {offsets = [0, 0], sizes = [2, 16], strides = [1, 1]} : vector<16x16xf32> to vector<2x16xf32>
    %cst_16 = arith.constant dense<0.000000e+00> : vector<2x16xf32>
    %15 = tpu.matmul %12, %3, %cst_16 {dimension_numbers = #tpu.dot_dimension_numbers<[1], [0], [0], [1], [0, 0, 1, 1], [], []>} : vector<2x4xf32>, vector<4x16xf32>, vector<2x16xf32> -> vector<2x16xf32>
    %16 = arith.addf %14, %15 : vector<2x16xf32>
    %17 = arith.negf %16 : vector<2x16xf32>
    %18 = math.exp %17 : vector<2x16xf32>
    %cst_17 = arith.constant 1.000000e+00 : f32
    %19 = vector.broadcast %cst_17 : f32 to vector<2x16xf32>
    %20 = arith.addf %19, %18 : vector<2x16xf32>
    %21 = arith.divf %19, %20 : vector<2x16xf32>
    %22 = math.tanh %16 : vector<2x16xf32>
    %23 = vector.extract_strided_slice %21 {offsets = [0, 0], sizes = [2, 4], strides = [1, 1]} : vector<2x16xf32> to vector<2x4xf32>
    %24 = vector.extract_strided_slice %21 {offsets = [0, 4], sizes = [2, 4], strides = [1, 1]} : vector<2x16xf32> to vector<2x4xf32>
    %25 = vector.extract_strided_slice %22 {offsets = [0, 8], sizes = [2, 4], strides = [1, 1]} : vector<2x16xf32> to vector<2x4xf32>
    %26 = vector.extract_strided_slice %21 {offsets = [0, 12], sizes = [2, 4], strides = [1, 1]} : vector<2x16xf32> to vector<2x4xf32>
    %27 = arith.mulf %24, %13 : vector<2x4xf32>
    %28 = arith.mulf %23, %25 : vector<2x4xf32>
    %29 = arith.addf %27, %28 : vector<2x4xf32>
    %30 = math.tanh %29 : vector<2x4xf32>
    %31 = arith.mulf %26, %30 : vector<2x4xf32>
    %c0_18 = arith.constant 0 : index
    %c0_19 = arith.constant 0 : index
    %32 = vector.load %arg5[%c0_18, %c0_19] : memref<16x4xf32, #tpu.memory_space<vmem>>, vector<2x4xf32>
    tpu.vector_store %arg5[%c0_18, %c0_19], %31 {strides = array<i32>} : memref<16x4xf32, #tpu.memory_space<vmem>>, vector<2x4xf32>,
    %33 = vector.extract_strided_slice %11 {offsets = [2, 0], sizes = [2, 16], strides = [1, 1]} : vector<16x16xf32> to vector<2x16xf32>
    %cst_20 = arith.constant dense<0.000000e+00> : vector<2x16xf32>
    %34 = tpu.matmul %31, %3, %cst_20 {dimension_numbers = #tpu.dot_dimension_numbers<[1], [0], [0], [1], [0, 0, 1, 1], [], []>} : vector<2x4xf32>, vector<4x16xf32>, vector<2x16xf32> -> vector<2x16xf32>
    %35 = arith.addf %33, %34 : vector<2x16xf32>
    %36 = arith.negf %35 : vector<2x16xf32>
    %37 = math.exp %36 : vector<2x16xf32>
    %cst_21 = arith.constant 1.000000e+00 : f32
    %38 = vector.broadcast %cst_21 : f32 to vector<2x16xf32>
    %39 = arith.addf %38, %37 : vector<2x16xf32>
    %40 = arith.divf %38, %39 : vector<2x16xf32>
    %41 = math.tanh %35 : vector<2x16xf32>
    %42 = vector.extract_strided_slice %40 {offsets = [0, 0], sizes = [2, 4], strides = [1, 1]} : vector<2x16xf32> to vector<2x4xf32>
    %43 = vector.extract_strided_slice %40 {offsets = [0, 4], sizes = [2, 4], strides = [1, 1]} : vector<2x16xf32> to vector<2x4xf32>
    %44 = vector.extract_strided_slice %41 {offsets = [0, 8], sizes = [2, 4], strides = [1, 1]} : vector<2x16xf32> to vector<2x4xf32>
    %45 = vector.extract_strided_slice %40 {offsets = [0, 12], sizes = [2, 4], strides = [1, 1]} : vector<2x16xf32> to vector<2x4xf32>
    %46 = arith.mulf %43, %29 : vector<2x4xf32>
    %47 = arith.mulf %42, %44 : vector<2x4xf32>
    %48 = arith.addf %46, %47 : vector<2x4xf32>
    %49 = math.tanh %48 : vector<2x4xf32>
    %50 = arith.mulf %45, %49 : vector<2x4xf32>
    %c2 = arith.constant 2 : index
    %c0_22 = arith.constant 0 : index
    %51 = vector.load %arg5[%c2, %c0_22] : memref<16x4xf32, #tpu.memory_space<vmem>>, vector<2x4xf32>
    tpu.vector_store %arg5[%c2, %c0_22], %50 {strides = array<i32>} : memref<16x4xf32, #tpu.memory_space<vmem>>, vector<2x4xf32>,
    %52 = vector.extract_strided_slice %11 {offsets = [4, 0], sizes = [2, 16], strides = [1, 1]} : vector<16x16xf32> to vector<2x16xf32>
    %cst_23 = arith.constant dense<0.000000e+00> : vector<2x16xf32>
    %53 = tpu.matmul %50, %3, %cst_23 {dimension_numbers = #tpu.dot_dimension_numbers<[1], [0], [0], [1], [0, 0, 1, 1], [], []>} : vector<2x4xf32>, vector<4x16xf32>, vector<2x16xf32> -> vector<2x16xf32>
    %54 = arith.addf %52, %53 : vector<2x16xf32>
    %55 = arith.negf %54 : vector<2x16xf32>
    %56 = math.exp %55 : vector<2x16xf32>
    %cst_24 = arith.constant 1.000000e+00 : f32
    %57 = vector.broadcast %cst_24 : f32 to vector<2x16xf32>
    %58 = arith.addf %57, %56 : vector<2x16xf32>
    %59 = arith.divf %57, %58 : vector<2x16xf32>
    %60 = math.tanh %54 : vector<2x16xf32>
    %61 = vector.extract_strided_slice %59 {offsets = [0, 0], sizes = [2, 4], strides = [1, 1]} : vector<2x16xf32> to vector<2x4xf32>
    %62 = vector.extract_strided_slice %59 {offsets = [0, 4], sizes = [2, 4], strides = [1, 1]} : vector<2x16xf32> to vector<2x4xf32>
    %63 = vector.extract_strided_slice %60 {offsets = [0, 8], sizes = [2, 4], strides = [1, 1]} : vector<2x16xf32> to vector<2x4xf32>
    %64 = vector.extract_strided_slice %59 {offsets = [0, 12], sizes = [2, 4], strides = [1, 1]} : vector<2x16xf32> to vector<2x4xf32>
    %65 = arith.mulf %62, %48 : vector<2x4xf32>
    %66 = arith.mulf %61, %63 : vector<2x4xf32>
    %67 = arith.addf %65, %66 : vector<2x4xf32>
    %68 = math.tanh %67 : vector<2x4xf32>
    %69 = arith.mulf %64, %68 : vector<2x4xf32>
    %c4 = arith.constant 4 : index
    %c0_25 = arith.constant 0 : index
    %70 = vector.load %arg5[%c4, %c0_25] : memref<16x4xf32, #tpu.memory_space<vmem>>, vector<2x4xf32>
    tpu.vector_store %arg5[%c4, %c0_25], %69 {strides = array<i32>} : memref<16x4xf32, #tpu.memory_space<vmem>>, vector<2x4xf32>,
    %71 = vector.extract_strided_slice %11 {offsets = [6, 0], sizes = [2, 16], strides = [1, 1]} : vector<16x16xf32> to vector<2x16xf32>
    %cst_26 = arith.constant dense<0.000000e+00> : vector<2x16xf32>
    %72 = tpu.matmul %69, %3, %cst_26 {dimension_numbers = #tpu.dot_dimension_numbers<[1], [0], [0], [1], [0, 0, 1, 1], [], []>} : vector<2x4xf32>, vector<4x16xf32>, vector<2x16xf32> -> vector<2x16xf32>
    %73 = arith.addf %71, %72 : vector<2x16xf32>
    %74 = arith.negf %73 : vector<2x16xf32>
    %75 = math.exp %74 : vector<2x16xf32>
    %cst_27 = arith.constant 1.000000e+00 : f32
    %76 = vector.broadcast %cst_27 : f32 to vector<2x16xf32>
    %77 = arith.addf %76, %75 : vector<2x16xf32>
    %78 = arith.divf %76, %77 : vector<2x16xf32>
    %79 = math.tanh %73 : vector<2x16xf32>
    %80 = vector.extract_strided_slice %78 {offsets = [0, 0], sizes = [2, 4], strides = [1, 1]} : vector<2x16xf32> to vector<2x4xf32>
    %81 = vector.extract_strided_slice %78 {offsets = [0, 4], sizes = [2, 4], strides = [1, 1]} : vector<2x16xf32> to vector<2x4xf32>
    %82 = vector.extract_strided_slice %79 {offsets = [0, 8], sizes = [2, 4], strides = [1, 1]} : vector<2x16xf32> to vector<2x4xf32>
    %83 = vector.extract_strided_slice %78 {offsets = [0, 12], sizes = [2, 4], strides = [1, 1]} : vector<2x16xf32> to vector<2x4xf32>
    %84 = arith.mulf %81, %67 : vector<2x4xf32>
    %85 = arith.mulf %80, %82 : vector<2x4xf32>
    %86 = arith.addf %84, %85 : vector<2x4xf32>
    %87 = math.tanh %86 : vector<2x4xf32>
    %88 = arith.mulf %83, %87 : vector<2x4xf32>
    %c6 = arith.constant 6 : index
    %c0_28 = arith.constant 0 : index
    %89 = vector.load %arg5[%c6, %c0_28] : memref<16x4xf32, #tpu.memory_space<vmem>>, vector<2x4xf32>
    tpu.vector_store %arg5[%c6, %c0_28], %88 {strides = array<i32>} : memref<16x4xf32, #tpu.memory_space<vmem>>, vector<2x4xf32>,
    %90 = vector.extract_strided_slice %11 {offsets = [8, 0], sizes = [2, 16], strides = [1, 1]} : vector<16x16xf32> to vector<2x16xf32>
    %cst_29 = arith.constant dense<0.000000e+00> : vector<2x16xf32>
    %91 = tpu.matmul %88, %3, %cst_29 {dimension_numbers = #tpu.dot_dimension_numbers<[1], [0], [0], [1], [0, 0, 1, 1], [], []>} : vector<2x4xf32>, vector<4x16xf32>, vector<2x16xf32> -> vector<2x16xf32>
    %92 = arith.addf %90, %91 : vector<2x16xf32>
    %93 = arith.negf %92 : vector<2x16xf32>
    %94 = math.exp %93 : vector<2x16xf32>
    %cst_30 = arith.constant 1.000000e+00 : f32
    %95 = vector.broadcast %cst_30 : f32 to vector<2x16xf32>
    %96 = arith.addf %95, %94 : vector<2x16xf32>
    %97 = arith.divf %95, %96 : vector<2x16xf32>
    %98 = math.tanh %92 : vector<2x16xf32>
    %99 = vector.extract_strided_slice %97 {offsets = [0, 0], sizes = [2, 4], strides = [1, 1]} : vector<2x16xf32> to vector<2x4xf32>
    %100 = vector.extract_strided_slice %97 {offsets = [0, 4], sizes = [2, 4], strides = [1, 1]} : vector<2x16xf32> to vector<2x4xf32>
    %101 = vector.extract_strided_slice %98 {offsets = [0, 8], sizes = [2, 4], strides = [1, 1]} : vector<2x16xf32> to vector<2x4xf32>
    %102 = vector.extract_strided_slice %97 {offsets = [0, 12], sizes = [2, 4], strides = [1, 1]} : vector<2x16xf32> to vector<2x4xf32>
    %103 = arith.mulf %100, %86 : vector<2x4xf32>
    %104 = arith.mulf %99, %101 : vector<2x4xf32>
    %105 = arith.addf %103, %104 : vector<2x4xf32>
    %106 = math.tanh %105 : vector<2x4xf32>
    %107 = arith.mulf %102, %106 : vector<2x4xf32>
    %c8 = arith.constant 8 : index
    %c0_31 = arith.constant 0 : index
    %108 = vector.load %arg5[%c8, %c0_31] : memref<16x4xf32, #tpu.memory_space<vmem>>, vector<2x4xf32>
    tpu.vector_store %arg5[%c8, %c0_31], %107 {strides = array<i32>} : memref<16x4xf32, #tpu.memory_space<vmem>>, vector<2x4xf32>,
    %109 = vector.extract_strided_slice %11 {offsets = [10, 0], sizes = [2, 16], strides = [1, 1]} : vector<16x16xf32> to vector<2x16xf32>
    %cst_32 = arith.constant dense<0.000000e+00> : vector<2x16xf32>
    %110 = tpu.matmul %107, %3, %cst_32 {dimension_numbers = #tpu.dot_dimension_numbers<[1], [0], [0], [1], [0, 0, 1, 1], [], []>} : vector<2x4xf32>, vector<4x16xf32>, vector<2x16xf32> -> vector<2x16xf32>
    %111 = arith.addf %109, %110 : vector<2x16xf32>
    %112 = arith.negf %111 : vector<2x16xf32>
    %113 = math.exp %112 : vector<2x16xf32>
    %cst_33 = arith.constant 1.000000e+00 : f32
    %114 = vector.broadcast %cst_33 : f32 to vector<2x16xf32>
    %115 = arith.addf %114, %113 : vector<2x16xf32>
    %116 = arith.divf %114, %115 : vector<2x16xf32>
    %117 = math.tanh %111 : vector<2x16xf32>
    %118 = vector.extract_strided_slice %116 {offsets = [0, 0], sizes = [2, 4], strides = [1, 1]} : vector<2x16xf32> to vector<2x4xf32>
    %119 = vector.extract_strided_slice %116 {offsets = [0, 4], sizes = [2, 4], strides = [1, 1]} : vector<2x16xf32> to vector<2x4xf32>
    %120 = vector.extract_strided_slice %117 {offsets = [0, 8], sizes = [2, 4], strides = [1, 1]} : vector<2x16xf32> to vector<2x4xf32>
    %121 = vector.extract_strided_slice %116 {offsets = [0, 12], sizes = [2, 4], strides = [1, 1]} : vector<2x16xf32> to vector<2x4xf32>
    %122 = arith.mulf %119, %105 : vector<2x4xf32>
    %123 = arith.mulf %118, %120 : vector<2x4xf32>
    %124 = arith.addf %122, %123 : vector<2x4xf32>
    %125 = math.tanh %124 : vector<2x4xf32>
    %126 = arith.mulf %121, %125 : vector<2x4xf32>
    %c10 = arith.constant 10 : index
    %c0_34 = arith.constant 0 : index
    %127 = vector.load %arg5[%c10, %c0_34] : memref<16x4xf32, #tpu.memory_space<vmem>>, vector<2x4xf32>
    tpu.vector_store %arg5[%c10, %c0_34], %126 {strides = array<i32>} : memref<16x4xf32, #tpu.memory_space<vmem>>, vector<2x4xf32>,
    %128 = vector.extract_strided_slice %11 {offsets = [12, 0], sizes = [2, 16], strides = [1, 1]} : vector<16x16xf32> to vector<2x16xf32>
    %cst_35 = arith.constant dense<0.000000e+00> : vector<2x16xf32>
    %129 = tpu.matmul %126, %3, %cst_35 {dimension_numbers = #tpu.dot_dimension_numbers<[1], [0], [0], [1], [0, 0, 1, 1], [], []>} : vector<2x4xf32>, vector<4x16xf32>, vector<2x16xf32> -> vector<2x16xf32>
    %130 = arith.addf %128, %129 : vector<2x16xf32>
    %131 = arith.negf %130 : vector<2x16xf32>
    %132 = math.exp %131 : vector<2x16xf32>
    %cst_36 = arith.constant 1.000000e+00 : f32
    %133 = vector.broadcast %cst_36 : f32 to vector<2x16xf32>
    %134 = arith.addf %133, %132 : vector<2x16xf32>
    %135 = arith.divf %133, %134 : vector<2x16xf32>
    %136 = math.tanh %130 : vector<2x16xf32>
    %137 = vector.extract_strided_slice %135 {offsets = [0, 0], sizes = [2, 4], strides = [1, 1]} : vector<2x16xf32> to vector<2x4xf32>
    %138 = vector.extract_strided_slice %135 {offsets = [0, 4], sizes = [2, 4], strides = [1, 1]} : vector<2x16xf32> to vector<2x4xf32>
    %139 = vector.extract_strided_slice %136 {offsets = [0, 8], sizes = [2, 4], strides = [1, 1]} : vector<2x16xf32> to vector<2x4xf32>
    %140 = vector.extract_strided_slice %135 {offsets = [0, 12], sizes = [2, 4], strides = [1, 1]} : vector<2x16xf32> to vector<2x4xf32>
    %141 = arith.mulf %138, %124 : vector<2x4xf32>
    %142 = arith.mulf %137, %139 : vector<2x4xf32>
    %143 = arith.addf %141, %142 : vector<2x4xf32>
    %144 = math.tanh %143 : vector<2x4xf32>
    %145 = arith.mulf %140, %144 : vector<2x4xf32>
    %c12 = arith.constant 12 : index
    %c0_37 = arith.constant 0 : index
    %146 = vector.load %arg5[%c12, %c0_37] : memref<16x4xf32, #tpu.memory_space<vmem>>, vector<2x4xf32>
    tpu.vector_store %arg5[%c12, %c0_37], %145 {strides = array<i32>} : memref<16x4xf32, #tpu.memory_space<vmem>>, vector<2x4xf32>,
    %147 = vector.extract_strided_slice %11 {offsets = [14, 0], sizes = [2, 16], strides = [1, 1]} : vector<16x16xf32> to vector<2x16xf32>
    %cst_38 = arith.constant dense<0.000000e+00> : vector<2x16xf32>
    %148 = tpu.matmul %145, %3, %cst_38 {dimension_numbers = #tpu.dot_dimension_numbers<[1], [0], [0], [1], [0, 0, 1, 1], [], []>} : vector<2x4xf32>, vector<4x16xf32>, vector<2x16xf32> -> vector<2x16xf32>
    %149 = arith.addf %147, %148 : vector<2x16xf32>
    %150 = arith.negf %149 : vector<2x16xf32>
    %151 = math.exp %150 : vector<2x16xf32>
    %cst_39 = arith.constant 1.000000e+00 : f32
    %152 = vector.broadcast %cst_39 : f32 to vector<2x16xf32>
    %153 = arith.addf %152, %151 : vector<2x16xf32>
    %154 = arith.divf %152, %153 : vector<2x16xf32>
    %155 = math.tanh %149 : vector<2x16xf32>
    %156 = vector.extract_strided_slice %154 {offsets = [0, 0], sizes = [2, 4], strides = [1, 1]} : vector<2x16xf32> to vector<2x4xf32>
    %157 = vector.extract_strided_slice %154 {offsets = [0, 4], sizes = [2, 4], strides = [1, 1]} : vector<2x16xf32> to vector<2x4xf32>
    %158 = vector.extract_strided_slice %155 {offsets = [0, 8], sizes = [2, 4], strides = [1, 1]} : vector<2x16xf32> to vector<2x4xf32>
    %159 = vector.extract_strided_slice %154 {offsets = [0, 12], sizes = [2, 4], strides = [1, 1]} : vector<2x16xf32> to vector<2x4xf32>
    %160 = arith.mulf %157, %143 : vector<2x4xf32>
    %161 = arith.mulf %156, %158 : vector<2x4xf32>
    %162 = arith.addf %160, %161 : vector<2x4xf32>
    %163 = math.tanh %162 : vector<2x4xf32>
    %164 = arith.mulf %159, %163 : vector<2x4xf32>
    %c14 = arith.constant 14 : index
    %c0_40 = arith.constant 0 : index
    %165 = vector.load %arg5[%c14, %c0_40] : memref<16x4xf32, #tpu.memory_space<vmem>>, vector<2x4xf32>
    tpu.vector_store %arg5[%c14, %c0_40], %164 {strides = array<i32>} : memref<16x4xf32, #tpu.memory_space<vmem>>, vector<2x4xf32>,
    %c1 = arith.constant 1 : index
    %c0_41 = arith.constant 0 : index
    %c0_42 = arith.constant 0 : index
    %166 = vector.load %arg2[%c1, %c0_41, %c0_42] : memref<5x4x16xf32, #tpu.memory_space<vmem>>, vector<1x4x16xf32>
    %167 = vector.shape_cast %166 : vector<1x4x16xf32> to vector<4x16xf32>
    %c0_43 = arith.constant 0 : index
    %c0_44 = arith.constant 0 : index
    %168 = vector.load %arg5[%c0_43, %c0_44] : memref<16x4xf32, #tpu.memory_space<vmem>>, vector<16x4xf32>
    %c1_45 = arith.constant 1 : index
    %c0_46 = arith.constant 0 : index
    %c0_47 = arith.constant 0 : index
    %169 = vector.load %arg1[%c1_45, %c0_46, %c0_47] : memref<5x4x16xf32, #tpu.memory_space<vmem>>, vector<1x4x16xf32>
    %170 = vector.shape_cast %169 : vector<1x4x16xf32> to vector<4x16xf32>
    %cst_48 = arith.constant dense<0.000000e+00> : vector<16x16xf32>
    %171 = tpu.matmul %168, %170, %cst_48 {dimension_numbers = #tpu.dot_dimension_numbers<[1], [0], [0], [1], [0, 0, 1, 1], [], []>} : vector<16x4xf32>, vector<4x16xf32>, vector<16x16xf32> -> vector<16x16xf32>
    %c1_49 = arith.constant 1 : index
    %c0_50 = arith.constant 0 : index
    %c0_51 = arith.constant 0 : index
    %172 = vector.load %arg3[%c1_49, %c0_50, %c0_51] : memref<5x1x16xf32, #tpu.memory_space<vmem>>, vector<1x1x16xf32>
    %173 = vector.shape_cast %172 : vector<1x1x16xf32> to vector<1x16xf32>
    %174 = vector.broadcast %173 : vector<1x16xf32> to vector<16x16xf32>
    %175 = arith.addf %171, %174 : vector<16x16xf32>
    %cst_52 = arith.constant 0.000000e+00 : f32
    %176 = vector.broadcast %cst_52 : f32 to vector<2x4xf32>
    %cst_53 = arith.constant 0.000000e+00 : f32
    %177 = vector.broadcast %cst_53 : f32 to vector<2x4xf32>
    %178 = vector.extract_strided_slice %175 {offsets = [0, 0], sizes = [2, 16], strides = [1, 1]} : vector<16x16xf32> to vector<2x16xf32>
    %cst_54 = arith.constant dense<0.000000e+00> : vector<2x16xf32>
    %179 = tpu.matmul %176, %167, %cst_54 {dimension_numbers = #tpu.dot_dimension_numbers<[1], [0], [0], [1], [0, 0, 1, 1], [], []>} : vector<2x4xf32>, vector<4x16xf32>, vector<2x16xf32> -> vector<2x16xf32>
    %180 = arith.addf %178, %179 : vector<2x16xf32>
    %181 = arith.negf %180 : vector<2x16xf32>
    %182 = math.exp %181 : vector<2x16xf32>
    %cst_55 = arith.constant 1.000000e+00 : f32
    %183 = vector.broadcast %cst_55 : f32 to vector<2x16xf32>
    %184 = arith.addf %183, %182 : vector<2x16xf32>
    %185 = arith.divf %183, %184 : vector<2x16xf32>
    %186 = math.tanh %180 : vector<2x16xf32>
    %187 = vector.extract_strided_slice %185 {offsets = [0, 0], sizes = [2, 4], strides = [1, 1]} : vector<2x16xf32> to vector<2x4xf32>
    %188 = vector.extract_strided_slice %185 {offsets = [0, 4], sizes = [2, 4], strides = [1, 1]} : vector<2x16xf32> to vector<2x4xf32>
    %189 = vector.extract_strided_slice %186 {offsets = [0, 8], sizes = [2, 4], strides = [1, 1]} : vector<2x16xf32> to vector<2x4xf32>
    %190 = vector.extract_strided_slice %185 {offsets = [0, 12], sizes = [2, 4], strides = [1, 1]} : vector<2x16xf32> to vector<2x4xf32>
    %191 = arith.mulf %188, %177 : vector<2x4xf32>
    %192 = arith.mulf %187, %189 : vector<2x4xf32>
    %193 = arith.addf %191, %192 : vector<2x4xf32>
    %194 = math.tanh %193 : vector<2x4xf32>
    %195 = arith.mulf %190, %194 : vector<2x4xf32>
    %c0_56 = arith.constant 0 : index
    %c0_57 = arith.constant 0 : index
    %196 = vector.load %arg5[%c0_56, %c0_57] : memref<16x4xf32, #tpu.memory_space<vmem>>, vector<2x4xf32>
    tpu.vector_store %arg5[%c0_56, %c0_57], %195 {strides = array<i32>} : memref<16x4xf32, #tpu.memory_space<vmem>>, vector<2x4xf32>,
    %197 = vector.extract_strided_slice %175 {offsets = [2, 0], sizes = [2, 16], strides = [1, 1]} : vector<16x16xf32> to vector<2x16xf32>
    %cst_58 = arith.constant dense<0.000000e+00> : vector<2x16xf32>
    %198 = tpu.matmul %195, %167, %cst_58 {dimension_numbers = #tpu.dot_dimension_numbers<[1], [0], [0], [1], [0, 0, 1, 1], [], []>} : vector<2x4xf32>, vector<4x16xf32>, vector<2x16xf32> -> vector<2x16xf32>
    %199 = arith.addf %197, %198 : vector<2x16xf32>
    %200 = arith.negf %199 : vector<2x16xf32>
    %201 = math.exp %200 : vector<2x16xf32>
    %cst_59 = arith.constant 1.000000e+00 : f32
    %202 = vector.broadcast %cst_59 : f32 to vector<2x16xf32>
    %203 = arith.addf %202, %201 : vector<2x16xf32>
    %204 = arith.divf %202, %203 : vector<2x16xf32>
    %205 = math.tanh %199 : vector<2x16xf32>
    %206 = vector.extract_strided_slice %204 {offsets = [0, 0], sizes = [2, 4], strides = [1, 1]} : vector<2x16xf32> to vector<2x4xf32>
    %207 = vector.extract_strided_slice %204 {offsets = [0, 4], sizes = [2, 4], strides = [1, 1]} : vector<2x16xf32> to vector<2x4xf32>
    %208 = vector.extract_strided_slice %205 {offsets = [0, 8], sizes = [2, 4], strides = [1, 1]} : vector<2x16xf32> to vector<2x4xf32>
    %209 = vector.extract_strided_slice %204 {offsets = [0, 12], sizes = [2, 4], strides = [1, 1]} : vector<2x16xf32> to vector<2x4xf32>
    %210 = arith.mulf %207, %193 : vector<2x4xf32>
    %211 = arith.mulf %206, %208 : vector<2x4xf32>
    %212 = arith.addf %210, %211 : vector<2x4xf32>
    %213 = math.tanh %212 : vector<2x4xf32>
    %214 = arith.mulf %209, %213 : vector<2x4xf32>
    %c2_60 = arith.constant 2 : index
    %c0_61 = arith.constant 0 : index
    %215 = vector.load %arg5[%c2_60, %c0_61] : memref<16x4xf32, #tpu.memory_space<vmem>>, vector<2x4xf32>
    tpu.vector_store %arg5[%c2_60, %c0_61], %214 {strides = array<i32>} : memref<16x4xf32, #tpu.memory_space<vmem>>, vector<2x4xf32>,
    %216 = vector.extract_strided_slice %175 {offsets = [4, 0], sizes = [2, 16], strides = [1, 1]} : vector<16x16xf32> to vector<2x16xf32>
    %cst_62 = arith.constant dense<0.000000e+00> : vector<2x16xf32>
    %217 = tpu.matmul %214, %167, %cst_62 {dimension_numbers = #tpu.dot_dimension_numbers<[1], [0], [0], [1], [0, 0, 1, 1], [], []>} : vector<2x4xf32>, vector<4x16xf32>, vector<2x16xf32> -> vector<2x16xf32>
    %218 = arith.addf %216, %217 : vector<2x16xf32>
    %219 = arith.negf %218 : vector<2x16xf32>
    %220 = math.exp %219 : vector<2x16xf32>
    %cst_63 = arith.constant 1.000000e+00 : f32
    %221 = vector.broadcast %cst_63 : f32 to vector<2x16xf32>
    %222 = arith.addf %221, %220 : vector<2x16xf32>
    %223 = arith.divf %221, %222 : vector<2x16xf32>
    %224 = math.tanh %218 : vector<2x16xf32>
    %225 = vector.extract_strided_slice %223 {offsets = [0, 0], sizes = [2, 4], strides = [1, 1]} : vector<2x16xf32> to vector<2x4xf32>
    %226 = vector.extract_strided_slice %223 {offsets = [0, 4], sizes = [2, 4], strides = [1, 1]} : vector<2x16xf32> to vector<2x4xf32>
    %227 = vector.extract_strided_slice %224 {offsets = [0, 8], sizes = [2, 4], strides = [1, 1]} : vector<2x16xf32> to vector<2x4xf32>
    %228 = vector.extract_strided_slice %223 {offsets = [0, 12], sizes = [2, 4], strides = [1, 1]} : vector<2x16xf32> to vector<2x4xf32>
    %229 = arith.mulf %226, %212 : vector<2x4xf32>
    %230 = arith.mulf %225, %227 : vector<2x4xf32>
    %231 = arith.addf %229, %230 : vector<2x4xf32>
    %232 = math.tanh %231 : vector<2x4xf32>
    %233 = arith.mulf %228, %232 : vector<2x4xf32>
    %c4_64 = arith.constant 4 : index
    %c0_65 = arith.constant 0 : index
    %234 = vector.load %arg5[%c4_64, %c0_65] : memref<16x4xf32, #tpu.memory_space<vmem>>, vector<2x4xf32>
    tpu.vector_store %arg5[%c4_64, %c0_65], %233 {strides = array<i32>} : memref<16x4xf32, #tpu.memory_space<vmem>>, vector<2x4xf32>,
    %235 = vector.extract_strided_slice %175 {offsets = [6, 0], sizes = [2, 16], strides = [1, 1]} : vector<16x16xf32> to vector<2x16xf32>
    %cst_66 = arith.constant dense<0.000000e+00> : vector<2x16xf32>
    %236 = tpu.matmul %233, %167, %cst_66 {dimension_numbers = #tpu.dot_dimension_numbers<[1], [0], [0], [1], [0, 0, 1, 1], [], []>} : vector<2x4xf32>, vector<4x16xf32>, vector<2x16xf32> -> vector<2x16xf32>
    %237 = arith.addf %235, %236 : vector<2x16xf32>
    %238 = arith.negf %237 : vector<2x16xf32>
    %239 = math.exp %238 : vector<2x16xf32>
    %cst_67 = arith.constant 1.000000e+00 : f32
    %240 = vector.broadcast %cst_67 : f32 to vector<2x16xf32>
    %241 = arith.addf %240, %239 : vector<2x16xf32>
    %242 = arith.divf %240, %241 : vector<2x16xf32>
    %243 = math.tanh %237 : vector<2x16xf32>
    %244 = vector.extract_strided_slice %242 {offsets = [0, 0], sizes = [2, 4], strides = [1, 1]} : vector<2x16xf32> to vector<2x4xf32>
    %245 = vector.extract_strided_slice %242 {offsets = [0, 4], sizes = [2, 4], strides = [1, 1]} : vector<2x16xf32> to vector<2x4xf32>
    %246 = vector.extract_strided_slice %243 {offsets = [0, 8], sizes = [2, 4], strides = [1, 1]} : vector<2x16xf32> to vector<2x4xf32>
    %247 = vector.extract_strided_slice %242 {offsets = [0, 12], sizes = [2, 4], strides = [1, 1]} : vector<2x16xf32> to vector<2x4xf32>
    %248 = arith.mulf %245, %231 : vector<2x4xf32>
    %249 = arith.mulf %244, %246 : vector<2x4xf32>
    %250 = arith.addf %248, %249 : vector<2x4xf32>
    %251 = math.tanh %250 : vector<2x4xf32>
    %252 = arith.mulf %247, %251 : vector<2x4xf32>
    %c6_68 = arith.constant 6 : index
    %c0_69 = arith.constant 0 : index
    %253 = vector.load %arg5[%c6_68, %c0_69] : memref<16x4xf32, #tpu.memory_space<vmem>>, vector<2x4xf32>
    tpu.vector_store %arg5[%c6_68, %c0_69], %252 {strides = array<i32>} : memref<16x4xf32, #tpu.memory_space<vmem>>, vector<2x4xf32>,
    %254 = vector.extract_strided_slice %175 {offsets = [8, 0], sizes = [2, 16], strides = [1, 1]} : vector<16x16xf32> to vector<2x16xf32>
    %cst_70 = arith.constant dense<0.000000e+00> : vector<2x16xf32>
    %255 = tpu.matmul %252, %167, %cst_70 {dimension_numbers = #tpu.dot_dimension_numbers<[1], [0], [0], [1], [0, 0, 1, 1], [], []>} : vector<2x4xf32>, vector<4x16xf32>, vector<2x16xf32> -> vector<2x16xf32>
    %256 = arith.addf %254, %255 : vector<2x16xf32>
    %257 = arith.negf %256 : vector<2x16xf32>
    %258 = math.exp %257 : vector<2x16xf32>
    %cst_71 = arith.constant 1.000000e+00 : f32
    %259 = vector.broadcast %cst_71 : f32 to vector<2x16xf32>
    %260 = arith.addf %259, %258 : vector<2x16xf32>
    %261 = arith.divf %259, %260 : vector<2x16xf32>
    %262 = math.tanh %256 : vector<2x16xf32>
    %263 = vector.extract_strided_slice %261 {offsets = [0, 0], sizes = [2, 4], strides = [1, 1]} : vector<2x16xf32> to vector<2x4xf32>
    %264 = vector.extract_strided_slice %261 {offsets = [0, 4], sizes = [2, 4], strides = [1, 1]} : vector<2x16xf32> to vector<2x4xf32>
    %265 = vector.extract_strided_slice %262 {offsets = [0, 8], sizes = [2, 4], strides = [1, 1]} : vector<2x16xf32> to vector<2x4xf32>
    %266 = vector.extract_strided_slice %261 {offsets = [0, 12], sizes = [2, 4], strides = [1, 1]} : vector<2x16xf32> to vector<2x4xf32>
    %267 = arith.mulf %264, %250 : vector<2x4xf32>
    %268 = arith.mulf %263, %265 : vector<2x4xf32>
    %269 = arith.addf %267, %268 : vector<2x4xf32>
    %270 = math.tanh %269 : vector<2x4xf32>
    %271 = arith.mulf %266, %270 : vector<2x4xf32>
    %c8_72 = arith.constant 8 : index
    %c0_73 = arith.constant 0 : index
    %272 = vector.load %arg5[%c8_72, %c0_73] : memref<16x4xf32, #tpu.memory_space<vmem>>, vector<2x4xf32>
    tpu.vector_store %arg5[%c8_72, %c0_73], %271 {strides = array<i32>} : memref<16x4xf32, #tpu.memory_space<vmem>>, vector<2x4xf32>,
    %273 = vector.extract_strided_slice %175 {offsets = [10, 0], sizes = [2, 16], strides = [1, 1]} : vector<16x16xf32> to vector<2x16xf32>
    %cst_74 = arith.constant dense<0.000000e+00> : vector<2x16xf32>
    %274 = tpu.matmul %271, %167, %cst_74 {dimension_numbers = #tpu.dot_dimension_numbers<[1], [0], [0], [1], [0, 0, 1, 1], [], []>} : vector<2x4xf32>, vector<4x16xf32>, vector<2x16xf32> -> vector<2x16xf32>
    %275 = arith.addf %273, %274 : vector<2x16xf32>
    %276 = arith.negf %275 : vector<2x16xf32>
    %277 = math.exp %276 : vector<2x16xf32>
    %cst_75 = arith.constant 1.000000e+00 : f32
    %278 = vector.broadcast %cst_75 : f32 to vector<2x16xf32>
    %279 = arith.addf %278, %277 : vector<2x16xf32>
    %280 = arith.divf %278, %279 : vector<2x16xf32>
    %281 = math.tanh %275 : vector<2x16xf32>
    %282 = vector.extract_strided_slice %280 {offsets = [0, 0], sizes = [2, 4], strides = [1, 1]} : vector<2x16xf32> to vector<2x4xf32>
    %283 = vector.extract_strided_slice %280 {offsets = [0, 4], sizes = [2, 4], strides = [1, 1]} : vector<2x16xf32> to vector<2x4xf32>
    %284 = vector.extract_strided_slice %281 {offsets = [0, 8], sizes = [2, 4], strides = [1, 1]} : vector<2x16xf32> to vector<2x4xf32>
    %285 = vector.extract_strided_slice %280 {offsets = [0, 12], sizes = [2, 4], strides = [1, 1]} : vector<2x16xf32> to vector<2x4xf32>
    %286 = arith.mulf %283, %269 : vector<2x4xf32>
    %287 = arith.mulf %282, %284 : vector<2x4xf32>
    %288 = arith.addf %286, %287 : vector<2x4xf32>
    %289 = math.tanh %288 : vector<2x4xf32>
    %290 = arith.mulf %285, %289 : vector<2x4xf32>
    %c10_76 = arith.constant 10 : index
    %c0_77 = arith.constant 0 : index
    %291 = vector.load %arg5[%c10_76, %c0_77] : memref<16x4xf32, #tpu.memory_space<vmem>>, vector<2x4xf32>
    tpu.vector_store %arg5[%c10_76, %c0_77], %290 {strides = array<i32>} : memref<16x4xf32, #tpu.memory_space<vmem>>, vector<2x4xf32>,
    %292 = vector.extract_strided_slice %175 {offsets = [12, 0], sizes = [2, 16], strides = [1, 1]} : vector<16x16xf32> to vector<2x16xf32>
    %cst_78 = arith.constant dense<0.000000e+00> : vector<2x16xf32>
    %293 = tpu.matmul %290, %167, %cst_78 {dimension_numbers = #tpu.dot_dimension_numbers<[1], [0], [0], [1], [0, 0, 1, 1], [], []>} : vector<2x4xf32>, vector<4x16xf32>, vector<2x16xf32> -> vector<2x16xf32>
    %294 = arith.addf %292, %293 : vector<2x16xf32>
    %295 = arith.negf %294 : vector<2x16xf32>
    %296 = math.exp %295 : vector<2x16xf32>
    %cst_79 = arith.constant 1.000000e+00 : f32
    %297 = vector.broadcast %cst_79 : f32 to vector<2x16xf32>
    %298 = arith.addf %297, %296 : vector<2x16xf32>
    %299 = arith.divf %297, %298 : vector<2x16xf32>
    %300 = math.tanh %294 : vector<2x16xf32>
    %301 = vector.extract_strided_slice %299 {offsets = [0, 0], sizes = [2, 4], strides = [1, 1]} : vector<2x16xf32> to vector<2x4xf32>
    %302 = vector.extract_strided_slice %299 {offsets = [0, 4], sizes = [2, 4], strides = [1, 1]} : vector<2x16xf32> to vector<2x4xf32>
    %303 = vector.extract_strided_slice %300 {offsets = [0, 8], sizes = [2, 4], strides = [1, 1]} : vector<2x16xf32> to vector<2x4xf32>
    %304 = vector.extract_strided_slice %299 {offsets = [0, 12], sizes = [2, 4], strides = [1, 1]} : vector<2x16xf32> to vector<2x4xf32>
    %305 = arith.mulf %302, %288 : vector<2x4xf32>
    %306 = arith.mulf %301, %303 : vector<2x4xf32>
    %307 = arith.addf %305, %306 : vector<2x4xf32>
    %308 = math.tanh %307 : vector<2x4xf32>
    %309 = arith.mulf %304, %308 : vector<2x4xf32>
    %c12_80 = arith.constant 12 : index
    %c0_81 = arith.constant 0 : index
    %310 = vector.load %arg5[%c12_80, %c0_81] : memref<16x4xf32, #tpu.memory_space<vmem>>, vector<2x4xf32>
    tpu.vector_store %arg5[%c12_80, %c0_81], %309 {strides = array<i32>} : memref<16x4xf32, #tpu.memory_space<vmem>>, vector<2x4xf32>,
    %311 = vector.extract_strided_slice %175 {offsets = [14, 0], sizes = [2, 16], strides = [1, 1]} : vector<16x16xf32> to vector<2x16xf32>
    %cst_82 = arith.constant dense<0.000000e+00> : vector<2x16xf32>
    %312 = tpu.matmul %309, %167, %cst_82 {dimension_numbers = #tpu.dot_dimension_numbers<[1], [0], [0], [1], [0, 0, 1, 1], [], []>} : vector<2x4xf32>, vector<4x16xf32>, vector<2x16xf32> -> vector<2x16xf32>
    %313 = arith.addf %311, %312 : vector<2x16xf32>
    %314 = arith.negf %313 : vector<2x16xf32>
    %315 = math.exp %314 : vector<2x16xf32>
    %cst_83 = arith.constant 1.000000e+00 : f32
    %316 = vector.broadcast %cst_83 : f32 to vector<2x16xf32>
    %317 = arith.addf %316, %315 : vector<2x16xf32>
    %318 = arith.divf %316, %317 : vector<2x16xf32>
    %319 = math.tanh %313 : vector<2x16xf32>
    %320 = vector.extract_strided_slice %318 {offsets = [0, 0], sizes = [2, 4], strides = [1, 1]} : vector<2x16xf32> to vector<2x4xf32>
    %321 = vector.extract_strided_slice %318 {offsets = [0, 4], sizes = [2, 4], strides = [1, 1]} : vector<2x16xf32> to vector<2x4xf32>
    %322 = vector.extract_strided_slice %319 {offsets = [0, 8], sizes = [2, 4], strides = [1, 1]} : vector<2x16xf32> to vector<2x4xf32>
    %323 = vector.extract_strided_slice %318 {offsets = [0, 12], sizes = [2, 4], strides = [1, 1]} : vector<2x16xf32> to vector<2x4xf32>
    %324 = arith.mulf %321, %307 : vector<2x4xf32>
    %325 = arith.mulf %320, %322 : vector<2x4xf32>
    %326 = arith.addf %324, %325 : vector<2x4xf32>
    %327 = math.tanh %326 : vector<2x4xf32>
    %328 = arith.mulf %323, %327 : vector<2x4xf32>
    %c14_84 = arith.constant 14 : index
    %c0_85 = arith.constant 0 : index
    %329 = vector.load %arg5[%c14_84, %c0_85] : memref<16x4xf32, #tpu.memory_space<vmem>>, vector<2x4xf32>
    tpu.vector_store %arg5[%c14_84, %c0_85], %328 {strides = array<i32>} : memref<16x4xf32, #tpu.memory_space<vmem>>, vector<2x4xf32>,
    %c2_86 = arith.constant 2 : index
    %c0_87 = arith.constant 0 : index
    %c0_88 = arith.constant 0 : index
    %330 = vector.load %arg2[%c2_86, %c0_87, %c0_88] : memref<5x4x16xf32, #tpu.memory_space<vmem>>, vector<1x4x16xf32>
    %331 = vector.shape_cast %330 : vector<1x4x16xf32> to vector<4x16xf32>
    %c0_89 = arith.constant 0 : index
    %c0_90 = arith.constant 0 : index
    %332 = vector.load %arg5[%c0_89, %c0_90] : memref<16x4xf32, #tpu.memory_space<vmem>>, vector<16x4xf32>
    %c2_91 = arith.constant 2 : index
    %c0_92 = arith.constant 0 : index
    %c0_93 = arith.constant 0 : index
    %333 = vector.load %arg1[%c2_91, %c0_92, %c0_93] : memref<5x4x16xf32, #tpu.memory_space<vmem>>, vector<1x4x16xf32>
    %334 = vector.shape_cast %333 : vector<1x4x16xf32> to vector<4x16xf32>
    %cst_94 = arith.constant dense<0.000000e+00> : vector<16x16xf32>
    %335 = tpu.matmul %332, %334, %cst_94 {dimension_numbers = #tpu.dot_dimension_numbers<[1], [0], [0], [1], [0, 0, 1, 1], [], []>} : vector<16x4xf32>, vector<4x16xf32>, vector<16x16xf32> -> vector<16x16xf32>
    %c2_95 = arith.constant 2 : index
    %c0_96 = arith.constant 0 : index
    %c0_97 = arith.constant 0 : index
    %336 = vector.load %arg3[%c2_95, %c0_96, %c0_97] : memref<5x1x16xf32, #tpu.memory_space<vmem>>, vector<1x1x16xf32>
    %337 = vector.shape_cast %336 : vector<1x1x16xf32> to vector<1x16xf32>
    %338 = vector.broadcast %337 : vector<1x16xf32> to vector<16x16xf32>
    %339 = arith.addf %335, %338 : vector<16x16xf32>
    %cst_98 = arith.constant 0.000000e+00 : f32
    %340 = vector.broadcast %cst_98 : f32 to vector<2x4xf32>
    %cst_99 = arith.constant 0.000000e+00 : f32
    %341 = vector.broadcast %cst_99 : f32 to vector<2x4xf32>
    %342 = vector.extract_strided_slice %339 {offsets = [0, 0], sizes = [2, 16], strides = [1, 1]} : vector<16x16xf32> to vector<2x16xf32>
    %cst_100 = arith.constant dense<0.000000e+00> : vector<2x16xf32>
    %343 = tpu.matmul %340, %331, %cst_100 {dimension_numbers = #tpu.dot_dimension_numbers<[1], [0], [0], [1], [0, 0, 1, 1], [], []>} : vector<2x4xf32>, vector<4x16xf32>, vector<2x16xf32> -> vector<2x16xf32>
    %344 = arith.addf %342, %343 : vector<2x16xf32>
    %345 = arith.negf %344 : vector<2x16xf32>
    %346 = math.exp %345 : vector<2x16xf32>
    %cst_101 = arith.constant 1.000000e+00 : f32
    %347 = vector.broadcast %cst_101 : f32 to vector<2x16xf32>
    %348 = arith.addf %347, %346 : vector<2x16xf32>
    %349 = arith.divf %347, %348 : vector<2x16xf32>
    %350 = math.tanh %344 : vector<2x16xf32>
    %351 = vector.extract_strided_slice %349 {offsets = [0, 0], sizes = [2, 4], strides = [1, 1]} : vector<2x16xf32> to vector<2x4xf32>
    %352 = vector.extract_strided_slice %349 {offsets = [0, 4], sizes = [2, 4], strides = [1, 1]} : vector<2x16xf32> to vector<2x4xf32>
    %353 = vector.extract_strided_slice %350 {offsets = [0, 8], sizes = [2, 4], strides = [1, 1]} : vector<2x16xf32> to vector<2x4xf32>
    %354 = vector.extract_strided_slice %349 {offsets = [0, 12], sizes = [2, 4], strides = [1, 1]} : vector<2x16xf32> to vector<2x4xf32>
    %355 = arith.mulf %352, %341 : vector<2x4xf32>
    %356 = arith.mulf %351, %353 : vector<2x4xf32>
    %357 = arith.addf %355, %356 : vector<2x4xf32>
    %358 = math.tanh %357 : vector<2x4xf32>
    %359 = arith.mulf %354, %358 : vector<2x4xf32>
    %c0_102 = arith.constant 0 : index
    %c0_103 = arith.constant 0 : index
    %360 = vector.load %arg5[%c0_102, %c0_103] : memref<16x4xf32, #tpu.memory_space<vmem>>, vector<2x4xf32>
    tpu.vector_store %arg5[%c0_102, %c0_103], %359 {strides = array<i32>} : memref<16x4xf32, #tpu.memory_space<vmem>>, vector<2x4xf32>,
    %361 = vector.extract_strided_slice %339 {offsets = [2, 0], sizes = [2, 16], strides = [1, 1]} : vector<16x16xf32> to vector<2x16xf32>
    %cst_104 = arith.constant dense<0.000000e+00> : vector<2x16xf32>
    %362 = tpu.matmul %359, %331, %cst_104 {dimension_numbers = #tpu.dot_dimension_numbers<[1], [0], [0], [1], [0, 0, 1, 1], [], []>} : vector<2x4xf32>, vector<4x16xf32>, vector<2x16xf32> -> vector<2x16xf32>
    %363 = arith.addf %361, %362 : vector<2x16xf32>
    %364 = arith.negf %363 : vector<2x16xf32>
    %365 = math.exp %364 : vector<2x16xf32>
    %cst_105 = arith.constant 1.000000e+00 : f32
    %366 = vector.broadcast %cst_105 : f32 to vector<2x16xf32>
    %367 = arith.addf %366, %365 : vector<2x16xf32>
    %368 = arith.divf %366, %367 : vector<2x16xf32>
    %369 = math.tanh %363 : vector<2x16xf32>
    %370 = vector.extract_strided_slice %368 {offsets = [0, 0], sizes = [2, 4], strides = [1, 1]} : vector<2x16xf32> to vector<2x4xf32>
    %371 = vector.extract_strided_slice %368 {offsets = [0, 4], sizes = [2, 4], strides = [1, 1]} : vector<2x16xf32> to vector<2x4xf32>
    %372 = vector.extract_strided_slice %369 {offsets = [0, 8], sizes = [2, 4], strides = [1, 1]} : vector<2x16xf32> to vector<2x4xf32>
    %373 = vector.extract_strided_slice %368 {offsets = [0, 12], sizes = [2, 4], strides = [1, 1]} : vector<2x16xf32> to vector<2x4xf32>
    %374 = arith.mulf %371, %357 : vector<2x4xf32>
    %375 = arith.mulf %370, %372 : vector<2x4xf32>
    %376 = arith.addf %374, %375 : vector<2x4xf32>
    %377 = math.tanh %376 : vector<2x4xf32>
    %378 = arith.mulf %373, %377 : vector<2x4xf32>
    %c2_106 = arith.constant 2 : index
    %c0_107 = arith.constant 0 : index
    %379 = vector.load %arg5[%c2_106, %c0_107] : memref<16x4xf32, #tpu.memory_space<vmem>>, vector<2x4xf32>
    tpu.vector_store %arg5[%c2_106, %c0_107], %378 {strides = array<i32>} : memref<16x4xf32, #tpu.memory_space<vmem>>, vector<2x4xf32>,
    %380 = vector.extract_strided_slice %339 {offsets = [4, 0], sizes = [2, 16], strides = [1, 1]} : vector<16x16xf32> to vector<2x16xf32>
    %cst_108 = arith.constant dense<0.000000e+00> : vector<2x16xf32>
    %381 = tpu.matmul %378, %331, %cst_108 {dimension_numbers = #tpu.dot_dimension_numbers<[1], [0], [0], [1], [0, 0, 1, 1], [], []>} : vector<2x4xf32>, vector<4x16xf32>, vector<2x16xf32> -> vector<2x16xf32>
    %382 = arith.addf %380, %381 : vector<2x16xf32>
    %383 = arith.negf %382 : vector<2x16xf32>
    %384 = math.exp %383 : vector<2x16xf32>
    %cst_109 = arith.constant 1.000000e+00 : f32
    %385 = vector.broadcast %cst_109 : f32 to vector<2x16xf32>
    %386 = arith.addf %385, %384 : vector<2x16xf32>
    %387 = arith.divf %385, %386 : vector<2x16xf32>
    %388 = math.tanh %382 : vector<2x16xf32>
    %389 = vector.extract_strided_slice %387 {offsets = [0, 0], sizes = [2, 4], strides = [1, 1]} : vector<2x16xf32> to vector<2x4xf32>
    %390 = vector.extract_strided_slice %387 {offsets = [0, 4], sizes = [2, 4], strides = [1, 1]} : vector<2x16xf32> to vector<2x4xf32>
    %391 = vector.extract_strided_slice %388 {offsets = [0, 8], sizes = [2, 4], strides = [1, 1]} : vector<2x16xf32> to vector<2x4xf32>
    %392 = vector.extract_strided_slice %387 {offsets = [0, 12], sizes = [2, 4], strides = [1, 1]} : vector<2x16xf32> to vector<2x4xf32>
    %393 = arith.mulf %390, %376 : vector<2x4xf32>
    %394 = arith.mulf %389, %391 : vector<2x4xf32>
    %395 = arith.addf %393, %394 : vector<2x4xf32>
    %396 = math.tanh %395 : vector<2x4xf32>
    %397 = arith.mulf %392, %396 : vector<2x4xf32>
    %c4_110 = arith.constant 4 : index
    %c0_111 = arith.constant 0 : index
    %398 = vector.load %arg5[%c4_110, %c0_111] : memref<16x4xf32, #tpu.memory_space<vmem>>, vector<2x4xf32>
    tpu.vector_store %arg5[%c4_110, %c0_111], %397 {strides = array<i32>} : memref<16x4xf32, #tpu.memory_space<vmem>>, vector<2x4xf32>,
    %399 = vector.extract_strided_slice %339 {offsets = [6, 0], sizes = [2, 16], strides = [1, 1]} : vector<16x16xf32> to vector<2x16xf32>
    %cst_112 = arith.constant dense<0.000000e+00> : vector<2x16xf32>
    %400 = tpu.matmul %397, %331, %cst_112 {dimension_numbers = #tpu.dot_dimension_numbers<[1], [0], [0], [1], [0, 0, 1, 1], [], []>} : vector<2x4xf32>, vector<4x16xf32>, vector<2x16xf32> -> vector<2x16xf32>
    %401 = arith.addf %399, %400 : vector<2x16xf32>
    %402 = arith.negf %401 : vector<2x16xf32>
    %403 = math.exp %402 : vector<2x16xf32>
    %cst_113 = arith.constant 1.000000e+00 : f32
    %404 = vector.broadcast %cst_113 : f32 to vector<2x16xf32>
    %405 = arith.addf %404, %403 : vector<2x16xf32>
    %406 = arith.divf %404, %405 : vector<2x16xf32>
    %407 = math.tanh %401 : vector<2x16xf32>
    %408 = vector.extract_strided_slice %406 {offsets = [0, 0], sizes = [2, 4], strides = [1, 1]} : vector<2x16xf32> to vector<2x4xf32>
    %409 = vector.extract_strided_slice %406 {offsets = [0, 4], sizes = [2, 4], strides = [1, 1]} : vector<2x16xf32> to vector<2x4xf32>
    %410 = vector.extract_strided_slice %407 {offsets = [0, 8], sizes = [2, 4], strides = [1, 1]} : vector<2x16xf32> to vector<2x4xf32>
    %411 = vector.extract_strided_slice %406 {offsets = [0, 12], sizes = [2, 4], strides = [1, 1]} : vector<2x16xf32> to vector<2x4xf32>
    %412 = arith.mulf %409, %395 : vector<2x4xf32>
    %413 = arith.mulf %408, %410 : vector<2x4xf32>
    %414 = arith.addf %412, %413 : vector<2x4xf32>
    %415 = math.tanh %414 : vector<2x4xf32>
    %416 = arith.mulf %411, %415 : vector<2x4xf32>
    %c6_114 = arith.constant 6 : index
    %c0_115 = arith.constant 0 : index
    %417 = vector.load %arg5[%c6_114, %c0_115] : memref<16x4xf32, #tpu.memory_space<vmem>>, vector<2x4xf32>
    tpu.vector_store %arg5[%c6_114, %c0_115], %416 {strides = array<i32>} : memref<16x4xf32, #tpu.memory_space<vmem>>, vector<2x4xf32>,
    %418 = vector.extract_strided_slice %339 {offsets = [8, 0], sizes = [2, 16], strides = [1, 1]} : vector<16x16xf32> to vector<2x16xf32>
    %cst_116 = arith.constant dense<0.000000e+00> : vector<2x16xf32>
    %419 = tpu.matmul %416, %331, %cst_116 {dimension_numbers = #tpu.dot_dimension_numbers<[1], [0], [0], [1], [0, 0, 1, 1], [], []>} : vector<2x4xf32>, vector<4x16xf32>, vector<2x16xf32> -> vector<2x16xf32>
    %420 = arith.addf %418, %419 : vector<2x16xf32>
    %421 = arith.negf %420 : vector<2x16xf32>
    %422 = math.exp %421 : vector<2x16xf32>
    %cst_117 = arith.constant 1.000000e+00 : f32
    %423 = vector.broadcast %cst_117 : f32 to vector<2x16xf32>
    %424 = arith.addf %423, %422 : vector<2x16xf32>
    %425 = arith.divf %423, %424 : vector<2x16xf32>
    %426 = math.tanh %420 : vector<2x16xf32>
    %427 = vector.extract_strided_slice %425 {offsets = [0, 0], sizes = [2, 4], strides = [1, 1]} : vector<2x16xf32> to vector<2x4xf32>
    %428 = vector.extract_strided_slice %425 {offsets = [0, 4], sizes = [2, 4], strides = [1, 1]} : vector<2x16xf32> to vector<2x4xf32>
    %429 = vector.extract_strided_slice %426 {offsets = [0, 8], sizes = [2, 4], strides = [1, 1]} : vector<2x16xf32> to vector<2x4xf32>
    %430 = vector.extract_strided_slice %425 {offsets = [0, 12], sizes = [2, 4], strides = [1, 1]} : vector<2x16xf32> to vector<2x4xf32>
    %431 = arith.mulf %428, %414 : vector<2x4xf32>
    %432 = arith.mulf %427, %429 : vector<2x4xf32>
    %433 = arith.addf %431, %432 : vector<2x4xf32>
    %434 = math.tanh %433 : vector<2x4xf32>
    %435 = arith.mulf %430, %434 : vector<2x4xf32>
    %c8_118 = arith.constant 8 : index
    %c0_119 = arith.constant 0 : index
    %436 = vector.load %arg5[%c8_118, %c0_119] : memref<16x4xf32, #tpu.memory_space<vmem>>, vector<2x4xf32>
    tpu.vector_store %arg5[%c8_118, %c0_119], %435 {strides = array<i32>} : memref<16x4xf32, #tpu.memory_space<vmem>>, vector<2x4xf32>,
    %437 = vector.extract_strided_slice %339 {offsets = [10, 0], sizes = [2, 16], strides = [1, 1]} : vector<16x16xf32> to vector<2x16xf32>
    %cst_120 = arith.constant dense<0.000000e+00> : vector<2x16xf32>
    %438 = tpu.matmul %435, %331, %cst_120 {dimension_numbers = #tpu.dot_dimension_numbers<[1], [0], [0], [1], [0, 0, 1, 1], [], []>} : vector<2x4xf32>, vector<4x16xf32>, vector<2x16xf32> -> vector<2x16xf32>
    %439 = arith.addf %437, %438 : vector<2x16xf32>
    %440 = arith.negf %439 : vector<2x16xf32>
    %441 = math.exp %440 : vector<2x16xf32>
    %cst_121 = arith.constant 1.000000e+00 : f32
    %442 = vector.broadcast %cst_121 : f32 to vector<2x16xf32>
    %443 = arith.addf %442, %441 : vector<2x16xf32>
    %444 = arith.divf %442, %443 : vector<2x16xf32>
    %445 = math.tanh %439 : vector<2x16xf32>
    %446 = vector.extract_strided_slice %444 {offsets = [0, 0], sizes = [2, 4], strides = [1, 1]} : vector<2x16xf32> to vector<2x4xf32>
    %447 = vector.extract_strided_slice %444 {offsets = [0, 4], sizes = [2, 4], strides = [1, 1]} : vector<2x16xf32> to vector<2x4xf32>
    %448 = vector.extract_strided_slice %445 {offsets = [0, 8], sizes = [2, 4], strides = [1, 1]} : vector<2x16xf32> to vector<2x4xf32>
    %449 = vector.extract_strided_slice %444 {offsets = [0, 12], sizes = [2, 4], strides = [1, 1]} : vector<2x16xf32> to vector<2x4xf32>
    %450 = arith.mulf %447, %433 : vector<2x4xf32>
    %451 = arith.mulf %446, %448 : vector<2x4xf32>
    %452 = arith.addf %450, %451 : vector<2x4xf32>
    %453 = math.tanh %452 : vector<2x4xf32>
    %454 = arith.mulf %449, %453 : vector<2x4xf32>
    %c10_122 = arith.constant 10 : index
    %c0_123 = arith.constant 0 : index
    %455 = vector.load %arg5[%c10_122, %c0_123] : memref<16x4xf32, #tpu.memory_space<vmem>>, vector<2x4xf32>
    tpu.vector_store %arg5[%c10_122, %c0_123], %454 {strides = array<i32>} : memref<16x4xf32, #tpu.memory_space<vmem>>, vector<2x4xf32>,
    %456 = vector.extract_strided_slice %339 {offsets = [12, 0], sizes = [2, 16], strides = [1, 1]} : vector<16x16xf32> to vector<2x16xf32>
    %cst_124 = arith.constant dense<0.000000e+00> : vector<2x16xf32>
    %457 = tpu.matmul %454, %331, %cst_124 {dimension_numbers = #tpu.dot_dimension_numbers<[1], [0], [0], [1], [0, 0, 1, 1], [], []>} : vector<2x4xf32>, vector<4x16xf32>, vector<2x16xf32> -> vector<2x16xf32>
    %458 = arith.addf %456, %457 : vector<2x16xf32>
    %459 = arith.negf %458 : vector<2x16xf32>
    %460 = math.exp %459 : vector<2x16xf32>
    %cst_125 = arith.constant 1.000000e+00 : f32
    %461 = vector.broadcast %cst_125 : f32 to vector<2x16xf32>
    %462 = arith.addf %461, %460 : vector<2x16xf32>
    %463 = arith.divf %461, %462 : vector<2x16xf32>
    %464 = math.tanh %458 : vector<2x16xf32>
    %465 = vector.extract_strided_slice %463 {offsets = [0, 0], sizes = [2, 4], strides = [1, 1]} : vector<2x16xf32> to vector<2x4xf32>
    %466 = vector.extract_strided_slice %463 {offsets = [0, 4], sizes = [2, 4], strides = [1, 1]} : vector<2x16xf32> to vector<2x4xf32>
    %467 = vector.extract_strided_slice %464 {offsets = [0, 8], sizes = [2, 4], strides = [1, 1]} : vector<2x16xf32> to vector<2x4xf32>
    %468 = vector.extract_strided_slice %463 {offsets = [0, 12], sizes = [2, 4], strides = [1, 1]} : vector<2x16xf32> to vector<2x4xf32>
    %469 = arith.mulf %466, %452 : vector<2x4xf32>
    %470 = arith.mulf %465, %467 : vector<2x4xf32>
    %471 = arith.addf %469, %470 : vector<2x4xf32>
    %472 = math.tanh %471 : vector<2x4xf32>
    %473 = arith.mulf %468, %472 : vector<2x4xf32>
    %c12_126 = arith.constant 12 : index
    %c0_127 = arith.constant 0 : index
    %474 = vector.load %arg5[%c12_126, %c0_127] : memref<16x4xf32, #tpu.memory_space<vmem>>, vector<2x4xf32>
    tpu.vector_store %arg5[%c12_126, %c0_127], %473 {strides = array<i32>} : memref<16x4xf32, #tpu.memory_space<vmem>>, vector<2x4xf32>,
    %475 = vector.extract_strided_slice %339 {offsets = [14, 0], sizes = [2, 16], strides = [1, 1]} : vector<16x16xf32> to vector<2x16xf32>
    %cst_128 = arith.constant dense<0.000000e+00> : vector<2x16xf32>
    %476 = tpu.matmul %473, %331, %cst_128 {dimension_numbers = #tpu.dot_dimension_numbers<[1], [0], [0], [1], [0, 0, 1, 1], [], []>} : vector<2x4xf32>, vector<4x16xf32>, vector<2x16xf32> -> vector<2x16xf32>
    %477 = arith.addf %475, %476 : vector<2x16xf32>
    %478 = arith.negf %477 : vector<2x16xf32>
    %479 = math.exp %478 : vector<2x16xf32>
    %cst_129 = arith.constant 1.000000e+00 : f32
    %480 = vector.broadcast %cst_129 : f32 to vector<2x16xf32>
    %481 = arith.addf %480, %479 : vector<2x16xf32>
    %482 = arith.divf %480, %481 : vector<2x16xf32>
    %483 = math.tanh %477 : vector<2x16xf32>
    %484 = vector.extract_strided_slice %482 {offsets = [0, 0], sizes = [2, 4], strides = [1, 1]} : vector<2x16xf32> to vector<2x4xf32>
    %485 = vector.extract_strided_slice %482 {offsets = [0, 4], sizes = [2, 4], strides = [1, 1]} : vector<2x16xf32> to vector<2x4xf32>
    %486 = vector.extract_strided_slice %483 {offsets = [0, 8], sizes = [2, 4], strides = [1, 1]} : vector<2x16xf32> to vector<2x4xf32>
    %487 = vector.extract_strided_slice %482 {offsets = [0, 12], sizes = [2, 4], strides = [1, 1]} : vector<2x16xf32> to vector<2x4xf32>
    %488 = arith.mulf %485, %471 : vector<2x4xf32>
    %489 = arith.mulf %484, %486 : vector<2x4xf32>
    %490 = arith.addf %488, %489 : vector<2x4xf32>
    %491 = math.tanh %490 : vector<2x4xf32>
    %492 = arith.mulf %487, %491 : vector<2x4xf32>
    %c14_130 = arith.constant 14 : index
    %c0_131 = arith.constant 0 : index
    %493 = vector.load %arg5[%c14_130, %c0_131] : memref<16x4xf32, #tpu.memory_space<vmem>>, vector<2x4xf32>
    tpu.vector_store %arg5[%c14_130, %c0_131], %492 {strides = array<i32>} : memref<16x4xf32, #tpu.memory_space<vmem>>, vector<2x4xf32>,
    %c3 = arith.constant 3 : index
    %c0_132 = arith.constant 0 : index
    %c0_133 = arith.constant 0 : index
    %494 = vector.load %arg2[%c3, %c0_132, %c0_133] : memref<5x4x16xf32, #tpu.memory_space<vmem>>, vector<1x4x16xf32>
    %495 = vector.shape_cast %494 : vector<1x4x16xf32> to vector<4x16xf32>
    %c0_134 = arith.constant 0 : index
    %c0_135 = arith.constant 0 : index
    %496 = vector.load %arg5[%c0_134, %c0_135] : memref<16x4xf32, #tpu.memory_space<vmem>>, vector<16x4xf32>
    %c3_136 = arith.constant 3 : index
    %c0_137 = arith.constant 0 : index
    %c0_138 = arith.constant 0 : index
    %497 = vector.load %arg1[%c3_136, %c0_137, %c0_138] : memref<5x4x16xf32, #tpu.memory_space<vmem>>, vector<1x4x16xf32>
    %498 = vector.shape_cast %497 : vector<1x4x16xf32> to vector<4x16xf32>
    %cst_139 = arith.constant dense<0.000000e+00> : vector<16x16xf32>
    %499 = tpu.matmul %496, %498, %cst_139 {dimension_numbers = #tpu.dot_dimension_numbers<[1], [0], [0], [1], [0, 0, 1, 1], [], []>} : vector<16x4xf32>, vector<4x16xf32>, vector<16x16xf32> -> vector<16x16xf32>
    %c3_140 = arith.constant 3 : index
    %c0_141 = arith.constant 0 : index
    %c0_142 = arith.constant 0 : index
    %500 = vector.load %arg3[%c3_140, %c0_141, %c0_142] : memref<5x1x16xf32, #tpu.memory_space<vmem>>, vector<1x1x16xf32>
    %501 = vector.shape_cast %500 : vector<1x1x16xf32> to vector<1x16xf32>
    %502 = vector.broadcast %501 : vector<1x16xf32> to vector<16x16xf32>
    %503 = arith.addf %499, %502 : vector<16x16xf32>
    %cst_143 = arith.constant 0.000000e+00 : f32
    %504 = vector.broadcast %cst_143 : f32 to vector<2x4xf32>
    %cst_144 = arith.constant 0.000000e+00 : f32
    %505 = vector.broadcast %cst_144 : f32 to vector<2x4xf32>
    %506 = vector.extract_strided_slice %503 {offsets = [0, 0], sizes = [2, 16], strides = [1, 1]} : vector<16x16xf32> to vector<2x16xf32>
    %cst_145 = arith.constant dense<0.000000e+00> : vector<2x16xf32>
    %507 = tpu.matmul %504, %495, %cst_145 {dimension_numbers = #tpu.dot_dimension_numbers<[1], [0], [0], [1], [0, 0, 1, 1], [], []>} : vector<2x4xf32>, vector<4x16xf32>, vector<2x16xf32> -> vector<2x16xf32>
    %508 = arith.addf %506, %507 : vector<2x16xf32>
    %509 = arith.negf %508 : vector<2x16xf32>
    %510 = math.exp %509 : vector<2x16xf32>
    %cst_146 = arith.constant 1.000000e+00 : f32
    %511 = vector.broadcast %cst_146 : f32 to vector<2x16xf32>
    %512 = arith.addf %511, %510 : vector<2x16xf32>
    %513 = arith.divf %511, %512 : vector<2x16xf32>
    %514 = math.tanh %508 : vector<2x16xf32>
    %515 = vector.extract_strided_slice %513 {offsets = [0, 0], sizes = [2, 4], strides = [1, 1]} : vector<2x16xf32> to vector<2x4xf32>
    %516 = vector.extract_strided_slice %513 {offsets = [0, 4], sizes = [2, 4], strides = [1, 1]} : vector<2x16xf32> to vector<2x4xf32>
    %517 = vector.extract_strided_slice %514 {offsets = [0, 8], sizes = [2, 4], strides = [1, 1]} : vector<2x16xf32> to vector<2x4xf32>
    %518 = vector.extract_strided_slice %513 {offsets = [0, 12], sizes = [2, 4], strides = [1, 1]} : vector<2x16xf32> to vector<2x4xf32>
    %519 = arith.mulf %516, %505 : vector<2x4xf32>
    %520 = arith.mulf %515, %517 : vector<2x4xf32>
    %521 = arith.addf %519, %520 : vector<2x4xf32>
    %522 = math.tanh %521 : vector<2x4xf32>
    %523 = arith.mulf %518, %522 : vector<2x4xf32>
    %c0_147 = arith.constant 0 : index
    %c0_148 = arith.constant 0 : index
    %524 = vector.load %arg5[%c0_147, %c0_148] : memref<16x4xf32, #tpu.memory_space<vmem>>, vector<2x4xf32>
    tpu.vector_store %arg5[%c0_147, %c0_148], %523 {strides = array<i32>} : memref<16x4xf32, #tpu.memory_space<vmem>>, vector<2x4xf32>,
    %525 = vector.extract_strided_slice %503 {offsets = [2, 0], sizes = [2, 16], strides = [1, 1]} : vector<16x16xf32> to vector<2x16xf32>
    %cst_149 = arith.constant dense<0.000000e+00> : vector<2x16xf32>
    %526 = tpu.matmul %523, %495, %cst_149 {dimension_numbers = #tpu.dot_dimension_numbers<[1], [0], [0], [1], [0, 0, 1, 1], [], []>} : vector<2x4xf32>, vector<4x16xf32>, vector<2x16xf32> -> vector<2x16xf32>
    %527 = arith.addf %525, %526 : vector<2x16xf32>
    %528 = arith.negf %527 : vector<2x16xf32>
    %529 = math.exp %528 : vector<2x16xf32>
    %cst_150 = arith.constant 1.000000e+00 : f32
    %530 = vector.broadcast %cst_150 : f32 to vector<2x16xf32>
    %531 = arith.addf %530, %529 : vector<2x16xf32>
    %532 = arith.divf %530, %531 : vector<2x16xf32>
    %533 = math.tanh %527 : vector<2x16xf32>
    %534 = vector.extract_strided_slice %532 {offsets = [0, 0], sizes = [2, 4], strides = [1, 1]} : vector<2x16xf32> to vector<2x4xf32>
    %535 = vector.extract_strided_slice %532 {offsets = [0, 4], sizes = [2, 4], strides = [1, 1]} : vector<2x16xf32> to vector<2x4xf32>
    %536 = vector.extract_strided_slice %533 {offsets = [0, 8], sizes = [2, 4], strides = [1, 1]} : vector<2x16xf32> to vector<2x4xf32>
    %537 = vector.extract_strided_slice %532 {offsets = [0, 12], sizes = [2, 4], strides = [1, 1]} : vector<2x16xf32> to vector<2x4xf32>
    %538 = arith.mulf %535, %521 : vector<2x4xf32>
    %539 = arith.mulf %534, %536 : vector<2x4xf32>
    %540 = arith.addf %538, %539 : vector<2x4xf32>
    %541 = math.tanh %540 : vector<2x4xf32>
    %542 = arith.mulf %537, %541 : vector<2x4xf32>
    %c2_151 = arith.constant 2 : index
    %c0_152 = arith.constant 0 : index
    %543 = vector.load %arg5[%c2_151, %c0_152] : memref<16x4xf32, #tpu.memory_space<vmem>>, vector<2x4xf32>
    tpu.vector_store %arg5[%c2_151, %c0_152], %542 {strides = array<i32>} : memref<16x4xf32, #tpu.memory_space<vmem>>, vector<2x4xf32>,
    %544 = vector.extract_strided_slice %503 {offsets = [4, 0], sizes = [2, 16], strides = [1, 1]} : vector<16x16xf32> to vector<2x16xf32>
    %cst_153 = arith.constant dense<0.000000e+00> : vector<2x16xf32>
    %545 = tpu.matmul %542, %495, %cst_153 {dimension_numbers = #tpu.dot_dimension_numbers<[1], [0], [0], [1], [0, 0, 1, 1], [], []>} : vector<2x4xf32>, vector<4x16xf32>, vector<2x16xf32> -> vector<2x16xf32>
    %546 = arith.addf %544, %545 : vector<2x16xf32>
    %547 = arith.negf %546 : vector<2x16xf32>
    %548 = math.exp %547 : vector<2x16xf32>
    %cst_154 = arith.constant 1.000000e+00 : f32
    %549 = vector.broadcast %cst_154 : f32 to vector<2x16xf32>
    %550 = arith.addf %549, %548 : vector<2x16xf32>
    %551 = arith.divf %549, %550 : vector<2x16xf32>
    %552 = math.tanh %546 : vector<2x16xf32>
    %553 = vector.extract_strided_slice %551 {offsets = [0, 0], sizes = [2, 4], strides = [1, 1]} : vector<2x16xf32> to vector<2x4xf32>
    %554 = vector.extract_strided_slice %551 {offsets = [0, 4], sizes = [2, 4], strides = [1, 1]} : vector<2x16xf32> to vector<2x4xf32>
    %555 = vector.extract_strided_slice %552 {offsets = [0, 8], sizes = [2, 4], strides = [1, 1]} : vector<2x16xf32> to vector<2x4xf32>
    %556 = vector.extract_strided_slice %551 {offsets = [0, 12], sizes = [2, 4], strides = [1, 1]} : vector<2x16xf32> to vector<2x4xf32>
    %557 = arith.mulf %554, %540 : vector<2x4xf32>
    %558 = arith.mulf %553, %555 : vector<2x4xf32>
    %559 = arith.addf %557, %558 : vector<2x4xf32>
    %560 = math.tanh %559 : vector<2x4xf32>
    %561 = arith.mulf %556, %560 : vector<2x4xf32>
    %c4_155 = arith.constant 4 : index
    %c0_156 = arith.constant 0 : index
    %562 = vector.load %arg5[%c4_155, %c0_156] : memref<16x4xf32, #tpu.memory_space<vmem>>, vector<2x4xf32>
    tpu.vector_store %arg5[%c4_155, %c0_156], %561 {strides = array<i32>} : memref<16x4xf32, #tpu.memory_space<vmem>>, vector<2x4xf32>,
    %563 = vector.extract_strided_slice %503 {offsets = [6, 0], sizes = [2, 16], strides = [1, 1]} : vector<16x16xf32> to vector<2x16xf32>
    %cst_157 = arith.constant dense<0.000000e+00> : vector<2x16xf32>
    %564 = tpu.matmul %561, %495, %cst_157 {dimension_numbers = #tpu.dot_dimension_numbers<[1], [0], [0], [1], [0, 0, 1, 1], [], []>} : vector<2x4xf32>, vector<4x16xf32>, vector<2x16xf32> -> vector<2x16xf32>
    %565 = arith.addf %563, %564 : vector<2x16xf32>
    %566 = arith.negf %565 : vector<2x16xf32>
    %567 = math.exp %566 : vector<2x16xf32>
    %cst_158 = arith.constant 1.000000e+00 : f32
    %568 = vector.broadcast %cst_158 : f32 to vector<2x16xf32>
    %569 = arith.addf %568, %567 : vector<2x16xf32>
    %570 = arith.divf %568, %569 : vector<2x16xf32>
    %571 = math.tanh %565 : vector<2x16xf32>
    %572 = vector.extract_strided_slice %570 {offsets = [0, 0], sizes = [2, 4], strides = [1, 1]} : vector<2x16xf32> to vector<2x4xf32>
    %573 = vector.extract_strided_slice %570 {offsets = [0, 4], sizes = [2, 4], strides = [1, 1]} : vector<2x16xf32> to vector<2x4xf32>
    %574 = vector.extract_strided_slice %571 {offsets = [0, 8], sizes = [2, 4], strides = [1, 1]} : vector<2x16xf32> to vector<2x4xf32>
    %575 = vector.extract_strided_slice %570 {offsets = [0, 12], sizes = [2, 4], strides = [1, 1]} : vector<2x16xf32> to vector<2x4xf32>
    %576 = arith.mulf %573, %559 : vector<2x4xf32>
    %577 = arith.mulf %572, %574 : vector<2x4xf32>
    %578 = arith.addf %576, %577 : vector<2x4xf32>
    %579 = math.tanh %578 : vector<2x4xf32>
    %580 = arith.mulf %575, %579 : vector<2x4xf32>
    %c6_159 = arith.constant 6 : index
    %c0_160 = arith.constant 0 : index
    %581 = vector.load %arg5[%c6_159, %c0_160] : memref<16x4xf32, #tpu.memory_space<vmem>>, vector<2x4xf32>
    tpu.vector_store %arg5[%c6_159, %c0_160], %580 {strides = array<i32>} : memref<16x4xf32, #tpu.memory_space<vmem>>, vector<2x4xf32>,
    %582 = vector.extract_strided_slice %503 {offsets = [8, 0], sizes = [2, 16], strides = [1, 1]} : vector<16x16xf32> to vector<2x16xf32>
    %cst_161 = arith.constant dense<0.000000e+00> : vector<2x16xf32>
    %583 = tpu.matmul %580, %495, %cst_161 {dimension_numbers = #tpu.dot_dimension_numbers<[1], [0], [0], [1], [0, 0, 1, 1], [], []>} : vector<2x4xf32>, vector<4x16xf32>, vector<2x16xf32> -> vector<2x16xf32>
    %584 = arith.addf %582, %583 : vector<2x16xf32>
    %585 = arith.negf %584 : vector<2x16xf32>
    %586 = math.exp %585 : vector<2x16xf32>
    %cst_162 = arith.constant 1.000000e+00 : f32
    %587 = vector.broadcast %cst_162 : f32 to vector<2x16xf32>
    %588 = arith.addf %587, %586 : vector<2x16xf32>
    %589 = arith.divf %587, %588 : vector<2x16xf32>
    %590 = math.tanh %584 : vector<2x16xf32>
    %591 = vector.extract_strided_slice %589 {offsets = [0, 0], sizes = [2, 4], strides = [1, 1]} : vector<2x16xf32> to vector<2x4xf32>
    %592 = vector.extract_strided_slice %589 {offsets = [0, 4], sizes = [2, 4], strides = [1, 1]} : vector<2x16xf32> to vector<2x4xf32>
    %593 = vector.extract_strided_slice %590 {offsets = [0, 8], sizes = [2, 4], strides = [1, 1]} : vector<2x16xf32> to vector<2x4xf32>
    %594 = vector.extract_strided_slice %589 {offsets = [0, 12], sizes = [2, 4], strides = [1, 1]} : vector<2x16xf32> to vector<2x4xf32>
    %595 = arith.mulf %592, %578 : vector<2x4xf32>
    %596 = arith.mulf %591, %593 : vector<2x4xf32>
    %597 = arith.addf %595, %596 : vector<2x4xf32>
    %598 = math.tanh %597 : vector<2x4xf32>
    %599 = arith.mulf %594, %598 : vector<2x4xf32>
    %c8_163 = arith.constant 8 : index
    %c0_164 = arith.constant 0 : index
    %600 = vector.load %arg5[%c8_163, %c0_164] : memref<16x4xf32, #tpu.memory_space<vmem>>, vector<2x4xf32>
    tpu.vector_store %arg5[%c8_163, %c0_164], %599 {strides = array<i32>} : memref<16x4xf32, #tpu.memory_space<vmem>>, vector<2x4xf32>,
    %601 = vector.extract_strided_slice %503 {offsets = [10, 0], sizes = [2, 16], strides = [1, 1]} : vector<16x16xf32> to vector<2x16xf32>
    %cst_165 = arith.constant dense<0.000000e+00> : vector<2x16xf32>
    %602 = tpu.matmul %599, %495, %cst_165 {dimension_numbers = #tpu.dot_dimension_numbers<[1], [0], [0], [1], [0, 0, 1, 1], [], []>} : vector<2x4xf32>, vector<4x16xf32>, vector<2x16xf32> -> vector<2x16xf32>
    %603 = arith.addf %601, %602 : vector<2x16xf32>
    %604 = arith.negf %603 : vector<2x16xf32>
    %605 = math.exp %604 : vector<2x16xf32>
    %cst_166 = arith.constant 1.000000e+00 : f32
    %606 = vector.broadcast %cst_166 : f32 to vector<2x16xf32>
    %607 = arith.addf %606, %605 : vector<2x16xf32>
    %608 = arith.divf %606, %607 : vector<2x16xf32>
    %609 = math.tanh %603 : vector<2x16xf32>
    %610 = vector.extract_strided_slice %608 {offsets = [0, 0], sizes = [2, 4], strides = [1, 1]} : vector<2x16xf32> to vector<2x4xf32>
    %611 = vector.extract_strided_slice %608 {offsets = [0, 4], sizes = [2, 4], strides = [1, 1]} : vector<2x16xf32> to vector<2x4xf32>
    %612 = vector.extract_strided_slice %609 {offsets = [0, 8], sizes = [2, 4], strides = [1, 1]} : vector<2x16xf32> to vector<2x4xf32>
    %613 = vector.extract_strided_slice %608 {offsets = [0, 12], sizes = [2, 4], strides = [1, 1]} : vector<2x16xf32> to vector<2x4xf32>
    %614 = arith.mulf %611, %597 : vector<2x4xf32>
    %615 = arith.mulf %610, %612 : vector<2x4xf32>
    %616 = arith.addf %614, %615 : vector<2x4xf32>
    %617 = math.tanh %616 : vector<2x4xf32>
    %618 = arith.mulf %613, %617 : vector<2x4xf32>
    %c10_167 = arith.constant 10 : index
    %c0_168 = arith.constant 0 : index
    %619 = vector.load %arg5[%c10_167, %c0_168] : memref<16x4xf32, #tpu.memory_space<vmem>>, vector<2x4xf32>
    tpu.vector_store %arg5[%c10_167, %c0_168], %618 {strides = array<i32>} : memref<16x4xf32, #tpu.memory_space<vmem>>, vector<2x4xf32>,
    %620 = vector.extract_strided_slice %503 {offsets = [12, 0], sizes = [2, 16], strides = [1, 1]} : vector<16x16xf32> to vector<2x16xf32>
    %cst_169 = arith.constant dense<0.000000e+00> : vector<2x16xf32>
    %621 = tpu.matmul %618, %495, %cst_169 {dimension_numbers = #tpu.dot_dimension_numbers<[1], [0], [0], [1], [0, 0, 1, 1], [], []>} : vector<2x4xf32>, vector<4x16xf32>, vector<2x16xf32> -> vector<2x16xf32>
    %622 = arith.addf %620, %621 : vector<2x16xf32>
    %623 = arith.negf %622 : vector<2x16xf32>
    %624 = math.exp %623 : vector<2x16xf32>
    %cst_170 = arith.constant 1.000000e+00 : f32
    %625 = vector.broadcast %cst_170 : f32 to vector<2x16xf32>
    %626 = arith.addf %625, %624 : vector<2x16xf32>
    %627 = arith.divf %625, %626 : vector<2x16xf32>
    %628 = math.tanh %622 : vector<2x16xf32>
    %629 = vector.extract_strided_slice %627 {offsets = [0, 0], sizes = [2, 4], strides = [1, 1]} : vector<2x16xf32> to vector<2x4xf32>
    %630 = vector.extract_strided_slice %627 {offsets = [0, 4], sizes = [2, 4], strides = [1, 1]} : vector<2x16xf32> to vector<2x4xf32>
    %631 = vector.extract_strided_slice %628 {offsets = [0, 8], sizes = [2, 4], strides = [1, 1]} : vector<2x16xf32> to vector<2x4xf32>
    %632 = vector.extract_strided_slice %627 {offsets = [0, 12], sizes = [2, 4], strides = [1, 1]} : vector<2x16xf32> to vector<2x4xf32>
    %633 = arith.mulf %630, %616 : vector<2x4xf32>
    %634 = arith.mulf %629, %631 : vector<2x4xf32>
    %635 = arith.addf %633, %634 : vector<2x4xf32>
    %636 = math.tanh %635 : vector<2x4xf32>
    %637 = arith.mulf %632, %636 : vector<2x4xf32>
    %c12_171 = arith.constant 12 : index
    %c0_172 = arith.constant 0 : index
    %638 = vector.load %arg5[%c12_171, %c0_172] : memref<16x4xf32, #tpu.memory_space<vmem>>, vector<2x4xf32>
    tpu.vector_store %arg5[%c12_171, %c0_172], %637 {strides = array<i32>} : memref<16x4xf32, #tpu.memory_space<vmem>>, vector<2x4xf32>,
    %639 = vector.extract_strided_slice %503 {offsets = [14, 0], sizes = [2, 16], strides = [1, 1]} : vector<16x16xf32> to vector<2x16xf32>
    %cst_173 = arith.constant dense<0.000000e+00> : vector<2x16xf32>
    %640 = tpu.matmul %637, %495, %cst_173 {dimension_numbers = #tpu.dot_dimension_numbers<[1], [0], [0], [1], [0, 0, 1, 1], [], []>} : vector<2x4xf32>, vector<4x16xf32>, vector<2x16xf32> -> vector<2x16xf32>
    %641 = arith.addf %639, %640 : vector<2x16xf32>
    %642 = arith.negf %641 : vector<2x16xf32>
    %643 = math.exp %642 : vector<2x16xf32>
    %cst_174 = arith.constant 1.000000e+00 : f32
    %644 = vector.broadcast %cst_174 : f32 to vector<2x16xf32>
    %645 = arith.addf %644, %643 : vector<2x16xf32>
    %646 = arith.divf %644, %645 : vector<2x16xf32>
    %647 = math.tanh %641 : vector<2x16xf32>
    %648 = vector.extract_strided_slice %646 {offsets = [0, 0], sizes = [2, 4], strides = [1, 1]} : vector<2x16xf32> to vector<2x4xf32>
    %649 = vector.extract_strided_slice %646 {offsets = [0, 4], sizes = [2, 4], strides = [1, 1]} : vector<2x16xf32> to vector<2x4xf32>
    %650 = vector.extract_strided_slice %647 {offsets = [0, 8], sizes = [2, 4], strides = [1, 1]} : vector<2x16xf32> to vector<2x4xf32>
    %651 = vector.extract_strided_slice %646 {offsets = [0, 12], sizes = [2, 4], strides = [1, 1]} : vector<2x16xf32> to vector<2x4xf32>
    %652 = arith.mulf %649, %635 : vector<2x4xf32>
    %653 = arith.mulf %648, %650 : vector<2x4xf32>
    %654 = arith.addf %652, %653 : vector<2x4xf32>
    %655 = math.tanh %654 : vector<2x4xf32>
    %656 = arith.mulf %651, %655 : vector<2x4xf32>
    %c14_175 = arith.constant 14 : index
    %c0_176 = arith.constant 0 : index
    %657 = vector.load %arg5[%c14_175, %c0_176] : memref<16x4xf32, #tpu.memory_space<vmem>>, vector<2x4xf32>
    tpu.vector_store %arg5[%c14_175, %c0_176], %656 {strides = array<i32>} : memref<16x4xf32, #tpu.memory_space<vmem>>, vector<2x4xf32>,
    %c4_177 = arith.constant 4 : index
    %c0_178 = arith.constant 0 : index
    %c0_179 = arith.constant 0 : index
    %658 = vector.load %arg2[%c4_177, %c0_178, %c0_179] : memref<5x4x16xf32, #tpu.memory_space<vmem>>, vector<1x4x16xf32>
    %659 = vector.shape_cast %658 : vector<1x4x16xf32> to vector<4x16xf32>
    %c0_180 = arith.constant 0 : index
    %c0_181 = arith.constant 0 : index
    %660 = vector.load %arg5[%c0_180, %c0_181] : memref<16x4xf32, #tpu.memory_space<vmem>>, vector<16x4xf32>
    %c4_182 = arith.constant 4 : index
    %c0_183 = arith.constant 0 : index
    %c0_184 = arith.constant 0 : index
    %661 = vector.load %arg1[%c4_182, %c0_183, %c0_184] : memref<5x4x16xf32, #tpu.memory_space<vmem>>, vector<1x4x16xf32>
    %662 = vector.shape_cast %661 : vector<1x4x16xf32> to vector<4x16xf32>
    %cst_185 = arith.constant dense<0.000000e+00> : vector<16x16xf32>
    %663 = tpu.matmul %660, %662, %cst_185 {dimension_numbers = #tpu.dot_dimension_numbers<[1], [0], [0], [1], [0, 0, 1, 1], [], []>} : vector<16x4xf32>, vector<4x16xf32>, vector<16x16xf32> -> vector<16x16xf32>
    %c4_186 = arith.constant 4 : index
    %c0_187 = arith.constant 0 : index
    %c0_188 = arith.constant 0 : index
    %664 = vector.load %arg3[%c4_186, %c0_187, %c0_188] : memref<5x1x16xf32, #tpu.memory_space<vmem>>, vector<1x1x16xf32>
    %665 = vector.shape_cast %664 : vector<1x1x16xf32> to vector<1x16xf32>
    %666 = vector.broadcast %665 : vector<1x16xf32> to vector<16x16xf32>
    %667 = arith.addf %663, %666 : vector<16x16xf32>
    %cst_189 = arith.constant 0.000000e+00 : f32
    %668 = vector.broadcast %cst_189 : f32 to vector<2x4xf32>
    %cst_190 = arith.constant 0.000000e+00 : f32
    %669 = vector.broadcast %cst_190 : f32 to vector<2x4xf32>
    %670 = vector.extract_strided_slice %667 {offsets = [0, 0], sizes = [2, 16], strides = [1, 1]} : vector<16x16xf32> to vector<2x16xf32>
    %cst_191 = arith.constant dense<0.000000e+00> : vector<2x16xf32>
    %671 = tpu.matmul %668, %659, %cst_191 {dimension_numbers = #tpu.dot_dimension_numbers<[1], [0], [0], [1], [0, 0, 1, 1], [], []>} : vector<2x4xf32>, vector<4x16xf32>, vector<2x16xf32> -> vector<2x16xf32>
    %672 = arith.addf %670, %671 : vector<2x16xf32>
    %673 = arith.negf %672 : vector<2x16xf32>
    %674 = math.exp %673 : vector<2x16xf32>
    %cst_192 = arith.constant 1.000000e+00 : f32
    %675 = vector.broadcast %cst_192 : f32 to vector<2x16xf32>
    %676 = arith.addf %675, %674 : vector<2x16xf32>
    %677 = arith.divf %675, %676 : vector<2x16xf32>
    %678 = math.tanh %672 : vector<2x16xf32>
    %679 = vector.extract_strided_slice %677 {offsets = [0, 0], sizes = [2, 4], strides = [1, 1]} : vector<2x16xf32> to vector<2x4xf32>
    %680 = vector.extract_strided_slice %677 {offsets = [0, 4], sizes = [2, 4], strides = [1, 1]} : vector<2x16xf32> to vector<2x4xf32>
    %681 = vector.extract_strided_slice %678 {offsets = [0, 8], sizes = [2, 4], strides = [1, 1]} : vector<2x16xf32> to vector<2x4xf32>
    %682 = vector.extract_strided_slice %677 {offsets = [0, 12], sizes = [2, 4], strides = [1, 1]} : vector<2x16xf32> to vector<2x4xf32>
    %683 = arith.mulf %680, %669 : vector<2x4xf32>
    %684 = arith.mulf %679, %681 : vector<2x4xf32>
    %685 = arith.addf %683, %684 : vector<2x4xf32>
    %686 = math.tanh %685 : vector<2x4xf32>
    %687 = arith.mulf %682, %686 : vector<2x4xf32>
    %688 = vector.extract_strided_slice %667 {offsets = [2, 0], sizes = [2, 16], strides = [1, 1]} : vector<16x16xf32> to vector<2x16xf32>
    %cst_193 = arith.constant dense<0.000000e+00> : vector<2x16xf32>
    %689 = tpu.matmul %687, %659, %cst_193 {dimension_numbers = #tpu.dot_dimension_numbers<[1], [0], [0], [1], [0, 0, 1, 1], [], []>} : vector<2x4xf32>, vector<4x16xf32>, vector<2x16xf32> -> vector<2x16xf32>
    %690 = arith.addf %688, %689 : vector<2x16xf32>
    %691 = arith.negf %690 : vector<2x16xf32>
    %692 = math.exp %691 : vector<2x16xf32>
    %cst_194 = arith.constant 1.000000e+00 : f32
    %693 = vector.broadcast %cst_194 : f32 to vector<2x16xf32>
    %694 = arith.addf %693, %692 : vector<2x16xf32>
    %695 = arith.divf %693, %694 : vector<2x16xf32>
    %696 = math.tanh %690 : vector<2x16xf32>
    %697 = vector.extract_strided_slice %695 {offsets = [0, 0], sizes = [2, 4], strides = [1, 1]} : vector<2x16xf32> to vector<2x4xf32>
    %698 = vector.extract_strided_slice %695 {offsets = [0, 4], sizes = [2, 4], strides = [1, 1]} : vector<2x16xf32> to vector<2x4xf32>
    %699 = vector.extract_strided_slice %696 {offsets = [0, 8], sizes = [2, 4], strides = [1, 1]} : vector<2x16xf32> to vector<2x4xf32>
    %700 = vector.extract_strided_slice %695 {offsets = [0, 12], sizes = [2, 4], strides = [1, 1]} : vector<2x16xf32> to vector<2x4xf32>
    %701 = arith.mulf %698, %685 : vector<2x4xf32>
    %702 = arith.mulf %697, %699 : vector<2x4xf32>
    %703 = arith.addf %701, %702 : vector<2x4xf32>
    %704 = math.tanh %703 : vector<2x4xf32>
    %705 = arith.mulf %700, %704 : vector<2x4xf32>
    %706 = vector.extract_strided_slice %667 {offsets = [4, 0], sizes = [2, 16], strides = [1, 1]} : vector<16x16xf32> to vector<2x16xf32>
    %cst_195 = arith.constant dense<0.000000e+00> : vector<2x16xf32>
    %707 = tpu.matmul %705, %659, %cst_195 {dimension_numbers = #tpu.dot_dimension_numbers<[1], [0], [0], [1], [0, 0, 1, 1], [], []>} : vector<2x4xf32>, vector<4x16xf32>, vector<2x16xf32> -> vector<2x16xf32>
    %708 = arith.addf %706, %707 : vector<2x16xf32>
    %709 = arith.negf %708 : vector<2x16xf32>
    %710 = math.exp %709 : vector<2x16xf32>
    %cst_196 = arith.constant 1.000000e+00 : f32
    %711 = vector.broadcast %cst_196 : f32 to vector<2x16xf32>
    %712 = arith.addf %711, %710 : vector<2x16xf32>
    %713 = arith.divf %711, %712 : vector<2x16xf32>
    %714 = math.tanh %708 : vector<2x16xf32>
    %715 = vector.extract_strided_slice %713 {offsets = [0, 0], sizes = [2, 4], strides = [1, 1]} : vector<2x16xf32> to vector<2x4xf32>
    %716 = vector.extract_strided_slice %713 {offsets = [0, 4], sizes = [2, 4], strides = [1, 1]} : vector<2x16xf32> to vector<2x4xf32>
    %717 = vector.extract_strided_slice %714 {offsets = [0, 8], sizes = [2, 4], strides = [1, 1]} : vector<2x16xf32> to vector<2x4xf32>
    %718 = vector.extract_strided_slice %713 {offsets = [0, 12], sizes = [2, 4], strides = [1, 1]} : vector<2x16xf32> to vector<2x4xf32>
    %719 = arith.mulf %716, %703 : vector<2x4xf32>
    %720 = arith.mulf %715, %717 : vector<2x4xf32>
    %721 = arith.addf %719, %720 : vector<2x4xf32>
    %722 = math.tanh %721 : vector<2x4xf32>
    %723 = arith.mulf %718, %722 : vector<2x4xf32>
    %724 = vector.extract_strided_slice %667 {offsets = [6, 0], sizes = [2, 16], strides = [1, 1]} : vector<16x16xf32> to vector<2x16xf32>
    %cst_197 = arith.constant dense<0.000000e+00> : vector<2x16xf32>
    %725 = tpu.matmul %723, %659, %cst_197 {dimension_numbers = #tpu.dot_dimension_numbers<[1], [0], [0], [1], [0, 0, 1, 1], [], []>} : vector<2x4xf32>, vector<4x16xf32>, vector<2x16xf32> -> vector<2x16xf32>
    %726 = arith.addf %724, %725 : vector<2x16xf32>
    %727 = arith.negf %726 : vector<2x16xf32>
    %728 = math.exp %727 : vector<2x16xf32>
    %cst_198 = arith.constant 1.000000e+00 : f32
    %729 = vector.broadcast %cst_198 : f32 to vector<2x16xf32>
    %730 = arith.addf %729, %728 : vector<2x16xf32>
    %731 = arith.divf %729, %730 : vector<2x16xf32>
    %732 = math.tanh %726 : vector<2x16xf32>
    %733 = vector.extract_strided_slice %731 {offsets = [0, 0], sizes = [2, 4], strides = [1, 1]} : vector<2x16xf32> to vector<2x4xf32>
    %734 = vector.extract_strided_slice %731 {offsets = [0, 4], sizes = [2, 4], strides = [1, 1]} : vector<2x16xf32> to vector<2x4xf32>
    %735 = vector.extract_strided_slice %732 {offsets = [0, 8], sizes = [2, 4], strides = [1, 1]} : vector<2x16xf32> to vector<2x4xf32>
    %736 = vector.extract_strided_slice %731 {offsets = [0, 12], sizes = [2, 4], strides = [1, 1]} : vector<2x16xf32> to vector<2x4xf32>
    %737 = arith.mulf %734, %721 : vector<2x4xf32>
    %738 = arith.mulf %733, %735 : vector<2x4xf32>
    %739 = arith.addf %737, %738 : vector<2x4xf32>
    %740 = math.tanh %739 : vector<2x4xf32>
    %741 = arith.mulf %736, %740 : vector<2x4xf32>
    %742 = vector.extract_strided_slice %667 {offsets = [8, 0], sizes = [2, 16], strides = [1, 1]} : vector<16x16xf32> to vector<2x16xf32>
    %cst_199 = arith.constant dense<0.000000e+00> : vector<2x16xf32>
    %743 = tpu.matmul %741, %659, %cst_199 {dimension_numbers = #tpu.dot_dimension_numbers<[1], [0], [0], [1], [0, 0, 1, 1], [], []>} : vector<2x4xf32>, vector<4x16xf32>, vector<2x16xf32> -> vector<2x16xf32>
    %744 = arith.addf %742, %743 : vector<2x16xf32>
    %745 = arith.negf %744 : vector<2x16xf32>
    %746 = math.exp %745 : vector<2x16xf32>
    %cst_200 = arith.constant 1.000000e+00 : f32
    %747 = vector.broadcast %cst_200 : f32 to vector<2x16xf32>
    %748 = arith.addf %747, %746 : vector<2x16xf32>
    %749 = arith.divf %747, %748 : vector<2x16xf32>
    %750 = math.tanh %744 : vector<2x16xf32>
    %751 = vector.extract_strided_slice %749 {offsets = [0, 0], sizes = [2, 4], strides = [1, 1]} : vector<2x16xf32> to vector<2x4xf32>
    %752 = vector.extract_strided_slice %749 {offsets = [0, 4], sizes = [2, 4], strides = [1, 1]} : vector<2x16xf32> to vector<2x4xf32>
    %753 = vector.extract_strided_slice %750 {offsets = [0, 8], sizes = [2, 4], strides = [1, 1]} : vector<2x16xf32> to vector<2x4xf32>
    %754 = vector.extract_strided_slice %749 {offsets = [0, 12], sizes = [2, 4], strides = [1, 1]} : vector<2x16xf32> to vector<2x4xf32>
    %755 = arith.mulf %752, %739 : vector<2x4xf32>
    %756 = arith.mulf %751, %753 : vector<2x4xf32>
    %757 = arith.addf %755, %756 : vector<2x4xf32>
    %758 = math.tanh %757 : vector<2x4xf32>
    %759 = arith.mulf %754, %758 : vector<2x4xf32>
    %760 = vector.extract_strided_slice %667 {offsets = [10, 0], sizes = [2, 16], strides = [1, 1]} : vector<16x16xf32> to vector<2x16xf32>
    %cst_201 = arith.constant dense<0.000000e+00> : vector<2x16xf32>
    %761 = tpu.matmul %759, %659, %cst_201 {dimension_numbers = #tpu.dot_dimension_numbers<[1], [0], [0], [1], [0, 0, 1, 1], [], []>} : vector<2x4xf32>, vector<4x16xf32>, vector<2x16xf32> -> vector<2x16xf32>
    %762 = arith.addf %760, %761 : vector<2x16xf32>
    %763 = arith.negf %762 : vector<2x16xf32>
    %764 = math.exp %763 : vector<2x16xf32>
    %cst_202 = arith.constant 1.000000e+00 : f32
    %765 = vector.broadcast %cst_202 : f32 to vector<2x16xf32>
    %766 = arith.addf %765, %764 : vector<2x16xf32>
    %767 = arith.divf %765, %766 : vector<2x16xf32>
    %768 = math.tanh %762 : vector<2x16xf32>
    %769 = vector.extract_strided_slice %767 {offsets = [0, 0], sizes = [2, 4], strides = [1, 1]} : vector<2x16xf32> to vector<2x4xf32>
    %770 = vector.extract_strided_slice %767 {offsets = [0, 4], sizes = [2, 4], strides = [1, 1]} : vector<2x16xf32> to vector<2x4xf32>
    %771 = vector.extract_strided_slice %768 {offsets = [0, 8], sizes = [2, 4], strides = [1, 1]} : vector<2x16xf32> to vector<2x4xf32>
    %772 = vector.extract_strided_slice %767 {offsets = [0, 12], sizes = [2, 4], strides = [1, 1]} : vector<2x16xf32> to vector<2x4xf32>
    %773 = arith.mulf %770, %757 : vector<2x4xf32>
    %774 = arith.mulf %769, %771 : vector<2x4xf32>
    %775 = arith.addf %773, %774 : vector<2x4xf32>
    %776 = math.tanh %775 : vector<2x4xf32>
    %777 = arith.mulf %772, %776 : vector<2x4xf32>
    %778 = vector.extract_strided_slice %667 {offsets = [12, 0], sizes = [2, 16], strides = [1, 1]} : vector<16x16xf32> to vector<2x16xf32>
    %cst_203 = arith.constant dense<0.000000e+00> : vector<2x16xf32>
    %779 = tpu.matmul %777, %659, %cst_203 {dimension_numbers = #tpu.dot_dimension_numbers<[1], [0], [0], [1], [0, 0, 1, 1], [], []>} : vector<2x4xf32>, vector<4x16xf32>, vector<2x16xf32> -> vector<2x16xf32>
    %780 = arith.addf %778, %779 : vector<2x16xf32>
    %781 = arith.negf %780 : vector<2x16xf32>
    %782 = math.exp %781 : vector<2x16xf32>
    %cst_204 = arith.constant 1.000000e+00 : f32
    %783 = vector.broadcast %cst_204 : f32 to vector<2x16xf32>
    %784 = arith.addf %783, %782 : vector<2x16xf32>
    %785 = arith.divf %783, %784 : vector<2x16xf32>
    %786 = math.tanh %780 : vector<2x16xf32>
    %787 = vector.extract_strided_slice %785 {offsets = [0, 0], sizes = [2, 4], strides = [1, 1]} : vector<2x16xf32> to vector<2x4xf32>
    %788 = vector.extract_strided_slice %785 {offsets = [0, 4], sizes = [2, 4], strides = [1, 1]} : vector<2x16xf32> to vector<2x4xf32>
    %789 = vector.extract_strided_slice %786 {offsets = [0, 8], sizes = [2, 4], strides = [1, 1]} : vector<2x16xf32> to vector<2x4xf32>
    %790 = vector.extract_strided_slice %785 {offsets = [0, 12], sizes = [2, 4], strides = [1, 1]} : vector<2x16xf32> to vector<2x4xf32>
    %791 = arith.mulf %788, %775 : vector<2x4xf32>
    %792 = arith.mulf %787, %789 : vector<2x4xf32>
    %793 = arith.addf %791, %792 : vector<2x4xf32>
    %794 = math.tanh %793 : vector<2x4xf32>
    %795 = arith.mulf %790, %794 : vector<2x4xf32>
    %796 = vector.extract_strided_slice %667 {offsets = [14, 0], sizes = [2, 16], strides = [1, 1]} : vector<16x16xf32> to vector<2x16xf32>
    %cst_205 = arith.constant dense<0.000000e+00> : vector<2x16xf32>
    %797 = tpu.matmul %795, %659, %cst_205 {dimension_numbers = #tpu.dot_dimension_numbers<[1], [0], [0], [1], [0, 0, 1, 1], [], []>} : vector<2x4xf32>, vector<4x16xf32>, vector<2x16xf32> -> vector<2x16xf32>
    %798 = arith.addf %796, %797 : vector<2x16xf32>
    %799 = arith.negf %798 : vector<2x16xf32>
    %800 = math.exp %799 : vector<2x16xf32>
    %cst_206 = arith.constant 1.000000e+00 : f32
    %801 = vector.broadcast %cst_206 : f32 to vector<2x16xf32>
    %802 = arith.addf %801, %800 : vector<2x16xf32>
    %803 = arith.divf %801, %802 : vector<2x16xf32>
    %804 = math.tanh %798 : vector<2x16xf32>
    %805 = vector.extract_strided_slice %803 {offsets = [0, 0], sizes = [2, 4], strides = [1, 1]} : vector<2x16xf32> to vector<2x4xf32>
    %806 = vector.extract_strided_slice %803 {offsets = [0, 4], sizes = [2, 4], strides = [1, 1]} : vector<2x16xf32> to vector<2x4xf32>
    %807 = vector.extract_strided_slice %804 {offsets = [0, 8], sizes = [2, 4], strides = [1, 1]} : vector<2x16xf32> to vector<2x4xf32>
    %808 = vector.extract_strided_slice %803 {offsets = [0, 12], sizes = [2, 4], strides = [1, 1]} : vector<2x16xf32> to vector<2x4xf32>
    %809 = arith.mulf %806, %793 : vector<2x4xf32>
    %810 = arith.mulf %805, %807 : vector<2x4xf32>
    %811 = arith.addf %809, %810 : vector<2x4xf32>
    %812 = math.tanh %811 : vector<2x4xf32>
    %813 = arith.mulf %808, %812 : vector<2x4xf32>
    %c0_207 = arith.constant 0 : index
    %c0_208 = arith.constant 0 : index
    %814 = vector.load %arg4[%c0_207, %c0_208] : memref<2x4xf32, #tpu.memory_space<vmem>>, vector<2x4xf32>
    tpu.vector_store %arg4[%c0_207, %c0_208], %813 {strides = array<i32>} : memref<2x4xf32, #tpu.memory_space<vmem>>, vector<2x4xf32>,
    return
  }
}

</mosaic_0001>

<bundles_post_ra>
// kernel: tpu_custom_call.1
= control target key start
LH: loop header
LB: loop body
LE: loop exit
PB: predicated region body
PF: predicated region fallthrough
CT: control target
= control target key end

     0   :  { %9 = vsyncpa [#allocation4], 0  ;;  %s4333_s0 = inlined_call_operand.vmem [shape: f32[16,4], index: 0, kind: input, shape index: {}]   ;;  %s4334_s1 = inlined_call_operand.vmem [shape: f32[5,4,16], index: 1, kind: input, shape index: {}]   ;;  %s4335_s2 = inlined_call_operand.hbm [shape: f32[5,4,16], index: 2, kind: input, shape index: {}]   ;;  %s4336_s3 = inlined_call_operand.hbm [shape: f32[5,1,16], index: 3, kind: input, shape index: {}]   ;;  %s4337_s4 = inlined_call_operand.hbm [shape: f32[2,4], index: 4, kind: output, shape index: {}]  }
   0x1   :  { %10 = vsyncpa [#allocation7], 0 }
   0x2   :  { %11 = vsyncpa [#allocation5], 0  ;;  %s20_s17 = sshll.u32 %s4335_s2, 4  ;;  %s3692_s18 = smov [#allocation3]   ;;  %s21_s17 = int_to_ptr.hbm [resolvable:$true] %s20_s17 }
   0x3   :  { %s22_s19 = sshll.u32 %s3692_s18, 4  ;;  %s33_s22 = sshll.u32 %s4336_s3, 4  ;;  %s23_s19 = int_to_ptr.vmem [resolvable:$true] %s22_s19  ;;  %s34_s22 = int_to_ptr.hbm [resolvable:$true] %s33_s22 }
   0x4   :  { %s3693_s23 = smov 64   ;;  %s3694_s24 = smov 4  }
   0x5   :  { %28 = dma.hbm_to_vmem [thread:$0]  %s21_s17, 320, %s23_s19, [#allocation4], %s3693_s23, %s3693_s23, %s3694_s24  }
   0x6   :  { %s3695_s25 = smov [#allocation6]   ;;  %s3696_s27 = smov 16  }
   0x7   :  { %s35_s26 = sshll.u32 %s3695_s25, 4  ;;  %s3697_s28 = smov 1   ;;  %s36_s26 = int_to_ptr.vmem [resolvable:$true] %s35_s26 }
   0x8   :  { %41 = dma.hbm_to_vmem [thread:$0]  %s34_s22, 80, %s36_s26, [#allocation7], %s3696_s27, %s3696_s27, %s3697_s28  }
   0x9   :  { %3686 = dma.done.wait [#allocation4], 320  }
   0xa   :  { %3687 = vsyncadd [#allocation4], 4294966976 }
   0xb   :  { %3688 = dma.done.wait [#allocation7], 80  }
   0xc   :  { %3689 = vsyncadd [#allocation7], 4294967216  ;;  %vm69_vm0 = vcmask 1043456   ;;  %vm52_vm1 = vcmask 31744   ;;  %v58_v0 = vld [vmem:[%s4334_s1] sm:$0xf] }
   0xd   :  { %v50_v1 = vld [vmem:[%s4333_s0] sm:$0xff]  ;;  %v55_v2 = vld [vmem:[#allocation3] sm:$0xf]  ;;  %3144 = vmatpush.msk.msra.mxu0 %vm69_vm0, %v58_v0  ;;  %v3698_v3 = vmov 0.0   ;;  %s3699_s5 = smov 120   ;;  %s3700_s6 = smov 8  }
   0xe   :  { %53 = vst.msk [vmem:[#allocation2] sm:$0xff] %vm52_vm1, %v50_v1  ;;  %3147 = vmatpush.msk.msra.mxu1 %vm69_vm0, %v55_v2  ;;  %3149 = vmatpush.msk.msra.mxu2 %vm69_vm0, %v55_v2  ;;  %v3753_v5 = vld [vmem:[#allocation6] ss:$0 sm:$0xff]  ;;  %s3701_s7 = smov 116   ;;  %vm164_vm6 = vcmask 25600   ;;  %s3133_s20 = sshll.u32 %s4337_s4, 4  ;;  %s3134_s20 = int_to_ptr.hbm [resolvable:$true] %s3133_s20 }
   0xf   :  { %118 = vmatmul.f32.vlgmr.msra.gmra.mxu1 %v3698_v3  ;;  %3152 = vmatpush.msk.msra.mxu3 %vm69_vm0, %v55_v2 }
  0x10   :  { %3155 = vmatpush.msk.msrb.mxu1 %vm69_vm0, %v55_v2  ;;  %3158 = vmatpush.msk.msrb.mxu2 %vm69_vm0, %v55_v2 }
  0x11   :  { %3161 = vmatpush.msk.msrb.mxu3 %vm69_vm0, %v55_v2  ;;  %3164 = vmatpush.msk.msrb.mxu0 %vm69_vm0, %v55_v2 }
  0x12   :  { %3167 = vmatpush.msk.msra.mxu1 %vm69_vm0, %v55_v2 }
  0x15   :  { %v56_v4 = vld [vmem:[#allocation2] sm:$0xff] }
  0x16   :  { %3145 = vmatmul.msk.f32.vlgmr.msra.gmra.mxu0 %vm52_vm1, %v56_v4 }
  0x8c   :  { %v119_v7 = vpop.f32.mrf.mxu1 }
  0x93   :  { %v90_v6 = vpop.f32.mrf.mxu0 }
  0x94   :  { %v3756_v8 = vadd.f32 %v3753_v5, %v90_v6 }
  0x96   :  { %v122_v9 = vadd.f32 %v119_v7, %v3756_v8 }
  0x98   :  { %3294 = vtanh.f32 %v122_v9  ;;  %v3148_v11 = vmul.f32 -1.442695, %v122_v9 }
  0x9a   :  { %3296 = vpow2.f32 %v3148_v11 }
  0x9e   :  { %v3295_v10 = vpop.eup %3294 }
  0x9f   :  { %145 = vrot.lane.b32.xlu0 %v3295_v10, %s3699_s5 }
  0xa0   :  { %v3297_v12 = vpop.eup %3296 }
  0xa1   :  { %v126_v13 = vadd.f32 1.0, %v3297_v12 }
  0xa3   :  { %3298 = vrcp.f32 %v126_v13  ;;  %v138_v19 = vand.u32 2147483648, %v126_v13  ;;  %vm132_vm3 = vweird.f32 %v126_v13  ;;  %v136_v20 = vand.u32 2147483647, %v126_v13 }
  0xa5   :  { %v139_v22 = vor.u32 1.1754944e-38, %v138_v19  ;;  %vm137_vm5 = vcmp.eq.f32.partialorder %v136_v20, 8.507059e+37 }
  0xa9   :  { %v3299_v14 = vpop.eup %3298 }
  0xaa   :  { %v128_v15 = vmul.f32 %v3299_v14, %v126_v13  ;;  %vm133_vm2 = vweird.f32 %v3299_v14 }
  0xab   :  { %vm134_vm4 = vmor %vm132_vm3, %vm133_vm2 }
  0xac   :  { %v129_v16 = vsub.f32 1.0, %v128_v15 }
  0xae   :  { %v130_v17 = vmul.f32 %v3299_v14, %v129_v16 }
  0xb0   :  { %v131_v18 = vadd.f32 %v3299_v14, %v130_v17 }
  0xb2   :  { %v135_v21 = vsel %vm134_vm4, %v3299_v14, %v131_v18 }
  0xb3   :  { %v140_v24 = vsel %vm137_vm5, %v139_v22, %v135_v21 }
  0xb4   :  { %v143_v26 = vmul.f32 0.0, %v140_v24 }
 0x111   :  { %v146_v23 = vpop.permute.xlu0 %145 }
 0x112   :  { %v148_v25 = vmul.f32 %v146_v23, %v140_v24 }
 0x114   :  { %150 = vrot.lane.b32.xlu0 %v148_v25, %s3694_s24 }
 0x186   :  { %v151_v27 = vpop.permute.xlu0 %150 }
 0x187   :  { %v153_v28 = vadd.f32 %v151_v27, %v143_v26 }
 0x189   :  { %3300 = vtanh.f32 %v153_v28  ;;  %v213_v52 = vrot.slane %v153_v28, 6 }
 0x18f   :  { %v3301_v29 = vpop.eup %3300 }
 0x190   :  { %156 = vrot.lane.b32.xlu1 %v3301_v29, %s3700_s6 }
 0x202   :  { %v157_v30 = vpop.permute.xlu1 %156 }
 0x203   :  { %v159_v31 = vmul.f32 %v157_v30, %v140_v24 }
 0x205   :  { %161 = vrot.lane.b32.xlu1 %v159_v31, %s3701_s7 }
 0x277   :  { %v162_v32 = vpop.permute.xlu1 %161 }
 0x278   :  { %165 = vst.msk [vmem:[#allocation2] sm:$0x3] %vm164_vm6, %v162_v32  ;;  %3150 = vmatmul.msk.f32.vlgmr.msra.gmra.mxu2 %vm52_vm1, %v162_v32 }
 0x2fb   :  { %v185_v33 = vpop.f32.mrf.mxu2 }
 0x2fc   :  { %v189_v34 = vrot.slane %v185_v33, 6 }
 0x2fe   :  { %v191_v35 = vadd.f32 %v189_v34, %v3756_v8 }
 0x300   :  { %3302 = vtanh.f32 %v191_v35  ;;  %v3151_v37 = vmul.f32 -1.442695, %v191_v35 }
 0x302   :  { %3304 = vpow2.f32 %v3151_v37 }
 0x306   :  { %v3303_v36 = vpop.eup %3302 }
 0x307   :  { %217 = vrot.lane.b32.xlu2 %v3303_v36, %s3699_s5 }
 0x308   :  { %v3305_v38 = vpop.eup %3304 }
 0x309   :  { %v195_v39 = vadd.f32 1.0, %v3305_v38 }
 0x30b   :  { %3306 = vrcp.f32 %v195_v39  ;;  %v207_v45 = vand.u32 2147483648, %v195_v39  ;;  %vm201_vm8 = vweird.f32 %v195_v39  ;;  %v205_v46 = vand.u32 2147483647, %v195_v39 }
 0x30d   :  { %v208_v48 = vor.u32 1.1754944e-38, %v207_v45  ;;  %vm206_vm10 = vcmp.eq.f32.partialorder %v205_v46, 8.507059e+37 }
 0x311   :  { %v3307_v40 = vpop.eup %3306 }
 0x312   :  { %v197_v41 = vmul.f32 %v3307_v40, %v195_v39  ;;  %vm202_vm7 = vweird.f32 %v3307_v40 }
 0x313   :  { %vm203_vm9 = vmor %vm201_vm8, %vm202_vm7 }
 0x314   :  { %v198_v42 = vsub.f32 1.0, %v197_v41 }
 0x316   :  { %v199_v43 = vmul.f32 %v3307_v40, %v198_v42 }
 0x318   :  { %v200_v44 = vadd.f32 %v3307_v40, %v199_v43 }
 0x31a   :  { %v204_v47 = vsel %vm203_vm9, %v3307_v40, %v200_v44 }
 0x31b   :  { %v209_v50 = vsel %vm206_vm10, %v208_v48, %v204_v47  ;;  %vm236_vm10 = vcmask 27650  }
 0x31c   :  { %v215_v53 = vmul.f32 %v213_v52, %v209_v50 }
 0x361   :  { %v218_v49 = vpop.permute.xlu2 %217 }
 0x362   :  { %v220_v51 = vmul.f32 %v218_v49, %v209_v50 }
 0x364   :  { %222 = vrot.lane.b32.xlu2 %v220_v51, %s3694_s24 }
 0x3be   :  { %v223_v54 = vpop.permute.xlu2 %222 }
 0x3bf   :  { %v225_v55 = vadd.f32 %v223_v54, %v215_v53  ;;  %v51_v54 = vld [vmem:[%s4333_s0 + $0x8] sm:$0xff] }
 0x3c0   :  { %54 = vst.msk [vmem:[#allocation2 + $0x8] sm:$0xff] %vm52_vm1, %v51_v54 }
 0x3c1   :  { %3308 = vtanh.f32 %v225_v55  ;;  %v288_v19 = vrot.slane %v225_v55, 6 }
 0x3c7   :  { %v3309_v56 = vpop.eup %3308  ;;  %v57_v55 = vld [vmem:[#allocation2 + $0x8] sm:$0xff] }
 0x3c8   :  { %228 = vrot.lane.b32.xlu0 %v3309_v56, %s3700_s6  ;;  %3146 = vmatmul.msk.f32.gmra.mxu0 %vm52_vm1, %v57_v55 }
 0x43a   :  { %v229_v57 = vpop.permute.xlu0 %228 }
 0x43b   :  { %v3769_v58 = vmul.f32 %v229_v57, %v209_v50 }
 0x43d   :  { %v238_v59 = vrot.slane %v3769_v58, 2 }
 0x43f   :  { %239 = vrot.lane.b32.xlu1 %v238_v59, %s3701_s7 }
 0x445   :  { %v93_v57 = vpop.f32.mrf.mxu0 }
 0x446   :  { %v3795_v59 = vadd.f32 %v3753_v5, %v93_v57 }
 0x4b1   :  { %v240_v60 = vpop.permute.xlu1 %239 }
 0x4b2   :  { %3153 = vmatmul.msk.f32.vlgmr.msra.gmra.mxu3 %vm52_vm1, %v240_v60 }
 0x535   :  { %v260_v61 = vpop.f32.mrf.mxu3 }
 0x536   :  { %v264_v62 = vrot.slane %v260_v61, 4 }
 0x538   :  { %v266_v63 = vadd.f32 %v264_v62, %v3756_v8 }
 0x53a   :  { %3310 = vtanh.f32 %v266_v63  ;;  %v3154_v1 = vmul.f32 -1.442695, %v266_v63 }
 0x53c   :  { %3312 = vpow2.f32 %v3154_v1 }
 0x540   :  { %v3311_v0 = vpop.eup %3310 }
 0x541   :  { %292 = vrot.lane.b32.xlu2 %v3311_v0, %s3699_s5 }
 0x542   :  { %v3313_v2 = vpop.eup %3312 }
 0x543   :  { %v270_v4 = vadd.f32 1.0, %v3313_v2 }
 0x545   :  { %3314 = vrcp.f32 %v270_v4  ;;  %v282_v12 = vand.u32 2147483648, %v270_v4  ;;  %vm276_vm12 = vweird.f32 %v270_v4  ;;  %v280_v13 = vand.u32 2147483647, %v270_v4 }
 0x547   :  { %v283_v15 = vor.u32 1.1754944e-38, %v282_v12  ;;  %vm281_vm14 = vcmp.eq.f32.partialorder %v280_v13, 8.507059e+37 }
 0x54b   :  { %v3315_v6 = vpop.eup %3314 }
 0x54c   :  { %v272_v7 = vmul.f32 %v3315_v6, %v270_v4  ;;  %vm277_vm11 = vweird.f32 %v3315_v6 }
 0x54d   :  { %vm278_vm13 = vmor %vm276_vm12, %vm277_vm11  ;;  %vm311_vm11 = vcmask 29700   ;;  %vm386_vm12 = vcmask 31750  }
 0x54e   :  { %v273_v9 = vsub.f32 1.0, %v272_v7 }
 0x550   :  { %v274_v10 = vmul.f32 %v3315_v6, %v273_v9 }
 0x552   :  { %v275_v11 = vadd.f32 %v3315_v6, %v274_v10 }
 0x554   :  { %v279_v14 = vsel %vm278_vm13, %v3315_v6, %v275_v11 }
 0x555   :  { %v284_v17 = vsel %vm281_vm14, %v283_v15, %v279_v14 }
 0x556   :  { %v290_v20 = vmul.f32 %v288_v19, %v284_v17 }
 0x59b   :  { %v293_v16 = vpop.permute.xlu2 %292 }
 0x59c   :  { %v295_v18 = vmul.f32 %v293_v16, %v284_v17 }
 0x59e   :  { %297 = vrot.lane.b32.xlu0 %v295_v18, %s3694_s24 }
 0x610   :  { %v298_v21 = vpop.permute.xlu0 %297 }
 0x611   :  { %v300_v22 = vadd.f32 %v298_v21, %v290_v20 }
 0x613   :  { %3316 = vtanh.f32 %v300_v22  ;;  %v363_v46 = vrot.slane %v300_v22, 6 }
 0x619   :  { %v3317_v23 = vpop.eup %3316 }
 0x61a   :  { %303 = vrot.lane.b32.xlu1 %v3317_v23, %s3700_s6 }
 0x68c   :  { %v304_v24 = vpop.permute.xlu1 %303 }
 0x68d   :  { %v3778_v25 = vmul.f32 %v304_v24, %v284_v17  ;;  %v3170_v24 = vld [vmem:[%s4334_s1 + $0x4] sm:$0xf] }
 0x68e   :  { %3171 = vmatpush.msk.msra.mxu2 %vm69_vm0, %v3170_v24 }
 0x68f   :  { %v313_v26 = vrot.slane %v3778_v25, 4 }
 0x691   :  { %314 = vrot.lane.b32.xlu2 %v313_v26, %s3701_s7  ;;  %v3816_v26 = vld [vmem:[#allocation3 + $0x4] sm:$0xf] }
 0x692   :  { %3174 = vmatpush.msk.msra.mxu3 %vm69_vm0, %v3816_v26  ;;  %3176 = vmatpush.msk.msra.mxu0 %vm69_vm0, %v3816_v26 }
 0x6eb   :  { %v315_v27 = vpop.permute.xlu2 %314 }
 0x6ec   :  { %3156 = vmatmul.msk.f32.vlgmr.msrb.gmra.mxu1 %vm52_vm1, %v315_v27 }
 0x6ed   :  { %3179 = vmatpush.msk.msrb.mxu1 %vm69_vm0, %v3816_v26 }
 0x769   :  { %v335_v28 = vpop.f32.mrf.mxu1 }
 0x76a   :  { %v339_v29 = vrot.slane %v335_v28, 2 }
 0x76c   :  { %v341_v30 = vadd.f32 %v339_v29, %v3756_v8 }
 0x76e   :  { %3318 = vtanh.f32 %v341_v30  ;;  %v3157_v32 = vmul.f32 -1.442695, %v341_v30 }
 0x770   :  { %3320 = vpow2.f32 %v3157_v32 }
 0x774   :  { %v3319_v31 = vpop.eup %3318 }
 0x775   :  { %367 = vrot.lane.b32.xlu0 %v3319_v31, %s3699_s5 }
 0x776   :  { %v3321_v33 = vpop.eup %3320 }
 0x777   :  { %v345_v34 = vadd.f32 1.0, %v3321_v33  ;;  %v3837_v33 = vld [vmem:[#allocation6 + $0x1] ss:$0 sm:$0xff] }
 0x779   :  { %3322 = vrcp.f32 %v345_v34  ;;  %v357_v40 = vand.u32 2147483648, %v345_v34  ;;  %vm351_vm2 = vweird.f32 %v345_v34  ;;  %v355_v41 = vand.u32 2147483647, %v345_v34 }
 0x77b   :  { %v358_v42 = vor.u32 1.1754944e-38, %v357_v40  ;;  %vm356_vm4 = vcmp.eq.f32.partialorder %v355_v41, 8.507059e+37 }
 0x77f   :  { %v3323_v35 = vpop.eup %3322 }
 0x780   :  { %v347_v36 = vmul.f32 %v3323_v35, %v345_v34  ;;  %vm352_vm15 = vweird.f32 %v3323_v35 }
 0x781   :  { %vm353_vm3 = vmor %vm351_vm2, %vm352_vm15 }
 0x782   :  { %v348_v37 = vsub.f32 1.0, %v347_v36 }
 0x784   :  { %v349_v38 = vmul.f32 %v3323_v35, %v348_v37 }
 0x786   :  { %v350_v39 = vadd.f32 %v3323_v35, %v349_v38 }
 0x788   :  { %v354_v8 = vsel %vm353_vm3, %v3323_v35, %v350_v39 }
 0x789   :  { %v359_v44 = vsel %vm356_vm4, %v358_v42, %v354_v8 }
 0x78a   :  { %v365_v47 = vmul.f32 %v363_v46, %v359_v44 }
 0x7e7   :  { %v368_v43 = vpop.permute.xlu0 %367 }
 0x7e8   :  { %v370_v45 = vmul.f32 %v368_v43, %v359_v44 }
 0x7ea   :  { %372 = vrot.lane.b32.xlu1 %v370_v45, %s3694_s24 }
 0x85c   :  { %v373_v48 = vpop.permute.xlu1 %372 }
 0x85d   :  { %v375_v49 = vadd.f32 %v373_v48, %v365_v47 }
 0x85f   :  { %3324 = vtanh.f32 %v375_v49  ;;  %v435_v16 = vrot.slane %v375_v49, 6 }
 0x865   :  { %v3325_v50 = vpop.eup %3324 }
 0x866   :  { %378 = vrot.lane.b32.xlu2 %v3325_v50, %s3700_s6 }
 0x8c0   :  { %v379_v51 = vpop.permute.xlu2 %378 }
 0x8c1   :  { %v381_v52 = vmul.f32 %v379_v51, %v359_v44 }
 0x8c3   :  { %v388_v53 = vrot.slane %v381_v52, 6 }
 0x8c5   :  { %389 = vrot.lane.b32.xlu0 %v388_v53, %s3701_s7 }
 0x937   :  { %v390_v56 = vpop.permute.xlu0 %389 }
 0x938   :  { %3159 = vmatmul.msk.f32.vlgmr.msrb.gmra.mxu2 %vm52_vm1, %v390_v56 }
 0x939   :  { %3191 = vmatpush.msk.msrb.mxu2 %vm69_vm0, %v3816_v26 }
 0x9bb   :  { %v410_v60 = vpop.f32.mrf.mxu2 }
 0x9bc   :  { %v413_v61 = vadd.f32 %v410_v60, %v3795_v59 }
 0x9be   :  { %3326 = vtanh.f32 %v413_v61  ;;  %v3160_v63 = vmul.f32 -1.442695, %v413_v61 }
 0x9c0   :  { %3328 = vpow2.f32 %v3160_v63 }
 0x9c4   :  { %v3327_v62 = vpop.eup %3326 }
 0x9c5   :  { %439 = vrot.lane.b32.xlu1 %v3327_v62, %s3699_s5 }
 0x9c6   :  { %v3329_v0 = vpop.eup %3328 }
 0x9c7   :  { %v417_v1 = vadd.f32 1.0, %v3329_v0 }
 0x9c9   :  { %3330 = vrcp.f32 %v417_v1  ;;  %v429_v5 = vand.u32 2147483648, %v417_v1  ;;  %vm423_vm7 = vweird.f32 %v417_v1  ;;  %v427_v10 = vand.u32 2147483647, %v417_v1 }
 0x9cb   :  { %v430_v12 = vor.u32 1.1754944e-38, %v429_v5  ;;  %vm428_vm9 = vcmp.eq.f32.partialorder %v427_v10, 8.507059e+37 }
 0x9cf   :  { %v3331_v2 = vpop.eup %3330 }
 0x9d0   :  { %v419_v4 = vmul.f32 %v3331_v2, %v417_v1  ;;  %vm424_vm5 = vweird.f32 %v3331_v2 }
 0x9d1   :  { %vm425_vm8 = vmor %vm423_vm7, %vm424_vm5 }
 0x9d2   :  { %v420_v6 = vsub.f32 1.0, %v419_v4 }
 0x9d4   :  { %v421_v7 = vmul.f32 %v3331_v2, %v420_v6 }
 0x9d6   :  { %v422_v9 = vadd.f32 %v3331_v2, %v421_v7 }
 0x9d8   :  { %v426_v11 = vsel %vm425_vm8, %v3331_v2, %v422_v9 }
 0x9d9   :  { %v431_v14 = vsel %vm428_vm9, %v430_v12, %v426_v11 }
 0x9da   :  { %v437_v17 = vmul.f32 %v435_v16, %v431_v14 }
 0xa37   :  { %v440_v13 = vpop.permute.xlu1 %439 }
 0xa38   :  { %v442_v15 = vmul.f32 %v440_v13, %v431_v14 }
 0xa3a   :  { %444 = vrot.lane.b32.xlu2 %v442_v15, %s3694_s24 }
 0xa42   :  { %233 = vrot.lane.b32.xlu2 %v3769_v58, %s3701_s7 }
 0xa94   :  { %v445_v18 = vpop.permute.xlu2 %444 }
 0xa95   :  { %v3802_v19 = vadd.f32 %v445_v18, %v437_v17 }
 0xa97   :  { %3332 = vtanh.f32 %v3802_v19  ;;  %v506_v9 = vrot.slane %v3802_v19, 6 }
 0xa9c   :  { %v234_v20 = vpop.permute.xlu2 %233 }
 0xa9d   :  { %v3333_v21 = vpop.eup %3332  ;;  %237 = vst.msk [vmem:[#allocation2] sm:$0xc] %vm236_vm10, %v234_v20 }
 0xa9e   :  { %450 = vrot.lane.b32.xlu0 %v3333_v21, %s3700_s6 }
 0xaa6   :  { %308 = vrot.lane.b32.xlu0 %v3778_v25, %s3701_s7 }
 0xb10   :  { %v451_v22 = vpop.permute.xlu0 %450 }
 0xb11   :  { %v453_v23 = vmul.f32 %v451_v22, %v431_v14 }
 0xb13   :  { %455 = vrot.lane.b32.xlu1 %v453_v23, %s3701_s7 }
 0xb18   :  { %v309_v58 = vpop.permute.xlu0 %308 }
 0xb19   :  { %312 = vst.msk [vmem:[#allocation2] sm:$0x30] %vm311_vm11, %v309_v58 }
 0xb1b   :  { %383 = vrot.lane.b32.xlu1 %v381_v52, %s3701_s7 }
 0xb85   :  { %v456_v25 = vpop.permute.xlu1 %455 }
 0xb86   :  { %458 = vst.msk [vmem:[#allocation2 + $0x8] sm:$0x3] %vm164_vm6, %v456_v25  ;;  %3162 = vmatmul.msk.f32.vlgmr.msrb.gmra.mxu3 %vm52_vm1, %v456_v25 }
 0xb87   :  { %3182 = vmatpush.msk.msrb.mxu3 %vm69_vm0, %v3816_v26 }
 0xb8d   :  { %v384_v27 = vpop.permute.xlu1 %383 }
 0xb8e   :  { %387 = vst.msk [vmem:[#allocation2] sm:$0xc0] %vm386_vm12, %v384_v27  ;;  %740 = vmatmul.f32.vlgmr.msra.gmra.mxu3 %v3698_v3 }
 0xb8f   :  { %3194 = vmatpush.msk.msra.mxu3 %vm69_vm0, %v3816_v26 }
 0xb95   :  { %v680_v28 = vld [vmem:[#allocation2] sm:$0xff] }
 0xb96   :  { %3172 = vmatmul.msk.f32.vlgmr.msra.gmra.mxu2 %vm52_vm1, %v680_v28 }
 0xc09   :  { %v478_v29 = vpop.f32.mrf.mxu3 }
 0xc0a   :  { %v482_v30 = vrot.slane %v478_v29, 6 }
 0xc0c   :  { %v484_v31 = vadd.f32 %v482_v30, %v3795_v59 }
 0xc0e   :  { %3334 = vtanh.f32 %v484_v31  ;;  %v3163_v39 = vmul.f32 -1.442695, %v484_v31 }
 0xc11   :  { %v741_v35 = vpop.f32.mrf.mxu3 }
 0xc14   :  { %v3335_v32 = vpop.eup %3334 }
 0xc15   :  { %510 = vrot.lane.b32.xlu2 %v3335_v32, %s3699_s5 }
 0xc19   :  { %v715_v34 = vpop.f32.mrf.mxu2 }
 0xc1a   :  { %v3840_v36 = vadd.f32 %v3837_v33, %v715_v34 }
 0xc1c   :  { %v744_v37 = vadd.f32 %v741_v35, %v3840_v36 }
 0xc1e   :  { %3336 = vtanh.f32 %v744_v37  ;;  %v3175_v47 = vmul.f32 -1.442695, %v744_v37 }
 0xc1f   :  { %3338 = vpow2.f32 %v3163_v39 }
 0xc24   :  { %v3337_v38 = vpop.eup %3336 }
 0xc25   :  { %767 = vrot.lane.b32.xlu0 %v3337_v38, %s3699_s5  ;;  %v3339_v40 = vpop.eup %3338 }
 0xc26   :  { %v488_v41 = vadd.f32 1.0, %v3339_v40 }
 0xc28   :  { %3340 = vrcp.f32 %v488_v41  ;;  %v500_v46 = vand.u32 2147483648, %v488_v41  ;;  %vm494_vm14 = vweird.f32 %v488_v41  ;;  %v498_v48 = vand.u32 2147483647, %v488_v41 }
 0xc29   :  { %3342 = vpow2.f32 %v3175_v47 }
 0xc2a   :  { %v501_v50 = vor.u32 1.1754944e-38, %v500_v46  ;;  %vm499_vm2 = vcmp.eq.f32.partialorder %v498_v48, 8.507059e+37 }
 0xc2e   :  { %v3341_v8 = vpop.eup %3340 }
 0xc2f   :  { %v490_v42 = vmul.f32 %v3341_v8, %v488_v41  ;;  %vm495_vm13 = vweird.f32 %v3341_v8  ;;  %v3343_v54 = vpop.eup %3342 }
 0xc30   :  { %vm496_vm15 = vmor %vm494_vm14, %vm495_vm13  ;;  %v748_v55 = vadd.f32 1.0, %v3343_v54 }
 0xc31   :  { %v491_v43 = vsub.f32 1.0, %v490_v42 }
 0xc32   :  { %3344 = vrcp.f32 %v748_v55  ;;  %v760_v63 = vand.u32 2147483648, %v748_v55  ;;  %vm754_vm4 = vweird.f32 %v748_v55  ;;  %v758_v0 = vand.u32 2147483647, %v748_v55 }
 0xc33   :  { %v492_v44 = vmul.f32 %v3341_v8, %v491_v43 }
 0xc34   :  { %v761_v2 = vor.u32 1.1754944e-38, %v760_v63  ;;  %vm759_vm7 = vcmp.eq.f32.partialorder %v758_v0, 8.507059e+37 }
 0xc35   :  { %v493_v45 = vadd.f32 %v3341_v8, %v492_v44 }
 0xc37   :  { %v497_v49 = vsel %vm496_vm15, %v3341_v8, %v493_v45 }
 0xc38   :  { %v502_v52 = vsel %vm499_vm2, %v501_v50, %v497_v49  ;;  %v3345_v56 = vpop.eup %3344 }
 0xc39   :  { %v750_v57 = vmul.f32 %v3345_v56, %v748_v55  ;;  %vm755_vm3 = vweird.f32 %v3345_v56  ;;  %v508_v5 = vmul.f32 %v506_v9, %v502_v52 }
 0xc3a   :  { %vm756_vm5 = vmor %vm754_vm4, %vm755_vm3 }
 0xc3b   :  { %v751_v60 = vsub.f32 1.0, %v750_v57 }
 0xc3d   :  { %v752_v61 = vmul.f32 %v3345_v56, %v751_v60 }
 0xc3f   :  { %v753_v62 = vadd.f32 %v3345_v56, %v752_v61 }
 0xc41   :  { %v757_v1 = vsel %vm756_vm5, %v3345_v56, %v753_v62 }
 0xc42   :  { %v762_v6 = vsel %vm759_vm7, %v761_v2, %v757_v1 }
 0xc43   :  { %v765_v13 = vmul.f32 0.0, %v762_v6 }
 0xc6f   :  { %v511_v51 = vpop.permute.xlu2 %510 }
 0xc70   :  { %v513_v53 = vmul.f32 %v511_v51, %v502_v52 }
 0xc72   :  { %515 = vrot.lane.b32.xlu1 %v513_v53, %s3694_s24 }
 0xc97   :  { %v768_v4 = vpop.permute.xlu0 %767 }
 0xc98   :  { %v770_v7 = vmul.f32 %v768_v4, %v762_v6 }
 0xc9a   :  { %772 = vrot.lane.b32.xlu2 %v770_v7, %s3694_s24 }
 0xce4   :  { %v516_v10 = vpop.permute.xlu1 %515 }
 0xce5   :  { %v3847_v11 = vadd.f32 %v516_v10, %v508_v5 }
 0xce7   :  { %3346 = vtanh.f32 %v3847_v11  ;;  %v580_v1 = vrot.slane %v3847_v11, 6 }
 0xced   :  { %v3347_v12 = vpop.eup %3346 }
 0xcee   :  { %521 = vrot.lane.b32.xlu0 %v3347_v12, %s3700_s6 }
 0xcf4   :  { %v773_v14 = vpop.permute.xlu2 %772 }
 0xcf5   :  { %v3851_v15 = vadd.f32 %v773_v14, %v765_v13 }
 0xcf7   :  { %3348 = vtanh.f32 %v3851_v15  ;;  %v834_v9 = vrot.slane %v3851_v15, 6 }
 0xcfd   :  { %v3349_v16 = vpop.eup %3348 }
 0xcfe   :  { %778 = vrot.lane.b32.xlu1 %v3349_v16, %s3700_s6 }
 0xd60   :  { %v522_v17 = vpop.permute.xlu0 %521 }
 0xd61   :  { %v3855_v18 = vmul.f32 %v522_v17, %v502_v52 }
 0xd63   :  { %v530_v19 = vrot.slane %v3855_v18, 2 }
 0xd65   :  { %531 = vrot.lane.b32.xlu2 %v530_v19, %s3701_s7 }
 0xd70   :  { %v779_v20 = vpop.permute.xlu1 %778 }
 0xd71   :  { %v781_v21 = vmul.f32 %v779_v20, %v762_v6 }
 0xd73   :  { %783 = vrot.lane.b32.xlu0 %v781_v21, %s3701_s7 }
 0xdbf   :  { %v532_v22 = vpop.permute.xlu2 %531 }
 0xdc0   :  { %3165 = vmatmul.msk.f32.vlgmr.msrb.gmra.mxu0 %vm52_vm1, %v532_v22 }
 0xdc1   :  { %3185 = vmatpush.msk.msrb.mxu0 %vm69_vm0, %v3816_v26 }
 0xde5   :  { %v784_v23 = vpop.permute.xlu0 %783 }
 0xde6   :  { %786 = vst.msk [vmem:[#allocation2] sm:$0x3] %vm164_vm6, %v784_v23  ;;  %3177 = vmatmul.msk.f32.vlgmr.msra.gmra.mxu0 %vm52_vm1, %v784_v23 }
 0xe3d   :  { %v552_v58 = vpop.f32.mrf.mxu0 }
 0xe3e   :  { %v556_v24 = vrot.slane %v552_v58, 4 }
 0xe40   :  { %v558_v25 = vadd.f32 %v556_v24, %v3795_v59 }
 0xe42   :  { %3350 = vtanh.f32 %v558_v25  ;;  %v3166_v32 = vmul.f32 -1.442695, %v558_v25 }
 0xe48   :  { %v3351_v27 = vpop.eup %3350 }
 0xe49   :  { %584 = vrot.lane.b32.xlu1 %v3351_v27, %s3699_s5 }
 0xe63   :  { %v806_v28 = vpop.f32.mrf.mxu0 }
 0xe64   :  { %v810_v29 = vrot.slane %v806_v28, 6 }
 0xe66   :  { %v812_v30 = vadd.f32 %v810_v29, %v3840_v36 }
 0xe68   :  { %3352 = vtanh.f32 %v812_v30  ;;  %v3178_v37 = vmul.f32 -1.442695, %v812_v30 }
 0xe69   :  { %3354 = vpow2.f32 %v3166_v32 }
 0xe6e   :  { %v3353_v31 = vpop.eup %3352 }
 0xe6f   :  { %838 = vrot.lane.b32.xlu2 %v3353_v31, %s3699_s5  ;;  %v3355_v34 = vpop.eup %3354 }
 0xe70   :  { %v562_v35 = vadd.f32 1.0, %v3355_v34 }
 0xe72   :  { %3356 = vrcp.f32 %v562_v35  ;;  %v574_v45 = vand.u32 2147483648, %v562_v35  ;;  %vm568_vm9 = vweird.f32 %v562_v35  ;;  %v572_v46 = vand.u32 2147483647, %v562_v35 }
 0xe73   :  { %3358 = vpow2.f32 %v3178_v37 }
 0xe74   :  { %v575_v49 = vor.u32 1.1754944e-38, %v574_v45  ;;  %vm573_vm14 = vcmp.eq.f32.partialorder %v572_v46, 8.507059e+37 }
 0xe78   :  { %v3357_v38 = vpop.eup %3356 }
 0xe79   :  { %v3359_v39 = vpop.eup %3358  ;;  %v564_v40 = vmul.f32 %v3357_v38, %v562_v35  ;;  %vm569_vm8 = vweird.f32 %v3357_v38 }
 0xe7a   :  { %v816_v41 = vadd.f32 1.0, %v3359_v39  ;;  %vm570_vm13 = vmor %vm568_vm9, %vm569_vm8 }
 0xe7b   :  { %v565_v8 = vsub.f32 1.0, %v564_v40 }
 0xe7c   :  { %3360 = vrcp.f32 %v816_v41  ;;  %v828_v56 = vand.u32 2147483648, %v816_v41  ;;  %vm822_vm2 = vweird.f32 %v816_v41  ;;  %v826_v57 = vand.u32 2147483647, %v816_v41 }
 0xe7d   :  { %v566_v42 = vmul.f32 %v3357_v38, %v565_v8 }
 0xe7e   :  { %v829_v61 = vor.u32 1.1754944e-38, %v828_v56  ;;  %vm827_vm4 = vcmp.eq.f32.partialorder %v826_v57, 8.507059e+37 }
 0xe7f   :  { %v567_v44 = vadd.f32 %v3357_v38, %v566_v42 }
 0xe81   :  { %v571_v48 = vsel %vm570_vm13, %v3357_v38, %v567_v44 }
 0xe82   :  { %v3361_v43 = vpop.eup %3360  ;;  %v576_v52 = vsel %vm573_vm14, %v575_v49, %v571_v48 }
 0xe83   :  { %v818_v47 = vmul.f32 %v3361_v43, %v816_v41  ;;  %vm823_vm15 = vweird.f32 %v3361_v43  ;;  %v582_v2 = vmul.f32 %v580_v1, %v576_v52 }
 0xe84   :  { %vm824_vm3 = vmor %vm822_vm2, %vm823_vm15 }
 0xe85   :  { %v819_v50 = vsub.f32 1.0, %v818_v47 }
 0xe87   :  { %v820_v54 = vmul.f32 %v3361_v43, %v819_v50 }
 0xe89   :  { %v821_v55 = vadd.f32 %v3361_v43, %v820_v54 }
 0xe8b   :  { %v825_v60 = vsel %vm824_vm3, %v3361_v43, %v821_v55 }
 0xe8c   :  { %v830_v63 = vsel %vm827_vm4, %v829_v61, %v825_v60 }
 0xe8d   :  { %v836_v5 = vmul.f32 %v834_v9, %v830_v63 }
 0xebb   :  { %v585_v51 = vpop.permute.xlu1 %584 }
 0xebc   :  { %v587_v53 = vmul.f32 %v585_v51, %v576_v52 }
 0xebe   :  { %589 = vrot.lane.b32.xlu0 %v587_v53, %s3694_s24 }
 0xec9   :  { %v839_v62 = vpop.permute.xlu2 %838 }
 0xeca   :  { %v841_v0 = vmul.f32 %v839_v62, %v830_v63 }
 0xecc   :  { %843 = vrot.lane.b32.xlu1 %v841_v0, %s3694_s24 }
 0xf30   :  { %v590_v4 = vpop.permute.xlu0 %589 }
 0xf31   :  { %v3872_v6 = vadd.f32 %v590_v4, %v582_v2 }
 0xf33   :  { %3362 = vtanh.f32 %v3872_v6 }
 0xf39   :  { %v3363_v7 = vpop.eup %3362 }
 0xf3a   :  { %595 = vrot.lane.b32.xlu2 %v3363_v7, %s3700_s6 }
 0xf3e   :  { %v844_v10 = vpop.permute.xlu1 %843 }
 0xf3f   :  { %v846_v12 = vadd.f32 %v844_v10, %v836_v5 }
 0xf41   :  { %3364 = vtanh.f32 %v846_v12  ;;  %v908_v45 = vrot.slane %v846_v12, 6 }
 0xf47   :  { %v3365_v13 = vpop.eup %3364 }
 0xf48   :  { %849 = vrot.lane.b32.xlu0 %v3365_v13, %s3700_s6  ;;  %v654_v13 = vrot.slane %v3872_v6, 6 }
 0xf94   :  { %v596_v14 = vpop.permute.xlu2 %595 }
 0xf95   :  { %v3878_v11 = vmul.f32 %v596_v14, %v576_v52 }
 0xf97   :  { %v604_v16 = vrot.slane %v3878_v11, 4 }
 0xf99   :  { %605 = vrot.lane.b32.xlu1 %v604_v16, %s3701_s7 }
 0xfba   :  { %v850_v17 = vpop.permute.xlu0 %849 }
 0xfbb   :  { %v3882_v19 = vmul.f32 %v850_v17, %v830_v63 }
 0xfbd   :  { %v858_v20 = vrot.slane %v3882_v19, 2 }
 0xfbf   :  { %859 = vrot.lane.b32.xlu2 %v858_v20, %s3701_s7 }
0x100b   :  { %v606_v15 = vpop.permute.xlu1 %605 }
0x100c   :  { %3168 = vmatmul.msk.f32.vlgmr.msra.gmra.mxu1 %vm52_vm1, %v606_v15 }
0x100d   :  { %3188 = vmatpush.msk.msra.mxu1 %vm69_vm0, %v3816_v26 }
0x1019   :  { %v860_v21 = vpop.permute.xlu2 %859 }
0x101a   :  { %3180 = vmatmul.msk.f32.vlgmr.msrb.gmra.mxu1 %vm52_vm1, %v860_v21 }
0x1089   :  { %v626_v22 = vpop.f32.mrf.mxu1 }
0x108a   :  { %v630_v38 = vrot.slane %v626_v22, 2 }
0x108c   :  { %v632_v41 = vadd.f32 %v630_v38, %v3795_v59 }
0x108e   :  { %v3169_v59 = vmul.f32 -1.442695, %v632_v41 }
0x1097   :  { %v880_v23 = vpop.f32.mrf.mxu1 }
0x1098   :  { %v884_v58 = vrot.slane %v880_v23, 4 }
0x109a   :  { %v886_v24 = vadd.f32 %v884_v58, %v3840_v36 }
0x109c   :  { %3366 = vtanh.f32 %v886_v24  ;;  %v3181_v27 = vmul.f32 -1.442695, %v886_v24 }
0x109e   :  { %3368 = vpow2.f32 %v3181_v27 }
0x10a2   :  { %v3367_v25 = vpop.eup %3366 }
0x10a3   :  { %912 = vrot.lane.b32.xlu0 %v3367_v25, %s3699_s5 }
0x10a4   :  { %v3369_v28 = vpop.eup %3368 }
0x10a5   :  { %v890_v29 = vadd.f32 1.0, %v3369_v28 }
0x10a7   :  { %3370 = vrcp.f32 %v890_v29  ;;  %v902_v35 = vand.u32 2147483648, %v890_v29  ;;  %vm896_vm7 = vweird.f32 %v890_v29  ;;  %v900_v37 = vand.u32 2147483647, %v890_v29 }
0x10a8   :  { %3372 = vtanh.f32 %v632_v41 }
0x10a9   :  { %v903_v40 = vor.u32 1.1754944e-38, %v902_v35  ;;  %vm901_vm9 = vcmp.eq.f32.partialorder %v900_v37, 8.507059e+37 }
0x10ad   :  { %v3371_v30 = vpop.eup %3370 }
0x10ae   :  { %v892_v31 = vmul.f32 %v3371_v30, %v890_v29  ;;  %vm897_vm5 = vweird.f32 %v3371_v30  ;;  %v3373_v44 = vpop.eup %3372 }
0x10af   :  { %vm898_vm8 = vmor %vm896_vm7, %vm897_vm5 }
0x10b0   :  { %v893_v26 = vsub.f32 1.0, %v892_v31 }
0x10b2   :  { %v894_v32 = vmul.f32 %v3371_v30, %v893_v26 }
0x10b4   :  { %v895_v34 = vadd.f32 %v3371_v30, %v894_v32 }
0x10b6   :  { %v899_v39 = vsel %vm898_vm8, %v3371_v30, %v895_v34 }
0x10b7   :  { %v904_v42 = vsel %vm901_vm9, %v903_v40, %v899_v39 }
0x10b8   :  { %v910_v46 = vmul.f32 %v908_v45, %v904_v42 }
0x1115   :  { %v913_v8 = vpop.permute.xlu0 %912 }
0x1116   :  { %v915_v43 = vmul.f32 %v913_v8, %v904_v42 }
0x1118   :  { %917 = vrot.lane.b32.xlu1 %v915_v43, %s3694_s24 }
0x1120   :  { %658 = vrot.lane.b32.xlu1 %v3373_v44, %s3699_s5 }
0x118a   :  { %v918_v47 = vpop.permute.xlu1 %917 }
0x118b   :  { %v3895_v48 = vadd.f32 %v918_v47, %v910_v46 }
0x118d   :  { %3374 = vtanh.f32 %v3895_v48  ;;  %v982_v35 = vrot.slane %v3895_v48, 6 }
0x118e   :  { %3376 = vpow2.f32 %v3169_v59 }
0x1192   :  { %v659_v1 = vpop.permute.xlu1 %658 }
0x1193   :  { %v3375_v49 = vpop.eup %3374 }
0x1194   :  { %923 = vrot.lane.b32.xlu2 %v3375_v49, %s3700_s6  ;;  %v3377_v50 = vpop.eup %3376 }
0x1195   :  { %v636_v51 = vadd.f32 1.0, %v3377_v50 }
0x1197   :  { %3378 = vrcp.f32 %v636_v51  ;;  %v648_v62 = vand.u32 2147483648, %v636_v51  ;;  %vm642_vm14 = vweird.f32 %v636_v51  ;;  %v646_v63 = vand.u32 2147483647, %v636_v51 }
0x1199   :  { %v649_v2 = vor.u32 1.1754944e-38, %v648_v62  ;;  %vm647_vm2 = vcmp.eq.f32.partialorder %v646_v63, 8.507059e+37 }
0x119d   :  { %v3379_v52 = vpop.eup %3378 }
0x119e   :  { %v638_v53 = vmul.f32 %v3379_v52, %v636_v51  ;;  %vm643_vm13 = vweird.f32 %v3379_v52 }
0x119f   :  { %vm644_vm15 = vmor %vm642_vm14, %vm643_vm13 }
0x11a0   :  { %v639_v54 = vsub.f32 1.0, %v638_v53 }
0x11a2   :  { %v640_v55 = vmul.f32 %v3379_v52, %v639_v54 }
0x11a4   :  { %v641_v60 = vadd.f32 %v3379_v52, %v640_v55 }
0x11a6   :  { %v645_v0 = vsel %vm644_vm15, %v3379_v52, %v641_v60 }
0x11a7   :  { %v650_v4 = vsel %vm647_vm2, %v649_v2, %v645_v0 }
0x11a8   :  { %v661_v7 = vmul.f32 %v659_v1, %v650_v4  ;;  %v656_v16 = vmul.f32 %v654_v13, %v650_v4 }
0x11ee   :  { %v924_v56 = vpop.permute.xlu2 %923 }
0x11ef   :  { %v3899_v57 = vmul.f32 %v924_v56, %v904_v42 }
0x11f1   :  { %v932_v61 = vrot.slane %v3899_v57, 4 }
0x11f3   :  { %933 = vrot.lane.b32.xlu0 %v932_v61, %s3701_s7 }
0x11fb   :  { %663 = vrot.lane.b32.xlu0 %v661_v7, %s3694_s24 }
0x1265   :  { %v934_v9 = vpop.permute.xlu0 %933 }
0x1266   :  { %3183 = vmatmul.msk.f32.vlgmr.msrb.gmra.mxu3 %vm52_vm1, %v934_v9 }
0x126d   :  { %v664_v14 = vpop.permute.xlu0 %663 }
0x126e   :  { %v666_v17 = vadd.f32 %v664_v14, %v656_v16 }
0x12e9   :  { %v954_v5 = vpop.f32.mrf.mxu3 }
0x12ea   :  { %v958_v10 = vrot.slane %v954_v5, 2 }
0x12ec   :  { %v960_v12 = vadd.f32 %v958_v10, %v3840_v36 }
0x12ee   :  { %3380 = vtanh.f32 %v960_v12  ;;  %v3184_v21 = vmul.f32 -1.442695, %v960_v12 }
0x12ef   :  { %3382 = vtanh.f32 %v666_v17  ;;  %v3197_v17 = vld [vmem:[%s4334_s1 + $0x8] sm:$0xf] }
0x12f0   :  { %3384 = vpow2.f32 %v3184_v21  ;;  %3198 = vmatpush.msk.msra.mxu0 %vm69_vm0, %v3197_v17 }
0x12f4   :  { %v3381_v20 = vpop.eup %3380 }
0x12f5   :  { %986 = vrot.lane.b32.xlu2 %v3381_v20, %s3699_s5  ;;  %v3383_v15 = vpop.eup %3382  ;;  %v3944_v20 = vld [vmem:[#allocation3 + $0x8] sm:$0xf] }
0x12f6   :  { %v3385_v22 = vpop.eup %3384  ;;  %3201 = vmatpush.msk.msrb.mxu1 %vm69_vm0, %v3944_v20  ;;  %3203 = vmatpush.msk.msra.mxu2 %vm69_vm0, %v3944_v20 }
0x12f7   :  { %v964_v36 = vadd.f32 1.0, %v3385_v22  ;;  %3206 = vmatpush.msk.msrb.mxu3 %vm69_vm0, %v3944_v20 }
0x12f9   :  { %3386 = vrcp.f32 %v964_v36  ;;  %v976_v27 = vand.u32 2147483648, %v964_v36  ;;  %vm970_vm4 = vweird.f32 %v964_v36  ;;  %v974_v28 = vand.u32 2147483647, %v964_v36 }
0x12fb   :  { %v977_v30 = vor.u32 1.1754944e-38, %v976_v27  ;;  %vm975_vm7 = vcmp.eq.f32.partialorder %v974_v28, 8.507059e+37 }
0x12fd   :  { %669 = vrot.lane.b32.xlu2 %v3383_v15, %s3700_s6 }
0x12ff   :  { %v3387_v6 = vpop.eup %3386 }
0x1300   :  { %v966_v23 = vmul.f32 %v3387_v6, %v964_v36  ;;  %vm971_vm3 = vweird.f32 %v3387_v6 }
0x1301   :  { %vm972_vm5 = vmor %vm970_vm4, %vm971_vm3 }
0x1302   :  { %v967_v58 = vsub.f32 1.0, %v966_v23 }
0x1304   :  { %v968_v24 = vmul.f32 %v3387_v6, %v967_v58  ;;  %v3966_v58 = vld [vmem:[#allocation6 + $0x2] ss:$0 sm:$0xff] }
0x1305   :  { %600 = vrot.lane.b32.xlu2 %v3878_v11, %s3701_s7 }
0x1306   :  { %v969_v25 = vadd.f32 %v3387_v6, %v968_v24 }
0x1308   :  { %v973_v29 = vsel %vm972_vm5, %v3387_v6, %v969_v25 }
0x1309   :  { %v978_v11 = vsel %vm975_vm7, %v977_v30, %v973_v29 }
0x130a   :  { %v984_v37 = vmul.f32 %v982_v35, %v978_v11 }
0x134f   :  { %v987_v31 = vpop.permute.xlu2 %986 }
0x1350   :  { %v989_v26 = vmul.f32 %v987_v31, %v978_v11 }
0x1352   :  { %991 = vrot.lane.b32.xlu1 %v989_v26, %s3694_s24 }
0x1357   :  { %v670_v32 = vpop.permute.xlu2 %669 }
0x1358   :  { %v672_v8 = vmul.f32 %v670_v32, %v650_v4 }
0x135a   :  { %526 = vrot.lane.b32.xlu1 %v3855_v18, %s3701_s7 }
0x135f   :  { %v601_v34 = vpop.permute.xlu2 %600 }
0x1360   :  { %603 = vst.msk [vmem:[#allocation2 + $0x8] sm:$0x30] %vm311_vm11, %v601_v34 }
0x13c4   :  { %v992_v38 = vpop.permute.xlu1 %991 }
0x13c5   :  { %v994_v39 = vadd.f32 %v992_v38, %v984_v37 }
0x13c7   :  { %3388 = vtanh.f32 %v994_v39  ;;  %v1053_v7 = vrot.slane %v994_v39, 6 }
0x13cc   :  { %v527_v40 = vpop.permute.xlu1 %526 }
0x13cd   :  { %v3389_v41 = vpop.eup %3388  ;;  %529 = vst.msk [vmem:[#allocation2 + $0x8] sm:$0xc] %vm236_vm10, %v527_v40 }
0x13ce   :  { %997 = vrot.lane.b32.xlu0 %v3389_v41, %s3700_s6 }
0x13d6   :  { %674 = vrot.lane.b32.xlu0 %v672_v8, %s3701_s7 }
0x1440   :  { %v998_v42 = vpop.permute.xlu0 %997 }
0x1441   :  { %v1000_v18 = vmul.f32 %v998_v42, %v978_v11 }
0x1443   :  { %v1006_v43 = vrot.slane %v1000_v18, 6 }
0x1445   :  { %1007 = vrot.lane.b32.xlu1 %v1006_v43, %s3701_s7 }
0x1448   :  { %v675_v44 = vpop.permute.xlu0 %674 }
0x1449   :  { %677 = vst.msk [vmem:[#allocation2 + $0x8] sm:$0xc0] %vm386_vm12, %v675_v44 }
0x1450   :  { %v681_v45 = vld [vmem:[#allocation2 + $0x8] sm:$0xff] }
0x1451   :  { %3173 = vmatmul.msk.f32.gmra.mxu2 %vm52_vm1, %v681_v45 }
0x14b7   :  { %v1008_v46 = vpop.permute.xlu1 %1007 }
0x14b8   :  { %3186 = vmatmul.msk.f32.vlgmr.msrb.gmra.mxu0 %vm52_vm1, %v1008_v46 }
0x14b9   :  { %3218 = vmatpush.msk.msrb.mxu0 %vm69_vm0, %v3944_v20 }
0x14d4   :  { %v718_v47 = vpop.f32.mrf.mxu2 }
0x14d5   :  { %v3924_v48 = vadd.f32 %v3837_v33, %v718_v47 }
0x1535   :  { %v1028_v49 = vpop.f32.mrf.mxu0 }
0x1536   :  { %v1031_v59 = vadd.f32 %v1028_v49, %v3924_v48 }
0x1538   :  { %3390 = vtanh.f32 %v1031_v59  ;;  %v3187_v51 = vmul.f32 -1.442695, %v1031_v59 }
0x153a   :  { %3392 = vpow2.f32 %v3187_v51 }
0x153e   :  { %v3391_v50 = vpop.eup %3390 }
0x153f   :  { %1057 = vrot.lane.b32.xlu2 %v3391_v50, %s3699_s5 }
0x1540   :  { %v3393_v52 = vpop.eup %3392 }
0x1541   :  { %v1035_v53 = vadd.f32 1.0, %v3393_v52 }
0x1543   :  { %3394 = vrcp.f32 %v1035_v53  ;;  %v1047_v33 = vand.u32 2147483648, %v1035_v53  ;;  %vm1041_vm9 = vweird.f32 %v1035_v53  ;;  %v1045_v62 = vand.u32 2147483647, %v1035_v53 }
0x1545   :  { %v1048_v0 = vor.u32 1.1754944e-38, %v1047_v33  ;;  %vm1046_vm14 = vcmp.eq.f32.partialorder %v1045_v62, 8.507059e+37 }
0x1549   :  { %v3395_v54 = vpop.eup %3394 }
0x154a   :  { %v1037_v55 = vmul.f32 %v3395_v54, %v1035_v53  ;;  %vm1042_vm8 = vweird.f32 %v3395_v54 }
0x154b   :  { %vm1043_vm13 = vmor %vm1041_vm9, %vm1042_vm8 }
0x154c   :  { %v1038_v56 = vsub.f32 1.0, %v1037_v55 }
0x154e   :  { %v1039_v60 = vmul.f32 %v3395_v54, %v1038_v56 }
0x1550   :  { %v1040_v61 = vadd.f32 %v3395_v54, %v1039_v60 }
0x1552   :  { %v1044_v63 = vsel %vm1043_vm13, %v3395_v54, %v1040_v61 }
0x1553   :  { %v1049_v2 = vsel %vm1046_vm14, %v1048_v0, %v1044_v63 }
0x1554   :  { %v1055_v9 = vmul.f32 %v1053_v7, %v1049_v2 }
0x1599   :  { %v1058_v1 = vpop.permute.xlu2 %1057 }
0x159a   :  { %v1060_v4 = vmul.f32 %v1058_v1, %v1049_v2 }
0x159c   :  { %1062 = vrot.lane.b32.xlu0 %v1060_v4, %s3694_s24 }
0x15a4   :  { %854 = vrot.lane.b32.xlu0 %v3882_v19, %s3701_s7 }
0x160e   :  { %v1063_v5 = vpop.permute.xlu0 %1062 }
0x160f   :  { %v3931_v10 = vadd.f32 %v1063_v5, %v1055_v9 }
0x1611   :  { %3396 = vtanh.f32 %v3931_v10  ;;  %v1124_v61 = vrot.slane %v3931_v10, 6 }
0x1616   :  { %v855_v12 = vpop.permute.xlu0 %854 }
0x1617   :  { %v3397_v13 = vpop.eup %3396  ;;  %857 = vst.msk [vmem:[#allocation2] sm:$0xc] %vm236_vm10, %v855_v12 }
0x1618   :  { %1068 = vrot.lane.b32.xlu1 %v3397_v13, %s3700_s6 }
0x1620   :  { %928 = vrot.lane.b32.xlu1 %v3899_v57, %s3701_s7 }
0x168a   :  { %v1069_v14 = vpop.permute.xlu1 %1068 }
0x168b   :  { %v1071_v16 = vmul.f32 %v1069_v14, %v1049_v2 }
0x168d   :  { %1073 = vrot.lane.b32.xlu2 %v1071_v16, %s3701_s7 }
0x1692   :  { %v929_v19 = vpop.permute.xlu1 %928 }
0x1693   :  { %931 = vst.msk [vmem:[#allocation2] sm:$0x30] %vm311_vm11, %v929_v19 }
0x1695   :  { %1002 = vrot.lane.b32.xlu2 %v1000_v18, %s3701_s7 }
0x16e7   :  { %v1074_v57 = vpop.permute.xlu2 %1073 }
0x16e8   :  { %1076 = vst.msk [vmem:[#allocation2 + $0x8] sm:$0x3] %vm164_vm6, %v1074_v57  ;;  %3189 = vmatmul.msk.f32.vlgmr.msra.gmra.mxu1 %vm52_vm1, %v1074_v57 }
0x16e9   :  { %3209 = vmatpush.msk.msra.mxu1 %vm69_vm0, %v3944_v20 }
0x16ef   :  { %v1003_v15 = vpop.permute.xlu2 %1002 }
0x16f0   :  { %1005 = vst.msk [vmem:[#allocation2] sm:$0xc0] %vm386_vm12, %v1003_v15  ;;  %1358 = vmatmul.f32.vlgmr.msrb.gmra.mxu1 %v3698_v3 }
0x16f1   :  { %3221 = vmatpush.msk.msrb.mxu1 %vm69_vm0, %v3944_v20 }
0x16f7   :  { %v1298_v21 = vld [vmem:[#allocation2] sm:$0xff] }
0x16f8   :  { %3199 = vmatmul.msk.f32.vlgmr.msra.gmra.mxu0 %vm52_vm1, %v1298_v21 }
0x1765   :  { %v1096_v22 = vpop.f32.mrf.mxu1 }
0x1766   :  { %v1100_v36 = vrot.slane %v1096_v22, 6 }
0x1768   :  { %v1102_v6 = vadd.f32 %v1100_v36, %v3924_v48 }
0x176a   :  { %3398 = vtanh.f32 %v1102_v6  ;;  %v3190_v30 = vmul.f32 -1.442695, %v1102_v6 }
0x176d   :  { %v1359_v25 = vpop.f32.mrf.mxu1 }
0x1770   :  { %v3399_v23 = vpop.eup %3398 }
0x1771   :  { %1128 = vrot.lane.b32.xlu0 %v3399_v23, %s3699_s5 }
0x1775   :  { %v1333_v24 = vpop.f32.mrf.mxu0 }
0x1776   :  { %v3969_v27 = vadd.f32 %v3966_v58, %v1333_v24 }
0x1778   :  { %v1362_v28 = vadd.f32 %v1359_v25, %v3969_v27 }
0x177a   :  { %3400 = vtanh.f32 %v1362_v28  ;;  %v3202_v26 = vmul.f32 -1.442695, %v1362_v28 }
0x177b   :  { %3402 = vpow2.f32 %v3190_v30 }
0x1780   :  { %v3401_v29 = vpop.eup %3400 }
0x1781   :  { %1385 = vrot.lane.b32.xlu1 %v3401_v29, %s3699_s5  ;;  %v3403_v31 = vpop.eup %3402 }
0x1782   :  { %v1106_v11 = vadd.f32 1.0, %v3403_v31 }
0x1784   :  { %3404 = vrcp.f32 %v1106_v11  ;;  %v1118_v8 = vand.u32 2147483648, %v1106_v11  ;;  %vm1112_vm2 = vweird.f32 %v1106_v11  ;;  %v1116_v42 = vand.u32 2147483647, %v1106_v11 }
0x1785   :  { %3406 = vpow2.f32 %v3202_v26 }
0x1786   :  { %v1119_v44 = vor.u32 1.1754944e-38, %v1118_v8  ;;  %vm1117_vm4 = vcmp.eq.f32.partialorder %v1116_v42, 8.507059e+37 }
0x178a   :  { %v3405_v32 = vpop.eup %3404 }
0x178b   :  { %v3407_v34 = vpop.eup %3406  ;;  %v1108_v35 = vmul.f32 %v3405_v32, %v1106_v11  ;;  %vm1113_vm15 = vweird.f32 %v3405_v32 }
0x178c   :  { %v1366_v37 = vadd.f32 1.0, %v3407_v34  ;;  %vm1114_vm3 = vmor %vm1112_vm2, %vm1113_vm15 }
0x178d   :  { %v1109_v38 = vsub.f32 1.0, %v1108_v35 }
0x178e   :  { %3408 = vrcp.f32 %v1366_v37  ;;  %v1378_v51 = vand.u32 2147483648, %v1366_v37  ;;  %vm1372_vm7 = vweird.f32 %v1366_v37  ;;  %v1376_v52 = vand.u32 2147483647, %v1366_v37 }
0x178f   :  { %v1110_v39 = vmul.f32 %v3405_v32, %v1109_v38 }
0x1790   :  { %v1379_v54 = vor.u32 1.1754944e-38, %v1378_v51  ;;  %vm1377_vm9 = vcmp.eq.f32.partialorder %v1376_v52, 8.507059e+37 }
0x1791   :  { %v1111_v40 = vadd.f32 %v3405_v32, %v1110_v39 }
0x1793   :  { %v1115_v18 = vsel %vm1114_vm3, %v3405_v32, %v1111_v40 }
0x1794   :  { %v3409_v41 = vpop.eup %3408  ;;  %v1120_v46 = vsel %vm1117_vm4, %v1119_v44, %v1115_v18 }
0x1795   :  { %v1368_v43 = vmul.f32 %v3409_v41, %v1366_v37  ;;  %vm1373_vm5 = vweird.f32 %v3409_v41  ;;  %v1126_v33 = vmul.f32 %v1124_v61, %v1120_v46 }
0x1796   :  { %vm1374_vm8 = vmor %vm1372_vm7, %vm1373_vm5 }
0x1797   :  { %v1369_v49 = vsub.f32 1.0, %v1368_v43 }
0x1799   :  { %v1370_v59 = vmul.f32 %v3409_v41, %v1369_v49 }
0x179b   :  { %v1371_v50 = vadd.f32 %v3409_v41, %v1370_v59 }
0x179d   :  { %v1375_v53 = vsel %vm1374_vm8, %v3409_v41, %v1371_v50 }
0x179e   :  { %v1380_v56 = vsel %vm1377_vm9, %v1379_v54, %v1375_v53 }
0x179f   :  { %v1383_v1 = vmul.f32 0.0, %v1380_v56 }
0x17e3   :  { %v1129_v45 = vpop.permute.xlu0 %1128 }
0x17e4   :  { %v1131_v47 = vmul.f32 %v1129_v45, %v1120_v46 }
0x17e6   :  { %1133 = vrot.lane.b32.xlu2 %v1131_v47, %s3694_s24 }
0x17f3   :  { %v1386_v55 = vpop.permute.xlu1 %1385 }
0x17f4   :  { %v1388_v60 = vmul.f32 %v1386_v55, %v1380_v56 }
0x17f6   :  { %1390 = vrot.lane.b32.xlu0 %v1388_v60, %s3694_s24 }
0x1840   :  { %v1134_v62 = vpop.permute.xlu2 %1133 }
0x1841   :  { %v3976_v63 = vadd.f32 %v1134_v62, %v1126_v33 }
0x1843   :  { %3410 = vtanh.f32 %v3976_v63  ;;  %v1198_v53 = vrot.slane %v3976_v63, 6 }
0x1849   :  { %v3411_v0 = vpop.eup %3410 }
0x184a   :  { %1139 = vrot.lane.b32.xlu1 %v3411_v0, %s3700_s6 }
0x1868   :  { %v1391_v2 = vpop.permute.xlu0 %1390 }
0x1869   :  { %v3980_v4 = vadd.f32 %v1391_v2, %v1383_v1 }
0x186b   :  { %3412 = vtanh.f32 %v3980_v4  ;;  %v1452_v61 = vrot.slane %v3980_v4, 6 }
0x1871   :  { %v3413_v7 = vpop.eup %3412 }
0x1872   :  { %1396 = vrot.lane.b32.xlu2 %v3413_v7, %s3700_s6 }
0x18bc   :  { %v1140_v9 = vpop.permute.xlu1 %1139 }
0x18bd   :  { %v3984_v5 = vmul.f32 %v1140_v9, %v1120_v46 }
0x18bf   :  { %v1148_v10 = vrot.slane %v3984_v5, 2 }
0x18c1   :  { %1149 = vrot.lane.b32.xlu0 %v1148_v10, %s3701_s7 }
0x18cc   :  { %v1397_v12 = vpop.permute.xlu2 %1396 }
0x18cd   :  { %v1399_v13 = vmul.f32 %v1397_v12, %v1380_v56 }
0x18cf   :  { %1401 = vrot.lane.b32.xlu1 %v1399_v13, %s3701_s7 }
0x1933   :  { %v1150_v14 = vpop.permute.xlu0 %1149 }
0x1934   :  { %3192 = vmatmul.msk.f32.vlgmr.msrb.gmra.mxu2 %vm52_vm1, %v1150_v14 }
0x1935   :  { %3212 = vmatpush.msk.msrb.mxu2 %vm69_vm0, %v3944_v20 }
0x1941   :  { %v1402_v16 = vpop.permute.xlu1 %1401 }
0x1942   :  { %1404 = vst.msk [vmem:[#allocation2] sm:$0x3] %vm164_vm6, %v1402_v16  ;;  %3204 = vmatmul.msk.f32.vlgmr.msra.gmra.mxu2 %vm52_vm1, %v1402_v16 }
0x19b7   :  { %v1170_v19 = vpop.f32.mrf.mxu2 }
0x19b8   :  { %v1174_v17 = vrot.slane %v1170_v19, 4 }
0x19ba   :  { %v1176_v57 = vadd.f32 %v1174_v17, %v3924_v48 }
0x19bc   :  { %3414 = vtanh.f32 %v1176_v57  ;;  %v3193_v23 = vmul.f32 -1.442695, %v1176_v57 }
0x19c2   :  { %v3415_v15 = vpop.eup %3414 }
0x19c3   :  { %1202 = vrot.lane.b32.xlu2 %v3415_v15, %s3699_s5 }
0x19c5   :  { %v1424_v21 = vpop.f32.mrf.mxu2 }
0x19c6   :  { %v1428_v22 = vrot.slane %v1424_v21, 6 }
0x19c8   :  { %v1430_v36 = vadd.f32 %v1428_v22, %v3969_v27 }
0x19ca   :  { %3416 = vtanh.f32 %v1430_v36  ;;  %v3205_v11 = vmul.f32 -1.442695, %v1430_v36 }
0x19cb   :  { %3418 = vpow2.f32 %v3193_v23 }
0x19d0   :  { %v3417_v6 = vpop.eup %3416 }
0x19d1   :  { %1456 = vrot.lane.b32.xlu0 %v3417_v6, %s3699_s5  ;;  %v3419_v24 = vpop.eup %3418 }
0x19d2   :  { %v1180_v25 = vadd.f32 1.0, %v3419_v24 }
0x19d4   :  { %3420 = vrcp.f32 %v1180_v25  ;;  %v1192_v32 = vand.u32 2147483648, %v1180_v25  ;;  %vm1186_vm14 = vweird.f32 %v1180_v25  ;;  %v1190_v34 = vand.u32 2147483647, %v1180_v25 }
0x19d5   :  { %3422 = vpow2.f32 %v3205_v11 }
0x19d6   :  { %v1193_v37 = vor.u32 1.1754944e-38, %v1192_v32  ;;  %vm1191_vm2 = vcmp.eq.f32.partialorder %v1190_v34, 8.507059e+37 }
0x19da   :  { %v3421_v28 = vpop.eup %3420 }
0x19db   :  { %v1182_v29 = vmul.f32 %v3421_v28, %v1180_v25  ;;  %vm1187_vm13 = vweird.f32 %v3421_v28  ;;  %v3423_v41 = vpop.eup %3422 }
0x19dc   :  { %vm1188_vm15 = vmor %vm1186_vm14, %vm1187_vm13  ;;  %v1434_v8 = vadd.f32 1.0, %v3423_v41 }
0x19dd   :  { %v1183_v30 = vsub.f32 1.0, %v1182_v29 }
0x19de   :  { %3424 = vrcp.f32 %v1434_v8  ;;  %v1446_v46 = vand.u32 2147483648, %v1434_v8  ;;  %vm1440_vm4 = vweird.f32 %v1434_v8  ;;  %v1444_v47 = vand.u32 2147483647, %v1434_v8 }
0x19df   :  { %v1184_v31 = vmul.f32 %v3421_v28, %v1183_v30 }
0x19e0   :  { %v1447_v59 = vor.u32 1.1754944e-38, %v1446_v46  ;;  %vm1445_vm7 = vcmp.eq.f32.partialorder %v1444_v47, 8.507059e+37 }
0x19e1   :  { %v1185_v26 = vadd.f32 %v3421_v28, %v1184_v31 }
0x19e3   :  { %v1189_v35 = vsel %vm1188_vm15, %v3421_v28, %v1185_v26 }
0x19e4   :  { %v1194_v38 = vsel %vm1191_vm2, %v1193_v37, %v1189_v35  ;;  %v3425_v42 = vpop.eup %3424 }
0x19e5   :  { %v1436_v18 = vmul.f32 %v3425_v42, %v1434_v8  ;;  %vm1441_vm3 = vweird.f32 %v3425_v42  ;;  %v1200_v54 = vmul.f32 %v1198_v53, %v1194_v38 }
0x19e6   :  { %vm1442_vm5 = vmor %vm1440_vm4, %vm1441_vm3 }
0x19e7   :  { %v1437_v43 = vsub.f32 1.0, %v1436_v18 }
0x19e9   :  { %v1438_v44 = vmul.f32 %v3425_v42, %v1437_v43 }
0x19eb   :  { %v1439_v45 = vadd.f32 %v3425_v42, %v1438_v44 }
0x19ed   :  { %v1443_v49 = vsel %vm1442_vm5, %v3425_v42, %v1439_v45 }
0x19ee   :  { %v1448_v51 = vsel %vm1445_vm7, %v1447_v59, %v1443_v49 }
0x19ef   :  { %v1454_v33 = vmul.f32 %v1452_v61, %v1448_v51 }
0x1a1d   :  { %v1203_v39 = vpop.permute.xlu2 %1202 }
0x1a1e   :  { %v1205_v40 = vmul.f32 %v1203_v39, %v1194_v38 }
0x1a20   :  { %1207 = vrot.lane.b32.xlu1 %v1205_v40, %s3694_s24 }
0x1a43   :  { %v1457_v50 = vpop.permute.xlu0 %1456 }
0x1a44   :  { %v1459_v52 = vmul.f32 %v1457_v50, %v1448_v51 }
0x1a46   :  { %1461 = vrot.lane.b32.xlu2 %v1459_v52, %s3694_s24 }
0x1a92   :  { %v1208_v55 = vpop.permute.xlu1 %1207 }
0x1a93   :  { %v4001_v56 = vadd.f32 %v1208_v55, %v1200_v54 }
0x1a95   :  { %3426 = vtanh.f32 %v4001_v56 }
0x1a9b   :  { %v3427_v60 = vpop.eup %3426 }
0x1a9c   :  { %1213 = vrot.lane.b32.xlu0 %v3427_v60, %s3700_s6 }
0x1aa0   :  { %v1462_v62 = vpop.permute.xlu2 %1461 }
0x1aa1   :  { %v1464_v0 = vadd.f32 %v1462_v62, %v1454_v33 }
0x1aa3   :  { %3428 = vtanh.f32 %v1464_v0  ;;  %v1526_v37 = vrot.slane %v1464_v0, 6 }
0x1aa9   :  { %v3429_v1 = vpop.eup %3428 }
0x1aaa   :  { %1467 = vrot.lane.b32.xlu1 %v3429_v1, %s3700_s6  ;;  %v1272_v1 = vrot.slane %v4001_v56, 6 }
0x1b0e   :  { %v1214_v2 = vpop.permute.xlu0 %1213 }
0x1b0f   :  { %v4007_v63 = vmul.f32 %v1214_v2, %v1194_v38 }
0x1b11   :  { %v1222_v7 = vrot.slane %v4007_v63, 4 }
0x1b13   :  { %1223 = vrot.lane.b32.xlu2 %v1222_v7, %s3701_s7 }
0x1b1c   :  { %v1468_v9 = vpop.permute.xlu1 %1467 }
0x1b1d   :  { %v4011_v10 = vmul.f32 %v1468_v9, %v1448_v51 }
0x1b1f   :  { %v1476_v12 = vrot.slane %v4011_v10, 2 }
0x1b21   :  { %1477 = vrot.lane.b32.xlu0 %v1476_v12, %s3701_s7 }
0x1b6d   :  { %v1224_v4 = vpop.permute.xlu2 %1223 }
0x1b6e   :  { %3195 = vmatmul.msk.f32.vlgmr.msra.gmra.mxu3 %vm52_vm1, %v1224_v4 }
0x1b6f   :  { %3215 = vmatpush.msk.msra.mxu3 %vm69_vm0, %v3944_v20 }
0x1b93   :  { %v1478_v13 = vpop.permute.xlu0 %1477 }
0x1b94   :  { %3207 = vmatmul.msk.f32.vlgmr.msrb.gmra.mxu3 %vm52_vm1, %v1478_v13 }
0x1bf1   :  { %v1244_v14 = vpop.f32.mrf.mxu3 }
0x1bf2   :  { %v1248_v29 = vrot.slane %v1244_v14, 2 }
0x1bf4   :  { %v1250_v11 = vadd.f32 %v1248_v29, %v3924_v48 }
0x1bf6   :  { %v3196_v48 = vmul.f32 -1.442695, %v1250_v11 }
0x1c17   :  { %v1498_v16 = vpop.f32.mrf.mxu3 }
0x1c18   :  { %v1502_v19 = vrot.slane %v1498_v16, 4 }
0x1c1a   :  { %v1504_v17 = vadd.f32 %v1502_v19, %v3969_v27 }
0x1c1c   :  { %3430 = vtanh.f32 %v1504_v17  ;;  %v3208_v15 = vmul.f32 -1.442695, %v1504_v17 }
0x1c1e   :  { %3432 = vpow2.f32 %v3208_v15 }
0x1c22   :  { %v3431_v57 = vpop.eup %3430 }
0x1c23   :  { %1530 = vrot.lane.b32.xlu1 %v3431_v57, %s3699_s5 }
0x1c24   :  { %v3433_v21 = vpop.eup %3432 }
0x1c25   :  { %v1508_v22 = vadd.f32 1.0, %v3433_v21 }
0x1c27   :  { %3434 = vrcp.f32 %v1508_v22  ;;  %v1520_v25 = vand.u32 2147483648, %v1508_v22  ;;  %vm1514_vm9 = vweird.f32 %v1508_v22  ;;  %v1518_v28 = vand.u32 2147483647, %v1508_v22 }
0x1c28   :  { %3436 = vtanh.f32 %v1250_v11 }
0x1c29   :  { %v1521_v31 = vor.u32 1.1754944e-38, %v1520_v25  ;;  %vm1519_vm14 = vcmp.eq.f32.partialorder %v1518_v28, 8.507059e+37 }
0x1c2d   :  { %v3435_v36 = vpop.eup %3434 }
0x1c2e   :  { %v1510_v6 = vmul.f32 %v3435_v36, %v1508_v22  ;;  %vm1515_vm8 = vweird.f32 %v3435_v36  ;;  %v3437_v35 = vpop.eup %3436 }
0x1c2f   :  { %vm1516_vm13 = vmor %vm1514_vm9, %vm1515_vm8 }
0x1c30   :  { %v1511_v20 = vsub.f32 1.0, %v1510_v6 }
0x1c32   :  { %v1512_v23 = vmul.f32 %v3435_v36, %v1511_v20 }
0x1c34   :  { %v1513_v24 = vadd.f32 %v3435_v36, %v1512_v23 }
0x1c36   :  { %v1517_v30 = vsel %vm1516_vm13, %v3435_v36, %v1513_v24 }
0x1c37   :  { %v1522_v32 = vsel %vm1519_vm14, %v1521_v31, %v1517_v30 }
0x1c38   :  { %v1528_v38 = vmul.f32 %v1526_v37, %v1522_v32 }
0x1c95   :  { %v1531_v26 = vpop.permute.xlu1 %1530 }
0x1c96   :  { %v1533_v34 = vmul.f32 %v1531_v26, %v1522_v32 }
0x1c98   :  { %1535 = vrot.lane.b32.xlu2 %v1533_v34, %s3694_s24 }
0x1ca0   :  { %1276 = vrot.lane.b32.xlu2 %v3437_v35, %s3699_s5 }
0x1cf2   :  { %v1536_v39 = vpop.permute.xlu2 %1535 }
0x1cf3   :  { %v4024_v40 = vadd.f32 %v1536_v39, %v1528_v38 }
0x1cf5   :  { %3438 = vtanh.f32 %v4024_v40  ;;  %v1600_v25 = vrot.slane %v4024_v40, 6 }
0x1cf6   :  { %3440 = vpow2.f32 %v3196_v48 }
0x1cfa   :  { %v1277_v53 = vpop.permute.xlu2 %1276 }
0x1cfb   :  { %v3439_v41 = vpop.eup %3438 }
0x1cfc   :  { %1541 = vrot.lane.b32.xlu0 %v3439_v41, %s3700_s6  ;;  %v3441_v8 = vpop.eup %3440 }
0x1cfd   :  { %v1254_v42 = vadd.f32 1.0, %v3441_v8 }
0x1cff   :  { %3442 = vrcp.f32 %v1254_v42  ;;  %v1266_v50 = vand.u32 2147483648, %v1254_v42  ;;  %vm1260_vm2 = vweird.f32 %v1254_v42  ;;  %v1264_v51 = vand.u32 2147483647, %v1254_v42 }
0x1d01   :  { %v1267_v54 = vor.u32 1.1754944e-38, %v1266_v50  ;;  %vm1265_vm4 = vcmp.eq.f32.partialorder %v1264_v51, 8.507059e+37 }
0x1d05   :  { %v3443_v18 = vpop.eup %3442 }
0x1d06   :  { %v1256_v43 = vmul.f32 %v3443_v18, %v1254_v42  ;;  %vm1261_vm15 = vweird.f32 %v3443_v18 }
0x1d07   :  { %vm1262_vm3 = vmor %vm1260_vm2, %vm1261_vm15 }
0x1d08   :  { %v1257_v44 = vsub.f32 1.0, %v1256_v43 }
0x1d0a   :  { %v1258_v45 = vmul.f32 %v3443_v18, %v1257_v44 }
0x1d0c   :  { %v1259_v49 = vadd.f32 %v3443_v18, %v1258_v45 }
0x1d0e   :  { %v1263_v52 = vsel %vm1262_vm3, %v3443_v18, %v1259_v49 }
0x1d0f   :  { %v1268_v55 = vsel %vm1265_vm4, %v1267_v54, %v1263_v52 }
0x1d10   :  { %v1279_v60 = vmul.f32 %v1277_v53, %v1268_v55  ;;  %v1274_v7 = vmul.f32 %v1272_v1, %v1268_v55 }
0x1d6e   :  { %v1542_v46 = vpop.permute.xlu0 %1541 }
0x1d6f   :  { %v4028_v47 = vmul.f32 %v1542_v46, %v1522_v32 }
0x1d71   :  { %v1550_v59 = vrot.slane %v4028_v47, 4 }
0x1d73   :  { %1551 = vrot.lane.b32.xlu1 %v1550_v59, %s3701_s7 }
0x1d7b   :  { %1281 = vrot.lane.b32.xlu1 %v1279_v60, %s3694_s24 }
0x1de5   :  { %v1552_v61 = vpop.permute.xlu1 %1551 }
0x1de6   :  { %3210 = vmatmul.msk.f32.vlgmr.msra.gmra.mxu1 %vm52_vm1, %v1552_v61 }
0x1ded   :  { %v1282_v2 = vpop.permute.xlu1 %1281 }
0x1dee   :  { %v1284_v9 = vadd.f32 %v1282_v2, %v1274_v7 }
0x1e63   :  { %v1572_v33 = vpop.f32.mrf.mxu1 }
0x1e64   :  { %v1576_v62 = vrot.slane %v1572_v33, 2 }
0x1e66   :  { %v1578_v0 = vadd.f32 %v1576_v62, %v3969_v27 }
0x1e68   :  { %3444 = vtanh.f32 %v1578_v0  ;;  %v3211_v13 = vmul.f32 -1.442695, %v1578_v0 }
0x1e69   :  { %3446 = vtanh.f32 %v1284_v9  ;;  %v3224_v9 = vld [vmem:[%s4334_s1 + $0xc] sm:$0xf] }
0x1e6a   :  { %3448 = vpow2.f32 %v3211_v13  ;;  %3225 = vmatpush.msk.msra.mxu2 %vm69_vm0, %v3224_v9 }
0x1e6e   :  { %v3445_v12 = vpop.eup %3444 }
0x1e6f   :  { %1604 = vrot.lane.b32.xlu0 %v3445_v12, %s3699_s5  ;;  %v3447_v4 = vpop.eup %3446  ;;  %v4074_v12 = vld [vmem:[#allocation3 + $0xc] sm:$0xf] }
0x1e70   :  { %v3449_v14 = vpop.eup %3448  ;;  %3228 = vmatpush.msk.msrb.mxu3 %vm69_vm0, %v4074_v12  ;;  %3230 = vmatpush.msk.msra.mxu0 %vm69_vm0, %v4074_v12 }
0x1e71   :  { %v1582_v27 = vadd.f32 1.0, %v3449_v14  ;;  %3233 = vmatpush.msk.msra.mxu1 %vm69_vm0, %v4074_v12 }
0x1e73   :  { %3450 = vrcp.f32 %v1582_v27  ;;  %v1594_v15 = vand.u32 2147483648, %v1582_v27  ;;  %vm1588_vm7 = vweird.f32 %v1582_v27  ;;  %v1592_v21 = vand.u32 2147483647, %v1582_v27 }
0x1e75   :  { %v1595_v36 = vor.u32 1.1754944e-38, %v1594_v15  ;;  %vm1593_vm9 = vcmp.eq.f32.partialorder %v1592_v21, 8.507059e+37 }
0x1e77   :  { %1287 = vrot.lane.b32.xlu0 %v3447_v4, %s3700_s6 }
0x1e79   :  { %v3451_v56 = vpop.eup %3450 }
0x1e7a   :  { %v1584_v16 = vmul.f32 %v3451_v56, %v1582_v27  ;;  %vm1589_vm5 = vweird.f32 %v3451_v56 }
0x1e7b   :  { %vm1590_vm8 = vmor %vm1588_vm7, %vm1589_vm5 }
0x1e7c   :  { %v1585_v19 = vsub.f32 1.0, %v1584_v16 }
0x1e7e   :  { %v1586_v17 = vmul.f32 %v3451_v56, %v1585_v19  ;;  %v4095_v19 = vld [vmem:[#allocation6 + $0x3] ss:$0 sm:$0xff] }
0x1e7f   :  { %1218 = vrot.lane.b32.xlu0 %v4007_v63, %s3701_s7 }
0x1e80   :  { %v1587_v57 = vadd.f32 %v3451_v56, %v1586_v17 }
0x1e82   :  { %v1591_v22 = vsel %vm1590_vm8, %v3451_v56, %v1587_v57 }
0x1e83   :  { %v1596_v63 = vsel %vm1593_vm9, %v1595_v36, %v1591_v22 }
0x1e84   :  { %v1602_v28 = vmul.f32 %v1600_v25, %v1596_v63 }
0x1ee1   :  { %v1605_v6 = vpop.permute.xlu0 %1604 }
0x1ee2   :  { %v1607_v20 = vmul.f32 %v1605_v6, %v1596_v63 }
0x1ee4   :  { %1609 = vrot.lane.b32.xlu2 %v1607_v20, %s3694_s24 }
0x1ee9   :  { %v1288_v23 = vpop.permute.xlu0 %1287 }
0x1eea   :  { %v1290_v26 = vmul.f32 %v1288_v23, %v1268_v55 }
0x1eec   :  { %1144 = vrot.lane.b32.xlu2 %v3984_v5, %s3701_s7 }
0x1ef1   :  { %v1219_v24 = vpop.permute.xlu0 %1218 }
0x1ef2   :  { %1221 = vst.msk [vmem:[#allocation2 + $0x8] sm:$0x30] %vm311_vm11, %v1219_v24 }
0x1f3e   :  { %v1610_v29 = vpop.permute.xlu2 %1609 }
0x1f3f   :  { %v1612_v30 = vadd.f32 %v1610_v29, %v1602_v28 }
0x1f41   :  { %3452 = vtanh.f32 %v1612_v30  ;;  %v1671_v60 = vrot.slane %v1612_v30, 6 }
0x1f46   :  { %v1145_v31 = vpop.permute.xlu2 %1144 }
0x1f47   :  { %v3453_v11 = vpop.eup %3452  ;;  %1147 = vst.msk [vmem:[#allocation2 + $0x8] sm:$0xc] %vm236_vm10, %v1145_v31 }
0x1f48   :  { %1615 = vrot.lane.b32.xlu1 %v3453_v11, %s3700_s6 }
0x1f50   :  { %1292 = vrot.lane.b32.xlu1 %v1290_v26, %s3701_s7 }
0x1fba   :  { %v1616_v32 = vpop.permute.xlu1 %1615 }
0x1fbb   :  { %v1618_v5 = vmul.f32 %v1616_v32, %v1596_v63 }
0x1fbd   :  { %v1624_v34 = vrot.slane %v1618_v5, 6 }
0x1fbf   :  { %1625 = vrot.lane.b32.xlu2 %v1624_v34, %s3701_s7 }
0x1fc2   :  { %v1293_v35 = vpop.permute.xlu1 %1292 }
0x1fc3   :  { %1295 = vst.msk [vmem:[#allocation2 + $0x8] sm:$0xc0] %vm386_vm12, %v1293_v35 }
0x1fca   :  { %v1299_v37 = vld [vmem:[#allocation2 + $0x8] sm:$0xff] }
0x1fcb   :  { %3200 = vmatmul.msk.f32.gmra.mxu0 %vm52_vm1, %v1299_v37 }
0x2019   :  { %v1626_v38 = vpop.permute.xlu2 %1625 }
0x201a   :  { %3213 = vmatmul.msk.f32.vlgmr.msrb.gmra.mxu2 %vm52_vm1, %v1626_v38 }
0x201b   :  { %3245 = vmatpush.msk.msrb.mxu2 %vm69_vm0, %v4074_v12 }
0x2048   :  { %v1336_v39 = vpop.f32.mrf.mxu0 }
0x2049   :  { %v4053_v40 = vadd.f32 %v3966_v58, %v1336_v39 }
0x209d   :  { %v1646_v41 = vpop.f32.mrf.mxu2 }
0x209e   :  { %v1649_v48 = vadd.f32 %v1646_v41, %v4053_v40 }
0x20a0   :  { %3454 = vtanh.f32 %v1649_v48  ;;  %v3214_v42 = vmul.f32 -1.442695, %v1649_v48 }
0x20a2   :  { %3456 = vpow2.f32 %v3214_v42 }
0x20a6   :  { %v3455_v8 = vpop.eup %3454 }
0x20a7   :  { %1675 = vrot.lane.b32.xlu0 %v3455_v8, %s3699_s5 }
0x20a8   :  { %v3457_v18 = vpop.eup %3456 }
0x20a9   :  { %v1653_v43 = vadd.f32 1.0, %v3457_v18 }
0x20ab   :  { %3458 = vrcp.f32 %v1653_v43  ;;  %v1665_v58 = vand.u32 2147483648, %v1653_v43  ;;  %vm1659_vm14 = vweird.f32 %v1653_v43  ;;  %v1663_v50 = vand.u32 2147483647, %v1653_v43 }
0x20ad   :  { %v1666_v52 = vor.u32 1.1754944e-38, %v1665_v58  ;;  %vm1664_vm2 = vcmp.eq.f32.partialorder %v1663_v50, 8.507059e+37 }
0x20b1   :  { %v3459_v44 = vpop.eup %3458 }
0x20b2   :  { %v1655_v45 = vmul.f32 %v3459_v44, %v1653_v43  ;;  %vm1660_vm13 = vweird.f32 %v3459_v44 }
0x20b3   :  { %vm1661_vm15 = vmor %vm1659_vm14, %vm1660_vm13 }
0x20b4   :  { %v1656_v46 = vsub.f32 1.0, %v1655_v45 }
0x20b6   :  { %v1657_v49 = vmul.f32 %v3459_v44, %v1656_v46 }
0x20b8   :  { %v1658_v59 = vadd.f32 %v3459_v44, %v1657_v49 }
0x20ba   :  { %v1662_v51 = vsel %vm1661_vm15, %v3459_v44, %v1658_v59 }
0x20bb   :  { %v1667_v54 = vsel %vm1664_vm2, %v1666_v52, %v1662_v51 }
0x20bc   :  { %v1673_v61 = vmul.f32 %v1671_v60, %v1667_v54 }
0x2119   :  { %v1676_v53 = vpop.permute.xlu0 %1675 }
0x211a   :  { %v1678_v55 = vmul.f32 %v1676_v53, %v1667_v54 }
0x211c   :  { %1680 = vrot.lane.b32.xlu1 %v1678_v55, %s3694_s24 }
0x2124   :  { %1472 = vrot.lane.b32.xlu1 %v4011_v10, %s3701_s7 }
0x218e   :  { %v1681_v33 = vpop.permute.xlu1 %1680 }
0x218f   :  { %v4060_v62 = vadd.f32 %v1681_v33, %v1673_v61 }
0x2191   :  { %3460 = vtanh.f32 %v4060_v62  ;;  %v1742_v51 = vrot.slane %v4060_v62, 6 }
0x2196   :  { %v1473_v0 = vpop.permute.xlu1 %1472 }
0x2197   :  { %v3461_v1 = vpop.eup %3460  ;;  %1475 = vst.msk [vmem:[#allocation2] sm:$0xc] %vm236_vm10, %v1473_v0 }
0x2198   :  { %1686 = vrot.lane.b32.xlu2 %v3461_v1, %s3700_s6 }
0x21a0   :  { %1546 = vrot.lane.b32.xlu2 %v4028_v47, %s3701_s7 }
0x21f2   :  { %v1687_v2 = vpop.permute.xlu2 %1686 }
0x21f3   :  { %v1689_v7 = vmul.f32 %v1687_v2, %v1667_v54 }
0x21f5   :  { %1691 = vrot.lane.b32.xlu0 %v1689_v7, %s3701_s7 }
0x21fa   :  { %v1547_v10 = vpop.permute.xlu2 %1546 }
0x21fb   :  { %1549 = vst.msk [vmem:[#allocation2] sm:$0x30] %vm311_vm11, %v1547_v10 }
0x21fd   :  { %1620 = vrot.lane.b32.xlu0 %v1618_v5, %s3701_s7 }
0x2267   :  { %v1692_v47 = vpop.permute.xlu0 %1691 }
0x2268   :  { %1694 = vst.msk [vmem:[#allocation2 + $0x8] sm:$0x3] %vm164_vm6, %v1692_v47  ;;  %3216 = vmatmul.msk.f32.vlgmr.msra.gmra.mxu3 %vm52_vm1, %v1692_v47 }
0x2269   :  { %3236 = vmatpush.msk.msra.mxu3 %vm69_vm0, %v4074_v12 }
0x226f   :  { %v1621_v4 = vpop.permute.xlu0 %1620 }
0x2270   :  { %1623 = vst.msk [vmem:[#allocation2] sm:$0xc0] %vm386_vm12, %v1621_v4  ;;  %1976 = vmatmul.f32.vlgmr.msrb.gmra.mxu3 %v3698_v3 }
0x2271   :  { %3248 = vmatpush.msk.msrb.mxu3 %vm69_vm0, %v4074_v12 }
0x2277   :  { %v1916_v13 = vld [vmem:[#allocation2] sm:$0xff] }
0x2278   :  { %3226 = vmatmul.msk.f32.vlgmr.msra.gmra.mxu2 %vm52_vm1, %v1916_v13 }
0x22eb   :  { %v1714_v14 = vpop.f32.mrf.mxu3 }
0x22ec   :  { %v1718_v27 = vrot.slane %v1714_v14, 6 }
0x22ee   :  { %v1720_v56 = vadd.f32 %v1718_v27, %v4053_v40 }
0x22f0   :  { %3462 = vtanh.f32 %v1720_v56  ;;  %v3217_v6 = vmul.f32 -1.442695, %v1720_v56 }
0x22f3   :  { %v1977_v57 = vpop.f32.mrf.mxu3 }
0x22f6   :  { %v3463_v16 = vpop.eup %3462 }
0x22f7   :  { %1746 = vrot.lane.b32.xlu1 %v3463_v16, %s3699_s5 }
0x22fb   :  { %v1951_v17 = vpop.f32.mrf.mxu2 }
0x22fc   :  { %v4098_v15 = vadd.f32 %v4095_v19, %v1951_v17 }
0x22fe   :  { %v1980_v21 = vadd.f32 %v1977_v57, %v4098_v15 }
0x2300   :  { %3464 = vtanh.f32 %v1980_v21  ;;  %v3229_v36 = vmul.f32 -1.442695, %v1980_v21 }
0x2302   :  { %3466 = vpow2.f32 %v3229_v36 }
0x2303   :  { %3468 = vpow2.f32 %v3217_v6 }
0x2306   :  { %v3465_v22 = vpop.eup %3464 }
0x2307   :  { %2003 = vrot.lane.b32.xlu2 %v3465_v22, %s3699_s5 }
0x2308   :  { %v3467_v63 = vpop.eup %3466 }
0x2309   :  { %v1984_v20 = vadd.f32 1.0, %v3467_v63  ;;  %v3469_v23 = vpop.eup %3468 }
0x230a   :  { %v1724_v24 = vadd.f32 1.0, %v3469_v23 }
0x230b   :  { %3470 = vrcp.f32 %v1984_v20  ;;  %v1996_v5 = vand.u32 2147483648, %v1984_v20  ;;  %vm1990_vm4 = vweird.f32 %v1984_v20  ;;  %v1994_v34 = vand.u32 2147483647, %v1984_v20 }
0x230c   :  { %3472 = vrcp.f32 %v1724_v24  ;;  %v1736_v42 = vand.u32 2147483648, %v1724_v24  ;;  %vm1730_vm9 = vweird.f32 %v1724_v24  ;;  %v1734_v18 = vand.u32 2147483647, %v1724_v24 }
0x230d   :  { %v1997_v38 = vor.u32 1.1754944e-38, %v1996_v5  ;;  %vm1995_vm7 = vcmp.eq.f32.partialorder %v1994_v34, 8.507059e+37 }
0x230e   :  { %v1737_v44 = vor.u32 1.1754944e-38, %v1736_v42  ;;  %vm1735_vm14 = vcmp.eq.f32.partialorder %v1734_v18, 8.507059e+37 }
0x2311   :  { %v3471_v25 = vpop.eup %3470 }
0x2312   :  { %v1986_v28 = vmul.f32 %v3471_v25, %v1984_v20  ;;  %v3473_v30 = vpop.eup %3472  ;;  %vm1991_vm3 = vweird.f32 %v3471_v25 }
0x2313   :  { %v1726_v11 = vmul.f32 %v3473_v30, %v1724_v24  ;;  %vm1992_vm5 = vmor %vm1990_vm4, %vm1991_vm3  ;;  %vm1731_vm8 = vweird.f32 %v3473_v30 }
0x2314   :  { %v1987_v29 = vsub.f32 1.0, %v1986_v28  ;;  %vm1732_vm13 = vmor %vm1730_vm9, %vm1731_vm8 }
0x2315   :  { %v1727_v32 = vsub.f32 1.0, %v1726_v11 }
0x2316   :  { %v1988_v31 = vmul.f32 %v3471_v25, %v1987_v29 }
0x2317   :  { %v1728_v37 = vmul.f32 %v3473_v30, %v1727_v32 }
0x2318   :  { %v1989_v26 = vadd.f32 %v3471_v25, %v1988_v31 }
0x2319   :  { %v1729_v8 = vadd.f32 %v3473_v30, %v1728_v37 }
0x231a   :  { %v1993_v35 = vsel %vm1992_vm5, %v3471_v25, %v1989_v26 }
0x231b   :  { %v1998_v41 = vsel %vm1995_vm7, %v1997_v38, %v1993_v35  ;;  %v1733_v43 = vsel %vm1732_vm13, %v3473_v30, %v1729_v8 }
0x231c   :  { %v1738_v46 = vsel %vm1735_vm14, %v1737_v44, %v1733_v43  ;;  %v2001_v59 = vmul.f32 0.0, %v1998_v41 }
0x231d   :  { %v1744_v52 = vmul.f32 %v1742_v51, %v1738_v46 }
0x2361   :  { %v2004_v39 = vpop.permute.xlu2 %2003 }
0x2362   :  { %v2006_v48 = vmul.f32 %v2004_v39, %v1998_v41 }
0x2364   :  { %2008 = vrot.lane.b32.xlu1 %v2006_v48, %s3694_s24 }
0x2369   :  { %v1747_v45 = vpop.permute.xlu1 %1746 }
0x236a   :  { %v1749_v49 = vmul.f32 %v1747_v45, %v1738_v46 }
0x236c   :  { %1751 = vrot.lane.b32.xlu0 %v1749_v49, %s3694_s24 }
0x23d6   :  { %v2009_v58 = vpop.permute.xlu1 %2008 }
0x23d7   :  { %v4104_v50 = vadd.f32 %v2009_v58, %v2001_v59 }
0x23d9   :  { %3474 = vtanh.f32 %v4104_v50  ;;  %v2070_v59 = vrot.slane %v4104_v50, 6 }
0x23de   :  { %v1752_v53 = vpop.permute.xlu0 %1751 }
0x23df   :  { %v3475_v54 = vpop.eup %3474  ;;  %v4108_v55 = vadd.f32 %v1752_v53, %v1744_v52 }
0x23e0   :  { %2014 = vrot.lane.b32.xlu0 %v3475_v54, %s3700_s6 }
0x23e1   :  { %3476 = vtanh.f32 %v4108_v55  ;;  %v1816_v43 = vrot.slane %v4108_v55, 6 }
0x23e7   :  { %v3477_v60 = vpop.eup %3476 }
0x23e8   :  { %1757 = vrot.lane.b32.xlu2 %v3477_v60, %s3700_s6 }
0x2442   :  { %v1758_v61 = vpop.permute.xlu2 %1757 }
0x2443   :  { %v4113_v33 = vmul.f32 %v1758_v61, %v1738_v46 }
0x2445   :  { %v1766_v0 = vrot.slane %v4113_v33, 2 }
0x2447   :  { %1767 = vrot.lane.b32.xlu1 %v1766_v0, %s3701_s7 }
0x2452   :  { %v2015_v62 = vpop.permute.xlu0 %2014 }
0x2453   :  { %v2017_v1 = vmul.f32 %v2015_v62, %v1998_v41 }
0x2455   :  { %2019 = vrot.lane.b32.xlu2 %v2017_v1, %s3701_s7 }
0x24af   :  { %v2020_v2 = vpop.permute.xlu2 %2019 }
0x24b0   :  { %2022 = vst.msk [vmem:[#allocation2] sm:$0x3] %vm164_vm6, %v2020_v2 }
0x24b9   :  { %v1768_v7 = vpop.permute.xlu1 %1767 }
0x24ba   :  { %3219 = vmatmul.msk.f32.vlgmr.msrb.gmra.mxu0 %vm52_vm1, %v1768_v7 }
0x24bb   :  { %3239 = vmatpush.msk.msrb.mxu0 %vm69_vm0, %v4074_v12 }
0x24c2   :  { %3231 = vmatmul.msk.f32.vlgmr.msra.gmra.mxu0 %vm52_vm1, %v2020_v2 }
0x2537   :  { %v1788_v10 = vpop.f32.mrf.mxu0 }
0x2538   :  { %v1792_v9 = vrot.slane %v1788_v10, 4 }
0x253a   :  { %v1794_v47 = vadd.f32 %v1792_v9, %v4053_v40 }
0x253c   :  { %3478 = vtanh.f32 %v1794_v47  ;;  %v3220_v16 = vmul.f32 -1.442695, %v1794_v47 }
0x253f   :  { %v2042_v4 = vpop.f32.mrf.mxu0 }
0x2540   :  { %v2046_v13 = vrot.slane %v2042_v4, 6 }
0x2542   :  { %v3479_v14 = vpop.eup %3478  ;;  %v2048_v27 = vadd.f32 %v2046_v13, %v4098_v15 }
0x2543   :  { %1820 = vrot.lane.b32.xlu0 %v3479_v14, %s3699_s5 }
0x2544   :  { %3480 = vtanh.f32 %v2048_v27  ;;  %v3232_v17 = vmul.f32 -1.442695, %v2048_v27 }
0x2545   :  { %3482 = vpow2.f32 %v3220_v16 }
0x2546   :  { %3484 = vpow2.f32 %v3232_v17 }
0x254a   :  { %v3481_v56 = vpop.eup %3480 }
0x254b   :  { %2074 = vrot.lane.b32.xlu1 %v3481_v56, %s3699_s5  ;;  %v3483_v57 = vpop.eup %3482 }
0x254c   :  { %v1798_v21 = vadd.f32 1.0, %v3483_v57  ;;  %v3485_v22 = vpop.eup %3484 }
0x254d   :  { %v2052_v36 = vadd.f32 1.0, %v3485_v22 }
0x254e   :  { %3486 = vrcp.f32 %v1798_v21  ;;  %v1810_v30 = vand.u32 2147483648, %v1798_v21  ;;  %vm1804_vm2 = vweird.f32 %v1798_v21  ;;  %v1808_v31 = vand.u32 2147483647, %v1798_v21 }
0x254f   :  { %3488 = vrcp.f32 %v2052_v36  ;;  %v2064_v38 = vand.u32 2147483648, %v2052_v36  ;;  %vm2058_vm7 = vweird.f32 %v2052_v36  ;;  %v2062_v39 = vand.u32 2147483647, %v2052_v36 }
0x2550   :  { %v1811_v32 = vor.u32 1.1754944e-38, %v1810_v30  ;;  %vm1809_vm4 = vcmp.eq.f32.partialorder %v1808_v31, 8.507059e+37 }
0x2551   :  { %v2065_v48 = vor.u32 1.1754944e-38, %v2064_v38  ;;  %vm2063_vm9 = vcmp.eq.f32.partialorder %v2062_v39, 8.507059e+37 }
0x2554   :  { %v3487_v6 = vpop.eup %3486 }
0x2555   :  { %v1800_v63 = vmul.f32 %v3487_v6, %v1798_v21  ;;  %v3489_v23 = vpop.eup %3488  ;;  %vm1805_vm15 = vweird.f32 %v3487_v6 }
0x2556   :  { %v2054_v25 = vmul.f32 %v3489_v23, %v2052_v36  ;;  %vm1806_vm3 = vmor %vm1804_vm2, %vm1805_vm15  ;;  %vm2059_vm5 = vweird.f32 %v3489_v23 }
0x2557   :  { %v1801_v20 = vsub.f32 1.0, %v1800_v63  ;;  %vm2060_vm8 = vmor %vm2058_vm7, %vm2059_vm5 }
0x2558   :  { %v2055_v29 = vsub.f32 1.0, %v2054_v25 }
0x2559   :  { %v1802_v24 = vmul.f32 %v3487_v6, %v1801_v20 }
0x255a   :  { %v2056_v26 = vmul.f32 %v3489_v23, %v2055_v29 }
0x255b   :  { %v1803_v28 = vadd.f32 %v3487_v6, %v1802_v24 }
0x255c   :  { %v2057_v37 = vadd.f32 %v3489_v23, %v2056_v26 }
0x255d   :  { %v1807_v11 = vsel %vm1806_vm3, %v3487_v6, %v1803_v28 }
0x255e   :  { %v1812_v5 = vsel %vm1809_vm4, %v1811_v32, %v1807_v11  ;;  %v2061_v41 = vsel %vm2060_vm8, %v3489_v23, %v2057_v37 }
0x255f   :  { %v2066_v42 = vsel %vm2063_vm9, %v2065_v48, %v2061_v41  ;;  %v1818_v44 = vmul.f32 %v1816_v43, %v1812_v5 }
0x2560   :  { %v2072_v58 = vmul.f32 %v2070_v59, %v2066_v42 }
0x25b5   :  { %v1821_v34 = vpop.permute.xlu0 %1820 }
0x25b6   :  { %v1823_v35 = vmul.f32 %v1821_v34, %v1812_v5 }
0x25b8   :  { %1825 = vrot.lane.b32.xlu2 %v1823_v35, %s3694_s24 }
0x25bd   :  { %v2075_v8 = vpop.permute.xlu1 %2074 }
0x25be   :  { %v2077_v18 = vmul.f32 %v2075_v8, %v2066_v42 }
0x25c0   :  { %2079 = vrot.lane.b32.xlu0 %v2077_v18, %s3694_s24 }
0x2612   :  { %v1826_v45 = vpop.permute.xlu2 %1825 }
0x2613   :  { %v4130_v46 = vadd.f32 %v1826_v45, %v1818_v44 }
0x2615   :  { %3490 = vtanh.f32 %v4130_v46 }
0x261b   :  { %v3491_v49 = vpop.eup %3490 }
0x261c   :  { %1831 = vrot.lane.b32.xlu1 %v3491_v49, %s3700_s6 }
0x2632   :  { %v2080_v51 = vpop.permute.xlu0 %2079 }
0x2633   :  { %v2082_v52 = vadd.f32 %v2080_v51, %v2072_v58 }
0x2635   :  { %3492 = vtanh.f32 %v2082_v52  ;;  %v2144_v28 = vrot.slane %v2082_v52, 6 }
0x263b   :  { %v3493_v53 = vpop.eup %3492 }
0x263c   :  { %2085 = vrot.lane.b32.xlu2 %v3493_v53, %s3700_s6  ;;  %v1890_v53 = vrot.slane %v4130_v46, 6 }
0x268e   :  { %v1832_v54 = vpop.permute.xlu1 %1831 }
0x268f   :  { %v4136_v55 = vmul.f32 %v1832_v54, %v1812_v5 }
0x2691   :  { %v1840_v60 = vrot.slane %v4136_v55, 4 }
0x2693   :  { %1841 = vrot.lane.b32.xlu0 %v1840_v60, %s3701_s7 }
0x2696   :  { %v2086_v61 = vpop.permute.xlu2 %2085 }
0x2697   :  { %v4140_v0 = vmul.f32 %v2086_v61, %v2066_v42 }
0x2699   :  { %v2094_v62 = vrot.slane %v4140_v0, 2 }
0x269b   :  { %2095 = vrot.lane.b32.xlu1 %v2094_v62, %s3701_s7 }
0x2705   :  { %v1842_v50 = vpop.permute.xlu0 %1841 }
0x2706   :  { %3222 = vmatmul.msk.f32.vlgmr.msrb.gmra.mxu1 %vm52_vm1, %v1842_v50 }
0x2707   :  { %3242 = vmatpush.msk.msrb.mxu1 %vm69_vm0, %v4074_v12 }
0x270d   :  { %v2096_v1 = vpop.permute.xlu1 %2095 }
0x270e   :  { %3234 = vmatmul.msk.f32.vlgmr.msra.gmra.mxu1 %vm52_vm1, %v2096_v1 }
0x2783   :  { %v1862_v2 = vpop.f32.mrf.mxu1 }
0x2784   :  { %v1866_v22 = vrot.slane %v1862_v2, 2 }
0x2786   :  { %v1868_v63 = vadd.f32 %v1866_v22, %v4053_v40 }
0x2788   :  { %v3223_v40 = vmul.f32 -1.442695, %v1868_v63 }
0x278b   :  { %v2116_v7 = vpop.f32.mrf.mxu1 }
0x278c   :  { %v2120_v10 = vrot.slane %v2116_v7, 4 }
0x278e   :  { %v2122_v9 = vadd.f32 %v2120_v10, %v4098_v15 }
0x2790   :  { %3494 = vtanh.f32 %v2122_v9  ;;  %v3235_v4 = vmul.f32 -1.442695, %v2122_v9 }
0x2792   :  { %3496 = vpow2.f32 %v3235_v4 }
0x2796   :  { %v3495_v47 = vpop.eup %3494 }
0x2797   :  { %2148 = vrot.lane.b32.xlu2 %v3495_v47, %s3699_s5 }
0x2798   :  { %v3497_v13 = vpop.eup %3496 }
0x2799   :  { %v2126_v14 = vadd.f32 1.0, %v3497_v13 }
0x279b   :  { %3498 = vrcp.f32 %v2126_v14  ;;  %v2138_v57 = vand.u32 2147483648, %v2126_v14  ;;  %vm2132_vm14 = vweird.f32 %v2126_v14  ;;  %v2136_v21 = vand.u32 2147483647, %v2126_v14 }
0x279c   :  { %3500 = vtanh.f32 %v1868_v63 }
0x279d   :  { %v2139_v6 = vor.u32 1.1754944e-38, %v2138_v57  ;;  %vm2137_vm2 = vcmp.eq.f32.partialorder %v2136_v21, 8.507059e+37 }
0x27a1   :  { %v3499_v27 = vpop.eup %3498 }
0x27a2   :  { %v2128_v56 = vmul.f32 %v3499_v27, %v2126_v14  ;;  %vm2133_vm13 = vweird.f32 %v3499_v27  ;;  %v3501_v25 = vpop.eup %3500 }
0x27a3   :  { %vm2134_vm15 = vmor %vm2132_vm14, %vm2133_vm13 }
0x27a4   :  { %v2129_v12 = vsub.f32 1.0, %v2128_v56 }
0x27a6   :  { %v2130_v16 = vmul.f32 %v3499_v27, %v2129_v12 }
0x27a8   :  { %v2131_v17 = vadd.f32 %v3499_v27, %v2130_v16 }
0x27aa   :  { %v2135_v36 = vsel %vm2134_vm15, %v3499_v27, %v2131_v17 }
0x27ab   :  { %v2140_v23 = vsel %vm2137_vm2, %v2139_v6, %v2135_v36 }
0x27ac   :  { %v2146_v29 = vmul.f32 %v2144_v28, %v2140_v23 }
0x27f1   :  { %v2149_v20 = vpop.permute.xlu2 %2148 }
0x27f2   :  { %v2151_v24 = vmul.f32 %v2149_v20, %v2140_v23 }
0x27f4   :  { %2153 = vrot.lane.b32.xlu0 %v2151_v24, %s3694_s24 }
0x27fc   :  { %1894 = vrot.lane.b32.xlu0 %v3501_v25, %s3699_s5 }
0x2866   :  { %v2154_v30 = vpop.permute.xlu0 %2153 }
0x2867   :  { %v4153_v31 = vadd.f32 %v2154_v30, %v2146_v29 }
0x2869   :  { %3502 = vtanh.f32 %v4153_v31  ;;  %v2218_v57 = vrot.slane %v4153_v31, 6 }
0x286a   :  { %3504 = vpow2.f32 %v3223_v40 }
0x286e   :  { %v1895_v43 = vpop.permute.xlu0 %1894 }
0x286f   :  { %v3503_v11 = vpop.eup %3502 }
0x2870   :  { %2159 = vrot.lane.b32.xlu1 %v3503_v11, %s3700_s6  ;;  %v3505_v26 = vpop.eup %3504 }
0x2871   :  { %v1872_v32 = vadd.f32 1.0, %v3505_v26 }
0x2873   :  { %3506 = vrcp.f32 %v1872_v32  ;;  %v1884_v8 = vand.u32 2147483648, %v1872_v32  ;;  %vm1878_vm4 = vweird.f32 %v1872_v32  ;;  %v1882_v42 = vand.u32 2147483647, %v1872_v32 }
0x2875   :  { %v1885_v44 = vor.u32 1.1754944e-38, %v1884_v8  ;;  %vm1883_vm7 = vcmp.eq.f32.partialorder %v1882_v42, 8.507059e+37 }
0x2879   :  { %v3507_v5 = vpop.eup %3506 }
0x287a   :  { %v1874_v34 = vmul.f32 %v3507_v5, %v1872_v32  ;;  %vm1879_vm3 = vweird.f32 %v3507_v5 }
0x287b   :  { %vm1880_vm5 = vmor %vm1878_vm4, %vm1879_vm3 }
0x287c   :  { %v1875_v35 = vsub.f32 1.0, %v1874_v34 }
0x287e   :  { %v1876_v37 = vmul.f32 %v3507_v5, %v1875_v35 }
0x2880   :  { %v1877_v41 = vadd.f32 %v3507_v5, %v1876_v37 }
0x2882   :  { %v1881_v18 = vsel %vm1880_vm5, %v3507_v5, %v1877_v41 }
0x2883   :  { %v1886_v45 = vsel %vm1883_vm7, %v1885_v44, %v1881_v18 }
0x2884   :  { %v1897_v49 = vmul.f32 %v1895_v43, %v1886_v45  ;;  %v1892_v60 = vmul.f32 %v1890_v53, %v1886_v45 }
0x28e2   :  { %v2160_v38 = vpop.permute.xlu1 %2159 }
0x28e3   :  { %v4157_v39 = vmul.f32 %v2160_v38, %v2140_v23 }
0x28e5   :  { %v2168_v48 = vrot.slane %v4157_v39, 4 }
0x28e7   :  { %2169 = vrot.lane.b32.xlu2 %v2168_v48, %s3701_s7 }
0x28ef   :  { %1899 = vrot.lane.b32.xlu2 %v1897_v49, %s3694_s24 }
0x2941   :  { %v2170_v59 = vpop.permute.xlu2 %2169 }
0x2942   :  { %3237 = vmatmul.msk.f32.vlgmr.msra.gmra.mxu3 %vm52_vm1, %v2170_v59 }
0x2949   :  { %v1900_v54 = vpop.permute.xlu2 %1899 }
0x294a   :  { %v1902_v61 = vadd.f32 %v1900_v54, %v1892_v60 }
0x29c5   :  { %v2190_v58 = vpop.f32.mrf.mxu3 }
0x29c6   :  { %v2194_v51 = vrot.slane %v2190_v58, 2 }
0x29c8   :  { %v2196_v52 = vadd.f32 %v2194_v51, %v4098_v15 }
0x29ca   :  { %3508 = vtanh.f32 %v2196_v52  ;;  %v3238_v1 = vmul.f32 -1.442695, %v2196_v52 }
0x29cb   :  { %3510 = vtanh.f32 %v1902_v61  ;;  %v3251_v61 = vld [vmem:[%s4334_s1 + $0x10] sm:$0xf]  ;;  %s3702_s1 = smov [#allocation8]  }
0x29cc   :  { %3512 = vpow2.f32 %v3238_v1  ;;  %3252 = vmatpush.msk.msra.mxu0 %vm69_vm0, %v3251_v61  ;;  %s3131_s17 = sshll.u32 %s3702_s1, 4  ;;  %s3132_s17 = int_to_ptr.vmem [resolvable:$true] %s3131_s17 }
0x29d0   :  { %v3509_v62 = vpop.eup %3508 }
0x29d1   :  { %2222 = vrot.lane.b32.xlu1 %v3509_v62, %s3699_s5  ;;  %v3511_v50 = vpop.eup %3510  ;;  %v4202_v62 = vld [vmem:[#allocation3 + $0x10] sm:$0xf] }
0x29d2   :  { %v3513_v2 = vpop.eup %3512  ;;  %3255 = vmatpush.msk.msra.mxu1 %vm69_vm0, %v4202_v62  ;;  %3257 = vmatpush.msk.msra.mxu2 %vm69_vm0, %v4202_v62 }
0x29d3   :  { %v2200_v15 = vadd.f32 1.0, %v3513_v2  ;;  %3260 = vmatpush.msk.msra.mxu3 %vm69_vm0, %v4202_v62 }
0x29d5   :  { %3514 = vrcp.f32 %v2200_v15  ;;  %v2212_v4 = vand.u32 2147483648, %v2200_v15  ;;  %vm2206_vm9 = vweird.f32 %v2200_v15  ;;  %v2210_v13 = vand.u32 2147483647, %v2200_v15 }
0x29d7   :  { %v2213_v27 = vor.u32 1.1754944e-38, %v2212_v4  ;;  %vm2211_vm14 = vcmp.eq.f32.partialorder %v2210_v13, 8.507059e+37 }
0x29d9   :  { %1905 = vrot.lane.b32.xlu1 %v3511_v50, %s3700_s6 }
0x29db   :  { %v3515_v46 = vpop.eup %3514 }
0x29dc   :  { %v2202_v7 = vmul.f32 %v3515_v46, %v2200_v15  ;;  %vm2207_vm8 = vweird.f32 %v3515_v46 }
0x29dd   :  { %vm2208_vm13 = vmor %vm2206_vm9, %vm2207_vm8 }
0x29de   :  { %v2203_v10 = vsub.f32 1.0, %v2202_v7 }
0x29e0   :  { %v2204_v9 = vmul.f32 %v3515_v46, %v2203_v10  ;;  %v4224_v10 = vld [vmem:[#allocation6 + $0x4] ss:$0 sm:$0xff] }
0x29e1   :  { %1836 = vrot.lane.b32.xlu1 %v4136_v55, %s3701_s7 }
0x29e2   :  { %v2205_v47 = vadd.f32 %v3515_v46, %v2204_v9 }
0x29e4   :  { %v2209_v14 = vsel %vm2208_vm13, %v3515_v46, %v2205_v47 }
0x29e5   :  { %v2214_v55 = vsel %vm2211_vm14, %v2213_v27, %v2209_v14 }
0x29e6   :  { %v2220_v21 = vmul.f32 %v2218_v57, %v2214_v55 }
0x2a43   :  { %v2223_v56 = vpop.permute.xlu1 %2222 }
0x2a44   :  { %v2225_v12 = vmul.f32 %v2223_v56, %v2214_v55 }
0x2a46   :  { %2227 = vrot.lane.b32.xlu0 %v2225_v12, %s3694_s24 }
0x2a4b   :  { %v1906_v16 = vpop.permute.xlu1 %1905 }
0x2a4c   :  { %v1908_v20 = vmul.f32 %v1906_v16, %v1886_v45 }
0x2a4e   :  { %1762 = vrot.lane.b32.xlu0 %v4113_v33, %s3701_s7 }
0x2a53   :  { %v1837_v17 = vpop.permute.xlu1 %1836 }
0x2a54   :  { %1839 = vst.msk [vmem:[#allocation2 + $0x8] sm:$0x30] %vm311_vm11, %v1837_v17 }
0x2ab8   :  { %v2228_v22 = vpop.permute.xlu0 %2227 }
0x2ab9   :  { %v2230_v36 = vadd.f32 %v2228_v22, %v2220_v21 }
0x2abb   :  { %3516 = vtanh.f32 %v2230_v36  ;;  %v2289_v49 = vrot.slane %v2230_v36, 6 }
0x2ac0   :  { %v1763_v6 = vpop.permute.xlu0 %1762 }
0x2ac1   :  { %v3517_v63 = vpop.eup %3516  ;;  %1765 = vst.msk [vmem:[#allocation2 + $0x8] sm:$0xc] %vm236_vm10, %v1763_v6 }
0x2ac2   :  { %2233 = vrot.lane.b32.xlu2 %v3517_v63, %s3700_s6 }
0x2aca   :  { %1910 = vrot.lane.b32.xlu2 %v1908_v20, %s3701_s7 }
0x2b1c   :  { %v2234_v23 = vpop.permute.xlu2 %2233 }
0x2b1d   :  { %v2236_v33 = vmul.f32 %v2234_v23, %v2214_v55 }
0x2b1f   :  { %v2242_v24 = vrot.slane %v2236_v33, 6 }
0x2b21   :  { %2243 = vrot.lane.b32.xlu0 %v2242_v24, %s3701_s7 }
0x2b24   :  { %v1911_v25 = vpop.permute.xlu2 %1910 }
0x2b25   :  { %1913 = vst.msk [vmem:[#allocation2 + $0x8] sm:$0xc0] %vm386_vm12, %v1911_v25 }
0x2b2c   :  { %v1917_v28 = vld [vmem:[#allocation2 + $0x8] sm:$0xff] }
0x2b2d   :  { %3227 = vmatmul.msk.f32.gmra.mxu2 %vm52_vm1, %v1917_v28 }
0x2b93   :  { %v2244_v29 = vpop.permute.xlu0 %2243 }
0x2b94   :  { %3240 = vmatmul.msk.f32.vlgmr.msrb.gmra.mxu0 %vm52_vm1, %v2244_v29 }
0x2b95   :  { %3272 = vmatpush.msk.msrb.mxu0 %vm69_vm0, %v4202_v62 }
0x2bb0   :  { %v1954_v30 = vpop.f32.mrf.mxu2 }
0x2bb1   :  { %v4182_v31 = vadd.f32 %v4095_v19, %v1954_v30 }
0x2c11   :  { %v2264_v11 = vpop.f32.mrf.mxu0 }
0x2c12   :  { %v2267_v40 = vadd.f32 %v2264_v11, %v4182_v31 }
0x2c14   :  { %3518 = vtanh.f32 %v2267_v40  ;;  %v3241_v32 = vmul.f32 -1.442695, %v2267_v40 }
0x2c16   :  { %3520 = vpow2.f32 %v3241_v32 }
0x2c1a   :  { %v3519_v26 = vpop.eup %3518 }
0x2c1b   :  { %2293 = vrot.lane.b32.xlu1 %v3519_v26, %s3699_s5 }
0x2c1c   :  { %v3521_v5 = vpop.eup %3520 }
0x2c1d   :  { %v2271_v34 = vadd.f32 1.0, %v3521_v5 }
0x2c1f   :  { %3522 = vrcp.f32 %v2271_v34  ;;  %v2283_v19 = vand.u32 2147483648, %v2271_v34  ;;  %vm2277_vm2 = vweird.f32 %v2271_v34  ;;  %v2281_v8 = vand.u32 2147483647, %v2271_v34 }
0x2c21   :  { %v2284_v18 = vor.u32 1.1754944e-38, %v2283_v19  ;;  %vm2282_vm4 = vcmp.eq.f32.partialorder %v2281_v8, 8.507059e+37 }
0x2c25   :  { %v3523_v35 = vpop.eup %3522 }
0x2c26   :  { %v2273_v37 = vmul.f32 %v3523_v35, %v2271_v34  ;;  %vm2278_vm15 = vweird.f32 %v3523_v35 }
0x2c27   :  { %vm2279_vm3 = vmor %vm2277_vm2, %vm2278_vm15 }
0x2c28   :  { %v2274_v38 = vsub.f32 1.0, %v2273_v37 }
0x2c2a   :  { %v2275_v41 = vmul.f32 %v3523_v35, %v2274_v38 }
0x2c2c   :  { %v2276_v48 = vadd.f32 %v3523_v35, %v2275_v41 }
0x2c2e   :  { %v2280_v42 = vsel %vm2279_vm3, %v3523_v35, %v2276_v48 }
0x2c2f   :  { %v2285_v44 = vsel %vm2282_vm4, %v2284_v18, %v2280_v42 }
0x2c30   :  { %v2291_v59 = vmul.f32 %v2289_v49, %v2285_v44 }
0x2c8d   :  { %v2294_v43 = vpop.permute.xlu1 %2293 }
0x2c8e   :  { %v2296_v45 = vmul.f32 %v2294_v43, %v2285_v44 }
0x2c90   :  { %2298 = vrot.lane.b32.xlu2 %v2296_v45, %s3694_s24 }
0x2c98   :  { %2090 = vrot.lane.b32.xlu2 %v4140_v0, %s3701_s7 }
0x2cea   :  { %v2299_v58 = vpop.permute.xlu2 %2298 }
0x2ceb   :  { %v4189_v51 = vadd.f32 %v2299_v58, %v2291_v59 }
0x2ced   :  { %3524 = vtanh.f32 %v4189_v51  ;;  %v2360_v41 = vrot.slane %v4189_v51, 6 }
0x2cf2   :  { %v2091_v52 = vpop.permute.xlu2 %2090 }
0x2cf3   :  { %v3525_v53 = vpop.eup %3524  ;;  %2093 = vst.msk [vmem:[#allocation2] sm:$0xc] %vm236_vm10, %v2091_v52 }
0x2cf4   :  { %2304 = vrot.lane.b32.xlu0 %v3525_v53, %s3700_s6 }
0x2cfc   :  { %2164 = vrot.lane.b32.xlu0 %v4157_v39, %s3701_s7 }
0x2d66   :  { %v2305_v54 = vpop.permute.xlu0 %2304 }
0x2d67   :  { %v2307_v60 = vmul.f32 %v2305_v54, %v2285_v44 }
0x2d69   :  { %2309 = vrot.lane.b32.xlu1 %v2307_v60, %s3701_s7 }
0x2d6e   :  { %v2165_v0 = vpop.permute.xlu0 %2164 }
0x2d6f   :  { %2167 = vst.msk [vmem:[#allocation2] sm:$0x30] %vm311_vm11, %v2165_v0 }
0x2d71   :  { %2238 = vrot.lane.b32.xlu1 %v2236_v33, %s3701_s7 }
0x2ddb   :  { %v2310_v39 = vpop.permute.xlu1 %2309 }
0x2ddc   :  { %2312 = vst.msk [vmem:[#allocation2 + $0x8] sm:$0x3] %vm164_vm6, %v2310_v39  ;;  %3243 = vmatmul.msk.f32.vlgmr.msrb.gmra.mxu1 %vm52_vm1, %v2310_v39 }
0x2ddd   :  { %3263 = vmatpush.msk.msrb.mxu1 %vm69_vm0, %v4202_v62 }
0x2de3   :  { %v2239_v50 = vpop.permute.xlu1 %2238 }
0x2de4   :  { %2241 = vst.msk [vmem:[#allocation2] sm:$0xc0] %vm386_vm12, %v2239_v50  ;;  %2594 = vmatmul.f32.vlgmr.msra.gmra.mxu1 %v3698_v3 }
0x2de5   :  { %3275 = vmatpush.msk.msra.mxu1 %vm69_vm0, %v4202_v62 }
0x2deb   :  { %v2534_v1 = vld [vmem:[#allocation2] sm:$0xff] }
0x2dec   :  { %3253 = vmatmul.msk.f32.vlgmr.msra.gmra.mxu0 %vm52_vm1, %v2534_v1 }
0x2e59   :  { %v2332_v2 = vpop.f32.mrf.mxu1 }
0x2e5a   :  { %v2336_v15 = vrot.slane %v2332_v2, 6 }
0x2e5c   :  { %v2338_v46 = vadd.f32 %v2336_v15, %v4182_v31 }
0x2e5e   :  { %3526 = vtanh.f32 %v2338_v46  ;;  %v3244_v14 = vmul.f32 -1.442695, %v2338_v46 }
0x2e61   :  { %v2595_v47 = vpop.f32.mrf.mxu1 }
0x2e64   :  { %v3527_v7 = vpop.eup %3526 }
0x2e65   :  { %2364 = vrot.lane.b32.xlu2 %v3527_v7, %s3699_s5 }
0x2e69   :  { %v2569_v9 = vpop.f32.mrf.mxu0 }
0x2e6a   :  { %v4227_v3 = vadd.f32 %v4224_v10, %v2569_v9 }
0x2e6c   :  { %v2598_v4 = vadd.f32 %v2595_v47, %v4227_v3 }
0x2e6e   :  { %3528 = vtanh.f32 %v2598_v4  ;;  %v3256_v22 = vmul.f32 -1.442695, %v2598_v4 }
0x2e6f   :  { %3530 = vpow2.f32 %v3244_v14 }
0x2e74   :  { %v3529_v13 = vpop.eup %3528 }
0x2e75   :  { %2621 = vrot.lane.b32.xlu0 %v3529_v13, %s3699_s5  ;;  %v3531_v27 = vpop.eup %3530 }
0x2e76   :  { %v2342_v56 = vadd.f32 1.0, %v3531_v27 }
0x2e78   :  { %3532 = vrcp.f32 %v2342_v56  ;;  %v2354_v21 = vand.u32 2147483648, %v2342_v56  ;;  %vm2348_vm5 = vweird.f32 %v2342_v56  ;;  %v2352_v36 = vand.u32 2147483647, %v2342_v56 }
0x2e79   :  { %3534 = vpow2.f32 %v3256_v22 }
0x2e7a   :  { %v2355_v63 = vor.u32 1.1754944e-38, %v2354_v21  ;;  %vm2353_vm8 = vcmp.eq.f32.partialorder %v2352_v36, 8.507059e+37 }
0x2e7e   :  { %v3533_v55 = vpop.eup %3532 }
0x2e7f   :  { %v2344_v12 = vmul.f32 %v3533_v55, %v2342_v56  ;;  %vm2349_vm6 = vweird.f32 %v3533_v55  ;;  %v3535_v24 = vpop.eup %3534 }
0x2e80   :  { %vm2350_vm7 = vmor %vm2348_vm5, %vm2349_vm6  ;;  %v2602_v25 = vadd.f32 1.0, %v3535_v24 }
0x2e81   :  { %v2345_v16 = vsub.f32 1.0, %v2344_v12 }
0x2e82   :  { %3536 = vrcp.f32 %v2602_v25  ;;  %v2614_v26 = vand.u32 2147483648, %v2602_v25  ;;  %vm2608_vm13 = vweird.f32 %v2602_v25  ;;  %v2612_v32 = vand.u32 2147483647, %v2602_v25 }
0x2e83   :  { %v2346_v17 = vmul.f32 %v3533_v55, %v2345_v16 }
0x2e84   :  { %v2615_v34 = vor.u32 1.1754944e-38, %v2614_v26  ;;  %vm2613_vm15 = vcmp.eq.f32.partialorder %v2612_v32, 8.507059e+37 }
0x2e85   :  { %v2347_v57 = vadd.f32 %v3533_v55, %v2346_v17 }
0x2e87   :  { %v2351_v6 = vsel %vm2350_vm7, %v3533_v55, %v2347_v57 }
0x2e88   :  { %v2356_v23 = vsel %vm2353_vm8, %v2355_v63, %v2351_v6  ;;  %v3537_v28 = vpop.eup %3536 }
0x2e89   :  { %v2604_v29 = vmul.f32 %v3537_v28, %v2602_v25  ;;  %vm2609_vm9 = vweird.f32 %v3537_v28  ;;  %v2362_v48 = vmul.f32 %v2360_v41, %v2356_v23 }
0x2e8a   :  { %vm2610_vm14 = vmor %vm2608_vm13, %vm2609_vm9 }
0x2e8b   :  { %v2605_v30 = vsub.f32 1.0, %v2604_v29 }
0x2e8d   :  { %v2606_v11 = vmul.f32 %v3537_v28, %v2605_v30 }
0x2e8f   :  { %v2607_v40 = vadd.f32 %v3537_v28, %v2606_v11 }
0x2e91   :  { %v2611_v5 = vsel %vm2610_vm14, %v3537_v28, %v2607_v40 }
0x2e92   :  { %v2616_v37 = vsel %vm2613_vm15, %v2615_v34, %v2611_v5 }
0x2e93   :  { %v2619_v18 = vmul.f32 0.0, %v2616_v37 }
0x2ebf   :  { %v2365_v20 = vpop.permute.xlu2 %2364 }
0x2ec0   :  { %v2367_v33 = vmul.f32 %v2365_v20, %v2356_v23 }
0x2ec2   :  { %2369 = vrot.lane.b32.xlu1 %v2367_v33, %s3694_s24 }
0x2ee7   :  { %v2622_v35 = vpop.permute.xlu0 %2621 }
0x2ee8   :  { %v2624_v38 = vmul.f32 %v2622_v35, %v2616_v37 }
0x2eea   :  { %2626 = vrot.lane.b32.xlu2 %v2624_v38, %s3694_s24 }
0x2f34   :  { %v2370_v19 = vpop.permute.xlu1 %2369 }
0x2f35   :  { %v4234_v8 = vadd.f32 %v2370_v19, %v2362_v48 }
0x2f37   :  { %3538 = vtanh.f32 %v4234_v8  ;;  %v2434_v32 = vrot.slane %v4234_v8, 6 }
0x2f3d   :  { %v3539_v42 = vpop.eup %3538 }
0x2f3e   :  { %2375 = vrot.lane.b32.xlu0 %v3539_v42, %s3700_s6 }
0x2f44   :  { %v2627_v43 = vpop.permute.xlu2 %2626 }
0x2f45   :  { %v4238_v44 = vadd.f32 %v2627_v43, %v2619_v18 }
0x2f47   :  { %3540 = vtanh.f32 %v4238_v44  ;;  %v2686_v38 = vrot.slane %v4238_v44, 6 }
0x2f4d   :  { %v3541_v45 = vpop.eup %3540 }
0x2f4e   :  { %2632 = vrot.lane.b32.xlu1 %v3541_v45, %s3700_s6 }
0x2fb0   :  { %v2376_v49 = vpop.permute.xlu0 %2375 }
0x2fb1   :  { %v4242_v59 = vmul.f32 %v2376_v49, %v2356_v23 }
0x2fb3   :  { %v2384_v58 = vrot.slane %v4242_v59, 2 }
0x2fb5   :  { %2385 = vrot.lane.b32.xlu2 %v2384_v58, %s3701_s7 }
0x2fc0   :  { %v2633_v51 = vpop.permute.xlu1 %2632 }
0x2fc1   :  { %v2635_v52 = vmul.f32 %v2633_v51, %v2616_v37 }
0x2fc3   :  { %2637 = vrot.lane.b32.xlu0 %v2635_v52, %s3701_s7 }
0x300f   :  { %v2386_v53 = vpop.permute.xlu2 %2385 }
0x3010   :  { %3246 = vmatmul.msk.f32.vlgmr.msrb.gmra.mxu2 %vm52_vm1, %v2386_v53 }
0x3011   :  { %3266 = vmatpush.msk.msrb.mxu2 %vm69_vm0, %v4202_v62 }
0x3035   :  { %v2638_v54 = vpop.permute.xlu0 %2637 }
0x3036   :  { %3258 = vmatmul.msk.f32.vlgmr.msra.gmra.mxu2 %vm52_vm1, %v2638_v54 }
0x3093   :  { %v2406_v60 = vpop.f32.mrf.mxu2 }
0x3094   :  { %v2410_v0 = vrot.slane %v2406_v60, 4 }
0x3096   :  { %v2412_v61 = vadd.f32 %v2410_v0, %v4182_v31 }
0x3098   :  { %3542 = vtanh.f32 %v2412_v61  ;;  %v3247_v46 = vmul.f32 -1.442695, %v2412_v61 }
0x309e   :  { %v3543_v39 = vpop.eup %3542 }
0x309f   :  { %2438 = vrot.lane.b32.xlu1 %v3543_v39, %s3699_s5 }
0x30b9   :  { %v2658_v50 = vpop.f32.mrf.mxu2 }
0x30ba   :  { %v2662_v1 = vrot.slane %v2658_v50, 6 }
0x30bc   :  { %v2664_v2 = vadd.f32 %v2662_v1, %v4227_v3 }
0x30be   :  { %3544 = vtanh.f32 %v2664_v2  ;;  %v3259_v47 = vmul.f32 -1.442695, %v2664_v2 }
0x30bf   :  { %3546 = vpow2.f32 %v3247_v46 }
0x30c4   :  { %v3545_v15 = vpop.eup %3544 }
0x30c5   :  { %2690 = vrot.lane.b32.xlu2 %v3545_v15, %s3699_s5  ;;  %v3547_v7 = vpop.eup %3546 }
0x30c6   :  { %v2416_v9 = vadd.f32 1.0, %v3547_v7 }
0x30c8   :  { %3548 = vrcp.f32 %v2416_v9  ;;  %v2428_v17 = vand.u32 2147483648, %v2416_v9  ;;  %vm2422_vm3 = vweird.f32 %v2416_v9  ;;  %v2426_v57 = vand.u32 2147483647, %v2416_v9 }
0x30c9   :  { %3550 = vpow2.f32 %v3259_v47 }
0x30ca   :  { %v2429_v36 = vor.u32 1.1754944e-38, %v2428_v17  ;;  %vm2427_vm6 = vcmp.eq.f32.partialorder %v2426_v57, 8.507059e+37 }
0x30ce   :  { %v3549_v4 = vpop.eup %3548 }
0x30cf   :  { %v3551_v13 = vpop.eup %3550  ;;  %v2418_v14 = vmul.f32 %v3549_v4, %v2416_v9  ;;  %vm2423_vm2 = vweird.f32 %v3549_v4 }
0x30d0   :  { %v2668_v27 = vadd.f32 1.0, %v3551_v13  ;;  %vm2424_vm4 = vmor %vm2422_vm3, %vm2423_vm2 }
0x30d1   :  { %v2419_v56 = vsub.f32 1.0, %v2418_v14 }
0x30d2   :  { %3552 = vrcp.f32 %v2668_v27  ;;  %v2680_v25 = vand.u32 2147483648, %v2668_v27  ;;  %vm2674_vm7 = vweird.f32 %v2668_v27  ;;  %v2678_v28 = vand.u32 2147483647, %v2668_v27 }
0x30d3   :  { %v2420_v55 = vmul.f32 %v3549_v4, %v2419_v56 }
0x30d4   :  { %v2681_v30 = vor.u32 1.1754944e-38, %v2680_v25  ;;  %vm2679_vm9 = vcmp.eq.f32.partialorder %v2678_v28, 8.507059e+37 }
0x30d5   :  { %v2421_v16 = vadd.f32 %v3549_v4, %v2420_v55 }
0x30d7   :  { %v2425_v22 = vsel %vm2424_vm4, %v3549_v4, %v2421_v16 }
0x30d8   :  { %v3553_v12 = vpop.eup %3552  ;;  %v2430_v63 = vsel %vm2427_vm6, %v2429_v36, %v2425_v22 }
0x30d9   :  { %v2670_v21 = vmul.f32 %v3553_v12, %v2668_v27  ;;  %vm2675_vm5 = vweird.f32 %v3553_v12  ;;  %v2436_v5 = vmul.f32 %v2434_v32, %v2430_v63 }
0x30da   :  { %vm2676_vm8 = vmor %vm2674_vm7, %vm2675_vm5 }
0x30db   :  { %v2671_v6 = vsub.f32 1.0, %v2670_v21 }
0x30dd   :  { %v2672_v33 = vmul.f32 %v3553_v12, %v2671_v6 }
0x30df   :  { %v2673_v24 = vadd.f32 %v3553_v12, %v2672_v33 }
0x30e1   :  { %v2677_v29 = vsel %vm2676_vm8, %v3553_v12, %v2673_v24 }
0x30e2   :  { %v2682_v40 = vsel %vm2679_vm9, %v2681_v30, %v2677_v29 }
0x30e3   :  { %v2688_v41 = vmul.f32 %v2686_v38, %v2682_v40 }
0x3111   :  { %v2439_v20 = vpop.permute.xlu1 %2438 }
0x3112   :  { %v2441_v23 = vmul.f32 %v2439_v20, %v2430_v63 }
0x3114   :  { %2443 = vrot.lane.b32.xlu0 %v2441_v23, %s3694_s24 }
0x311f   :  { %v2691_v11 = vpop.permute.xlu2 %2690 }
0x3120   :  { %v2693_v26 = vmul.f32 %v2691_v11, %v2682_v40 }
0x3122   :  { %2695 = vrot.lane.b32.xlu1 %v2693_v26, %s3694_s24 }
0x3186   :  { %v2444_v34 = vpop.permute.xlu0 %2443 }
0x3187   :  { %v4258_v35 = vadd.f32 %v2444_v34, %v2436_v5 }
0x3189   :  { %3554 = vtanh.f32 %v4258_v35 }
0x318f   :  { %v3555_v37 = vpop.eup %3554 }
0x3190   :  { %2449 = vrot.lane.b32.xlu2 %v3555_v37, %s3700_s6 }
0x3194   :  { %v2696_v48 = vpop.permute.xlu1 %2695 }
0x3195   :  { %v2698_v19 = vadd.f32 %v2696_v48, %v2688_v41 }
0x3197   :  { %3556 = vtanh.f32 %v2698_v19  ;;  %v2756_v16 = vrot.slane %v2698_v19, 6  ;;  %v2508_v19 = vrot.slane %v4258_v35, 6 }
0x319d   :  { %v3557_v42 = vpop.eup %3556 }
0x319e   :  { %2701 = vrot.lane.b32.xlu0 %v3557_v42, %s3700_s6 }
0x31ea   :  { %v2450_v18 = vpop.permute.xlu2 %2449 }
0x31eb   :  { %v4264_v8 = vmul.f32 %v2450_v18, %v2430_v63 }
0x31ed   :  { %v2458_v43 = vrot.slane %v4264_v8, 4 }
0x31ef   :  { %2459 = vrot.lane.b32.xlu1 %v2458_v43, %s3701_s7 }
0x3210   :  { %v2702_v45 = vpop.permute.xlu0 %2701 }
0x3211   :  { %v2704_v49 = vmul.f32 %v2702_v45, %v2682_v40 }
0x3213   :  { %v2706_v58 = vrot.slane %v2704_v49, 2 }
0x3215   :  { %2707 = vrot.lane.b32.xlu2 %v2706_v58, %s3701_s7 }
0x3261   :  { %v2460_v44 = vpop.permute.xlu1 %2459 }
0x3262   :  { %3249 = vmatmul.msk.f32.vlgmr.msrb.gmra.mxu3 %vm52_vm1, %v2460_v44 }
0x3263   :  { %3269 = vmatpush.msk.msrb.mxu3 %vm69_vm0, %v4202_v62 }
0x326f   :  { %v2708_v51 = vpop.permute.xlu2 %2707 }
0x3270   :  { %3261 = vmatmul.msk.f32.vlgmr.msra.gmra.mxu3 %vm52_vm1, %v2708_v51 }
0x32e5   :  { %v2480_v52 = vpop.f32.mrf.mxu3 }
0x32e6   :  { %v2484_v47 = vrot.slane %v2480_v52, 2 }
0x32e8   :  { %v2486_v14 = vadd.f32 %v2484_v47, %v4182_v31 }
0x32ea   :  { %v3250_v31 = vmul.f32 -1.442695, %v2486_v14 }
0x32f3   :  { %v2728_v53 = vpop.f32.mrf.mxu3 }
0x32f4   :  { %v2732_v54 = vrot.slane %v2728_v53, 4 }
0x32f6   :  { %v2734_v60 = vadd.f32 %v2732_v54, %v4227_v3 }
0x32f8   :  { %3558 = vtanh.f32 %v2734_v60  ;;  %v3262_v61 = vmul.f32 -1.442695, %v2734_v60 }
0x32fa   :  { %3560 = vpow2.f32 %v3262_v61 }
0x32fe   :  { %v3559_v0 = vpop.eup %3558 }
0x32ff   :  { %2760 = vrot.lane.b32.xlu0 %v3559_v0, %s3699_s5 }
0x3300   :  { %v3561_v39 = vpop.eup %3560 }
0x3301   :  { %v2738_v50 = vadd.f32 1.0, %v3561_v39 }
0x3303   :  { %3562 = vrcp.f32 %v2738_v50  ;;  %v2750_v7 = vand.u32 2147483648, %v2738_v50  ;;  %vm2744_vm13 = vweird.f32 %v2738_v50  ;;  %v2748_v9 = vand.u32 2147483647, %v2738_v50 }
0x3304   :  { %3564 = vtanh.f32 %v2486_v14 }
0x3305   :  { %v2751_v13 = vor.u32 1.1754944e-38, %v2750_v7  ;;  %vm2749_vm15 = vcmp.eq.f32.partialorder %v2748_v9, 8.507059e+37 }
0x3309   :  { %v3563_v1 = vpop.eup %3562 }
0x330a   :  { %v2740_v2 = vmul.f32 %v3563_v1, %v2738_v50  ;;  %vm2745_vm0 = vweird.f32 %v3563_v1  ;;  %v3565_v12 = vpop.eup %3564 }
0x330b   :  { %vm2746_vm14 = vmor %vm2744_vm13, %vm2745_vm0 }
0x330c   :  { %v2741_v62 = vsub.f32 1.0, %v2740_v2 }
0x330e   :  { %v2742_v15 = vmul.f32 %v3563_v1, %v2741_v62 }
0x3310   :  { %v2743_v46 = vadd.f32 %v3563_v1, %v2742_v15 }
0x3312   :  { %v2747_v4 = vsel %vm2746_vm14, %v3563_v1, %v2743_v46 }
0x3313   :  { %v2752_v56 = vsel %vm2749_vm15, %v2751_v13, %v2747_v4 }
0x3314   :  { %v2758_v17 = vmul.f32 %v2756_v16, %v2752_v56 }
0x3371   :  { %v2761_v27 = vpop.permute.xlu0 %2760 }
0x3372   :  { %v2763_v55 = vmul.f32 %v2761_v27, %v2752_v56 }
0x3374   :  { %2765 = vrot.lane.b32.xlu1 %v2763_v55, %s3694_s24 }
0x337c   :  { %2512 = vrot.lane.b32.xlu1 %v3565_v12, %s3699_s5 }
0x33e6   :  { %v2766_v57 = vpop.permute.xlu1 %2765 }
0x33e7   :  { %v4278_v21 = vadd.f32 %v2766_v57, %v2758_v17 }
0x33e9   :  { %3566 = vtanh.f32 %v4278_v21  ;;  %v2826_v15 = vrot.slane %v4278_v21, 6 }
0x33ea   :  { %3568 = vpow2.f32 %v3250_v31 }
0x33ee   :  { %v2513_v26 = vpop.permute.xlu1 %2512 }
0x33ef   :  { %v3567_v22 = vpop.eup %3566 }
0x33f0   :  { %2771 = vrot.lane.b32.xlu2 %v3567_v22, %s3700_s6  ;;  %v3569_v36 = vpop.eup %3568 }
0x33f1   :  { %v2490_v6 = vadd.f32 1.0, %v3569_v36 }
0x33f3   :  { %3570 = vrcp.f32 %v2490_v6  ;;  %v2502_v30 = vand.u32 2147483648, %v2490_v6  ;;  %vm2496_vm3 = vweird.f32 %v2490_v6  ;;  %v2500_v11 = vand.u32 2147483647, %v2490_v6 }
0x33f5   :  { %v2503_v32 = vor.u32 1.1754944e-38, %v2502_v30  ;;  %vm2501_vm6 = vcmp.eq.f32.partialorder %v2500_v11, 8.507059e+37 }
0x33f9   :  { %v3571_v63 = vpop.eup %3570 }
0x33fa   :  { %v2492_v20 = vmul.f32 %v3571_v63, %v2490_v6  ;;  %vm2497_vm2 = vweird.f32 %v3571_v63 }
0x33fb   :  { %vm2498_vm4 = vmor %vm2496_vm3, %vm2497_vm2 }
0x33fc   :  { %v2493_v23 = vsub.f32 1.0, %v2492_v20 }
0x33fe   :  { %v2494_v33 = vmul.f32 %v3571_v63, %v2493_v23 }
0x3400   :  { %v2495_v28 = vadd.f32 %v3571_v63, %v2494_v33 }
0x3402   :  { %v2499_v40 = vsel %vm2498_vm4, %v3571_v63, %v2495_v28 }
0x3403   :  { %v2504_v5 = vsel %vm2501_vm6, %v2503_v32, %v2499_v40 }
0x3404   :  { %v2515_v34 = vmul.f32 %v2513_v26, %v2504_v5  ;;  %v2510_v18 = vmul.f32 %v2508_v19, %v2504_v5 }
0x344a   :  { %v2772_v24 = vpop.permute.xlu2 %2771 }
0x344b   :  { %v2774_v25 = vmul.f32 %v2772_v24, %v2752_v56 }
0x344d   :  { %v2776_v29 = vrot.slane %v2774_v25, 4 }
0x344f   :  { %2777 = vrot.lane.b32.xlu0 %v2776_v29, %s3701_s7 }
0x3457   :  { %2517 = vrot.lane.b32.xlu0 %v2515_v34, %s3694_s24 }
0x34c1   :  { %v2778_v37 = vpop.permute.xlu0 %2777 }
0x34c2   :  { %3264 = vmatmul.msk.f32.vlgmr.msrb.gmra.mxu1 %vm52_vm1, %v2778_v37 }
0x34c9   :  { %v2518_v42 = vpop.permute.xlu0 %2517 }
0x34ca   :  { %v2520_v43 = vadd.f32 %v2518_v42, %v2510_v18 }
0x353f   :  { %v2798_v38 = vpop.f32.mrf.mxu1 }
0x3540   :  { %v2802_v41 = vrot.slane %v2798_v38, 2 }
0x3542   :  { %v2804_v48 = vadd.f32 %v2802_v41, %v4227_v3 }
0x3544   :  { %3572 = vtanh.f32 %v2804_v48  ;;  %v3265_v58 = vmul.f32 -1.442695, %v2804_v48 }
0x3545   :  { %3574 = vtanh.f32 %v2520_v43 }
0x3546   :  { %3576 = vpow2.f32 %v3265_v58 }
0x354a   :  { %v3573_v45 = vpop.eup %3572 }
0x354b   :  { %2830 = vrot.lane.b32.xlu2 %v3573_v45, %s3699_s5  ;;  %v3575_v49 = vpop.eup %3574 }
0x354c   :  { %v3577_v44 = vpop.eup %3576 }
0x354d   :  { %v2808_v3 = vadd.f32 1.0, %v3577_v44 }
0x354f   :  { %3578 = vrcp.f32 %v2808_v3  ;;  %v2820_v60 = vand.u32 2147483648, %v2808_v3  ;;  %vm2814_vm7 = vweird.f32 %v2808_v3  ;;  %v2818_v0 = vand.u32 2147483647, %v2808_v3 }
0x3551   :  { %v2821_v39 = vor.u32 1.1754944e-38, %v2820_v60  ;;  %vm2819_vm9 = vcmp.eq.f32.partialorder %v2818_v0, 8.507059e+37 }
0x3553   :  { %2523 = vrot.lane.b32.xlu2 %v3575_v49, %s3700_s6 }
0x3555   :  { %v3579_v35 = vpop.eup %3578 }
0x3556   :  { %v2810_v51 = vmul.f32 %v3579_v35, %v2808_v3  ;;  %vm2815_vm5 = vweird.f32 %v3579_v35 }
0x3557   :  { %vm2816_vm8 = vmor %vm2814_vm7, %vm2815_vm5 }
0x3558   :  { %v2811_v52 = vsub.f32 1.0, %v2810_v51 }
0x355a   :  { %v2812_v53 = vmul.f32 %v3579_v35, %v2811_v52 }
0x355b   :  { %2454 = vrot.lane.b32.xlu2 %v4264_v8, %s3701_s7 }
0x355c   :  { %v2813_v54 = vadd.f32 %v3579_v35, %v2812_v53 }
0x355e   :  { %v2817_v61 = vsel %vm2816_vm8, %v3579_v35, %v2813_v54 }
0x355f   :  { %v2822_v8 = vsel %vm2819_vm9, %v2821_v39, %v2817_v61 }
0x3560   :  { %v2828_v46 = vmul.f32 %v2826_v15, %v2822_v8 }
0x35a5   :  { %v2831_v50 = vpop.permute.xlu2 %2830 }
0x35a6   :  { %v2833_v1 = vmul.f32 %v2831_v50, %v2822_v8 }
0x35a8   :  { %2835 = vrot.lane.b32.xlu1 %v2833_v1, %s3694_s24 }
0x35ad   :  { %v2524_v2 = vpop.permute.xlu2 %2523 }
0x35ae   :  { %v2526_v13 = vmul.f32 %v2524_v2, %v2504_v5 }
0x35b0   :  { %2380 = vrot.lane.b32.xlu1 %v4242_v59, %s3701_s7 }
0x35b5   :  { %v2455_v62 = vpop.permute.xlu2 %2454 }
0x35b6   :  { %2457 = vst.msk [vmem:[#allocation2 + $0x8] sm:$0x30] %vm311_vm11, %v2455_v62 }
0x361a   :  { %v2836_v7 = vpop.permute.xlu1 %2835 }
0x361b   :  { %v2838_v9 = vadd.f32 %v2836_v7, %v2828_v46 }
0x361d   :  { %3580 = vtanh.f32 %v2838_v9  ;;  %v2893_v26 = vrot.slane %v2838_v9, 6 }
0x3622   :  { %v2381_v47 = vpop.permute.xlu1 %2380 }
0x3623   :  { %v3581_v4 = vpop.eup %3580  ;;  %2383 = vst.msk [vmem:[#allocation2 + $0x8] sm:$0xc] %vm236_vm10, %v2381_v47 }
0x3624   :  { %2841 = vrot.lane.b32.xlu0 %v3581_v4, %s3700_s6 }
0x362c   :  { %2528 = vrot.lane.b32.xlu0 %v2526_v13, %s3701_s7 }
0x3696   :  { %v2842_v14 = vpop.permute.xlu0 %2841 }
0x3697   :  { %v2844_v59 = vmul.f32 %v2842_v14, %v2822_v8 }
0x3699   :  { %v2846_v27 = vrot.slane %v2844_v59, 6 }
0x369b   :  { %2847 = vrot.lane.b32.xlu1 %v2846_v27, %s3701_s7 }
0x369e   :  { %v2529_v56 = vpop.permute.xlu0 %2528 }
0x369f   :  { %2531 = vst.msk [vmem:[#allocation2 + $0x8] sm:$0xc0] %vm386_vm12, %v2529_v56 }
0x36a6   :  { %v2535_v55 = vld [vmem:[#allocation2 + $0x8] sm:$0xff] }
0x36a7   :  { %3254 = vmatmul.msk.f32.gmra.mxu0 %vm52_vm1, %v2535_v55 }
0x370d   :  { %v2848_v12 = vpop.permute.xlu1 %2847 }
0x370e   :  { %3267 = vmatmul.msk.f32.vlgmr.msrb.gmra.mxu2 %vm52_vm1, %v2848_v12 }
0x3724   :  { %v2572_v16 = vpop.f32.mrf.mxu0 }
0x3725   :  { %v4304_v17 = vadd.f32 %v4224_v10, %v2572_v16 }
0x3791   :  { %v2868_v57 = vpop.f32.mrf.mxu2 }
0x3792   :  { %v2871_v21 = vadd.f32 %v2868_v57, %v4304_v17 }
0x3794   :  { %3582 = vtanh.f32 %v2871_v21  ;;  %v3268_v31 = vmul.f32 -1.442695, %v2871_v21 }
0x3796   :  { %3584 = vpow2.f32 %v3268_v31 }
0x379a   :  { %v3583_v22 = vpop.eup %3582 }
0x379b   :  { %2897 = vrot.lane.b32.xlu2 %v3583_v22, %s3699_s5 }
0x379c   :  { %v3585_v36 = vpop.eup %3584 }
0x379d   :  { %v2875_v6 = vadd.f32 1.0, %v3585_v36 }
0x379f   :  { %3586 = vrcp.f32 %v2875_v6  ;;  %v2887_v10 = vand.u32 2147483648, %v2875_v6  ;;  %vm2881_vm11 = vweird.f32 %v2875_v6  ;;  %v2885_v25 = vand.u32 2147483647, %v2875_v6 }
0x37a1   :  { %v2888_v29 = vor.u32 1.1754944e-38, %v2887_v10  ;;  %vm2886_vm13 = vcmp.eq.f32.partialorder %v2885_v25, 8.507059e+37 }
0x37a5   :  { %v3587_v63 = vpop.eup %3586 }
0x37a6   :  { %v2877_v20 = vmul.f32 %v3587_v63, %v2875_v6  ;;  %vm2882_vm10 = vweird.f32 %v3587_v63 }
0x37a7   :  { %vm2883_vm0 = vmor %vm2881_vm11, %vm2882_vm10 }
0x37a8   :  { %v2878_v23 = vsub.f32 1.0, %v2877_v20 }
0x37aa   :  { %v2879_v33 = vmul.f32 %v3587_v63, %v2878_v23 }
0x37ac   :  { %v2880_v24 = vadd.f32 %v3587_v63, %v2879_v33 }
0x37ae   :  { %v2884_v28 = vsel %vm2883_vm0, %v3587_v63, %v2880_v24 }
0x37af   :  { %v2889_v11 = vsel %vm2886_vm13, %v2888_v29, %v2884_v28 }
0x37b0   :  { %v2895_v32 = vmul.f32 %v2893_v26, %v2889_v11 }
0x37f5   :  { %v2898_v30 = vpop.permute.xlu2 %2897 }
0x37f6   :  { %v2900_v40 = vmul.f32 %v2898_v30, %v2889_v11 }
0x37f8   :  { %2902 = vrot.lane.b32.xlu0 %v2900_v40, %s3694_s24 }
0x386a   :  { %v2903_v5 = vpop.permute.xlu0 %2902 }
0x386b   :  { %v2905_v34 = vadd.f32 %v2903_v5, %v2895_v32 }
0x386d   :  { %3588 = vtanh.f32 %v2905_v34  ;;  %v2962_v8 = vrot.slane %v2905_v34, 6 }
0x3873   :  { %v3589_v37 = vpop.eup %3588 }
0x3874   :  { %2908 = vrot.lane.b32.xlu1 %v3589_v37, %s3700_s6 }
0x38e6   :  { %v2909_v38 = vpop.permute.xlu1 %2908 }
0x38e7   :  { %v2911_v41 = vmul.f32 %v2909_v38, %v2889_v11 }
0x38e9   :  { %2913 = vrot.lane.b32.xlu2 %v2911_v41, %s3701_s7 }
0x3943   :  { %v2914_v48 = vpop.permute.xlu2 %2913 }
0x3944   :  { %3270 = vmatmul.msk.f32.vlgmr.msrb.gmra.mxu3 %vm52_vm1, %v2914_v48 }
0x39c7   :  { %v2934_v19 = vpop.f32.mrf.mxu3 }
0x39c8   :  { %v2938_v42 = vrot.slane %v2934_v19, 6 }
0x39ca   :  { %v2940_v18 = vadd.f32 %v2938_v42, %v4304_v17 }
0x39cc   :  { %3590 = vtanh.f32 %v2940_v18  ;;  %v3271_v45 = vmul.f32 -1.442695, %v2940_v18 }
0x39ce   :  { %3592 = vpow2.f32 %v3271_v45 }
0x39d2   :  { %v3591_v43 = vpop.eup %3590 }
0x39d3   :  { %2966 = vrot.lane.b32.xlu0 %v3591_v43, %s3699_s5 }
0x39d4   :  { %v3593_v49 = vpop.eup %3592 }
0x39d5   :  { %v2944_v58 = vadd.f32 1.0, %v3593_v49 }
0x39d7   :  { %3594 = vrcp.f32 %v2944_v58  ;;  %v2956_v53 = vand.u32 2147483648, %v2944_v58  ;;  %vm2950_vm15 = vweird.f32 %v2944_v58  ;;  %v2954_v54 = vand.u32 2147483647, %v2944_v58 }
0x39d9   :  { %v2957_v0 = vor.u32 1.1754944e-38, %v2956_v53  ;;  %vm2955_vm3 = vcmp.eq.f32.partialorder %v2954_v54, 8.507059e+37 }
0x39dd   :  { %v3595_v44 = vpop.eup %3594 }
0x39de   :  { %v2946_v3 = vmul.f32 %v3595_v44, %v2944_v58  ;;  %vm2951_vm14 = vweird.f32 %v3595_v44 }
0x39df   :  { %vm2952_vm2 = vmor %vm2950_vm15, %vm2951_vm14 }
0x39e0   :  { %v2947_v35 = vsub.f32 1.0, %v2946_v3 }
0x39e2   :  { %v2948_v51 = vmul.f32 %v3595_v44, %v2947_v35 }
0x39e4   :  { %v2949_v52 = vadd.f32 %v3595_v44, %v2948_v51 }
0x39e6   :  { %v2953_v60 = vsel %vm2952_vm2, %v3595_v44, %v2949_v52 }
0x39e7   :  { %v2958_v39 = vsel %vm2955_vm3, %v2957_v0, %v2953_v60 }
0x39e8   :  { %v2964_v1 = vmul.f32 %v2962_v8, %v2958_v39 }
0x3a45   :  { %v2967_v61 = vpop.permute.xlu0 %2966 }
0x3a46   :  { %v2969_v50 = vmul.f32 %v2967_v61, %v2958_v39 }
0x3a48   :  { %2971 = vrot.lane.b32.xlu1 %v2969_v50, %s3694_s24 }
0x3aba   :  { %v2972_v2 = vpop.permute.xlu1 %2971 }
0x3abb   :  { %v2974_v62 = vadd.f32 %v2972_v2, %v2964_v1 }
0x3abd   :  { %3596 = vtanh.f32 %v2974_v62  ;;  %v3032_v24 = vrot.slane %v2974_v62, 6 }
0x3ac3   :  { %v3597_v15 = vpop.eup %3596 }
0x3ac4   :  { %2977 = vrot.lane.b32.xlu2 %v3597_v15, %s3700_s6 }
0x3b1e   :  { %v2978_v46 = vpop.permute.xlu2 %2977 }
0x3b1f   :  { %v2980_v7 = vmul.f32 %v2978_v46, %v2958_v39 }
0x3b21   :  { %v2982_v9 = vrot.slane %v2980_v7, 2 }
0x3b23   :  { %2983 = vrot.lane.b32.xlu0 %v2982_v9, %s3701_s7 }
0x3b95   :  { %v2984_v47 = vpop.permute.xlu0 %2983 }
0x3b96   :  { %3273 = vmatmul.msk.f32.vlgmr.msrb.gmra.mxu0 %vm52_vm1, %v2984_v47 }
0x3c13   :  { %v3004_v4 = vpop.f32.mrf.mxu0 }
0x3c14   :  { %v3008_v13 = vrot.slane %v3004_v4, 4 }
0x3c16   :  { %v3010_v14 = vadd.f32 %v3008_v13, %v4304_v17 }
0x3c18   :  { %3598 = vtanh.f32 %v3010_v14  ;;  %v3274_v27 = vmul.f32 -1.442695, %v3010_v14 }
0x3c1a   :  { %3600 = vpow2.f32 %v3274_v27 }
0x3c1e   :  { %v3599_v59 = vpop.eup %3598 }
0x3c1f   :  { %3036 = vrot.lane.b32.xlu1 %v3599_v59, %s3699_s5 }
0x3c20   :  { %v3601_v56 = vpop.eup %3600 }
0x3c21   :  { %v3014_v55 = vadd.f32 1.0, %v3601_v56 }
0x3c23   :  { %3602 = vrcp.f32 %v3014_v55  ;;  %v3026_v31 = vand.u32 2147483648, %v3014_v55  ;;  %vm3020_vm6 = vweird.f32 %v3014_v55  ;;  %v3024_v36 = vand.u32 2147483647, %v3014_v55 }
0x3c25   :  { %v3027_v63 = vor.u32 1.1754944e-38, %v3026_v31  ;;  %vm3025_vm7 = vcmp.eq.f32.partialorder %v3024_v36, 8.507059e+37 }
0x3c29   :  { %v3603_v12 = vpop.eup %3602 }
0x3c2a   :  { %v3016_v16 = vmul.f32 %v3603_v12, %v3014_v55  ;;  %vm3021_vm4 = vweird.f32 %v3603_v12 }
0x3c2b   :  { %vm3022_vm5 = vmor %vm3020_vm6, %vm3021_vm4 }
0x3c2c   :  { %v3017_v57 = vsub.f32 1.0, %v3016_v16 }
0x3c2e   :  { %v3018_v21 = vmul.f32 %v3603_v12, %v3017_v57 }
0x3c30   :  { %v3019_v22 = vadd.f32 %v3603_v12, %v3018_v21 }
0x3c32   :  { %v3023_v6 = vsel %vm3022_vm5, %v3603_v12, %v3019_v22 }
0x3c33   :  { %v3028_v23 = vsel %vm3025_vm7, %v3027_v63, %v3023_v6 }
0x3c34   :  { %v3034_v10 = vmul.f32 %v3032_v24, %v3028_v23 }
0x3c91   :  { %v3037_v20 = vpop.permute.xlu1 %3036 }
0x3c92   :  { %v3039_v33 = vmul.f32 %v3037_v20, %v3028_v23 }
0x3c94   :  { %3041 = vrot.lane.b32.xlu2 %v3039_v33, %s3694_s24 }
0x3cee   :  { %v3042_v25 = vpop.permute.xlu2 %3041 }
0x3cef   :  { %v3044_v28 = vadd.f32 %v3042_v25, %v3034_v10 }
0x3cf1   :  { %3604 = vtanh.f32 %v3044_v28  ;;  %v3102_v52 = vrot.slane %v3044_v28, 6 }
0x3cf7   :  { %v3605_v29 = vpop.eup %3604 }
0x3cf8   :  { %3047 = vrot.lane.b32.xlu0 %v3605_v29, %s3700_s6 }
0x3d6a   :  { %v3048_v30 = vpop.permute.xlu0 %3047 }
0x3d6b   :  { %v3050_v11 = vmul.f32 %v3048_v30, %v3028_v23 }
0x3d6d   :  { %v3052_v40 = vrot.slane %v3050_v11, 4 }
0x3d6f   :  { %3053 = vrot.lane.b32.xlu1 %v3052_v40, %s3701_s7 }
0x3de1   :  { %v3054_v26 = vpop.permute.xlu1 %3053 }
0x3de2   :  { %3276 = vmatmul.msk.f32.vlgmr.msra.gmra.mxu1 %vm52_vm1, %v3054_v26 }
0x3e5f   :  { %v3074_v32 = vpop.f32.mrf.mxu1 }
0x3e60   :  { %v3078_v5 = vrot.slane %v3074_v32, 2 }
0x3e62   :  { %v3080_v34 = vadd.f32 %v3078_v5, %v4304_v17 }
0x3e64   :  { %3606 = vtanh.f32 %v3080_v34  ;;  %v3277_v38 = vmul.f32 -1.442695, %v3080_v34 }
0x3e66   :  { %3608 = vpow2.f32 %v3277_v38 }
0x3e6a   :  { %v3607_v37 = vpop.eup %3606 }
0x3e6b   :  { %3106 = vrot.lane.b32.xlu2 %v3607_v37, %s3699_s5 }
0x3e6c   :  { %v3609_v41 = vpop.eup %3608 }
0x3e6d   :  { %v3084_v48 = vadd.f32 1.0, %v3609_v41 }
0x3e6f   :  { %3610 = vrcp.f32 %v3084_v48  ;;  %v3096_v49 = vand.u32 2147483648, %v3084_v48  ;;  %vm3090_vm1 = vweird.f32 %v3084_v48  ;;  %v3094_v58 = vand.u32 2147483647, %v3084_v48 }
0x3e71   :  { %v3097_v44 = vor.u32 1.1754944e-38, %v3096_v49  ;;  %vm3095_vm10 = vcmp.eq.f32.partialorder %v3094_v58, 8.507059e+37 }
0x3e75   :  { %v3611_v19 = vpop.eup %3610 }
0x3e76   :  { %v3086_v42 = vmul.f32 %v3611_v19, %v3084_v48  ;;  %vm3091_vm8 = vweird.f32 %v3611_v19 }
0x3e77   :  { %vm3092_vm9 = vmor %vm3090_vm1, %vm3091_vm8 }
0x3e78   :  { %v3087_v18 = vsub.f32 1.0, %v3086_v42 }
0x3e7a   :  { %v3088_v43 = vmul.f32 %v3611_v19, %v3087_v18 }
0x3e7c   :  { %v3089_v45 = vadd.f32 %v3611_v19, %v3088_v43 }
0x3e7e   :  { %v3093_v17 = vsel %vm3092_vm9, %v3611_v19, %v3089_v45 }
0x3e7f   :  { %v3098_v35 = vsel %vm3095_vm10, %v3097_v44, %v3093_v17 }
0x3e80   :  { %v3104_v53 = vmul.f32 %v3102_v52, %v3098_v35 }
0x3ec5   :  { %v3107_v3 = vpop.permute.xlu2 %3106 }
0x3ec6   :  { %v3109_v51 = vmul.f32 %v3107_v3, %v3098_v35 }
0x3ec8   :  { %3111 = vrot.lane.b32.xlu0 %v3109_v51, %s3694_s24 }
0x3f3a   :  { %v3112_v54 = vpop.permute.xlu0 %3111 }
0x3f3b   :  { %v3114_v60 = vadd.f32 %v3112_v54, %v3104_v53 }
0x3f3d   :  { %3612 = vtanh.f32 %v3114_v60 }
0x3f43   :  { %v3613_v0 = vpop.eup %3612 }
0x3f44   :  { %3117 = vrot.lane.b32.xlu1 %v3613_v0, %s3700_s6 }
0x3fb6   :  { %v3118_v61 = vpop.permute.xlu1 %3117 }
0x3fb7   :  { %v3120_v39 = vmul.f32 %v3118_v61, %v3098_v35 }
0x3fb9   :  { %3122 = vrot.lane.b32.xlu2 %v3120_v39, %s3701_s7 }
0x4013   :  { %v3123_v50 = vpop.permute.xlu2 %3122 }
0x4014   :  { %3125 = vst.msk [vmem:[#allocation8 - $0x6] sm:$0xc0] %vm386_vm12, %v3123_v50 }
0x4015   :  { %3136 = dma.vmem_to_hbm [thread:$0]  %s3132_s17, 32, %s3134_s20, [#allocation5]  }
0x4016   :  { %3690 = dma.done.wait [#allocation5], 32  }
0x4017   :  { %3691 = vsyncadd [#allocation5], 4294967264 }
0x4018   :  { %3141 = vsyncpa [#allocation4], 1 }
0x4019   :  { %3142 = vsyncpa [#allocation7], 1 }
0x401a   :  { %3143 = vsyncpa [#allocation5], 1 }

</bundles_post_ra>
